<compile_context>
chip_gen: v7x
topology: tpu7x:2x2x1
jax: 0.10.0
libtpu: 0.0.40
codegen_flags: <defaults>
</compile_context>

<pallas_src>
import math

import jax
import jax.numpy as jnp
from jax.experimental import pallas as pl
from jax.experimental.pallas import tpu as pltpu


def _tpa_kernel(bias_ref, z_ref, t_ref, wq_ref, wk_ref, wv_ref, wo_ref,
                bo_ref, p_ref, out_ref):
    """One tile of TM residue-pairs.

    bias_ref : VMEM [S, HC]      f32   1e9*(mask-1), pre-broadcast along lanes
    z_ref    : VMEM [TM, c_z]    bf16
    t_ref    : VMEM [S, TM, c_t] bf16
    wq_ref   : VMEM [c_z, HC]    bf16  (1/sqrt(C) folded in)
    wk_ref   : VMEM [c_t, HC]    bf16
    wv_ref   : VMEM [c_t, HC]    bf16
    wo_ref   : VMEM [HC, c_z]    bf16
    bo_ref   : VMEM [1, c_z]     f32
    p_ref    : VMEM [HC, HC]     f32   block-diagonal head-membership matrix
    out_ref  : VMEM [TM, c_z]    f32
    """
    S, TM, c_t = t_ref.shape
    HC = wq_ref.shape[1]

    # --- projections: bf16 MXU inputs, f32 accumulation ----------------------
    q = jnp.dot(z_ref[...], wq_ref[...],
                preferred_element_type=jnp.float32)                   # [TM, HC]

    # K / V for all templates from two lane-aligned matmuls over the merged
    # [S*TM, c_t] slab (separate Wk / Wv projections avoid the cross-lane
    # relayout a fused [.., 2*HC] output would need when sliced in half).
    t_flat = t_ref[...].reshape(S * TM, c_t)                          # bf16
    k_all = jnp.dot(t_flat, wk_ref[...],
                    preferred_element_type=jnp.float32)               # [S*TM, HC]
    v_all = jnp.dot(t_flat, wv_ref[...],
                    preferred_element_type=jnp.float32).reshape(S, TM, HC)

    # --- per-head scores, broadcast back to all HC lanes of the head ---------
    # P is block-diagonal (1 within a head), so (q*k) @ P == per-head score
    # replicated across that head's C lanes: everything downstream stays
    # [.., HC]-lane-dense (no [.., H] narrow vregs, no per-template matmuls).
    qk = k_all.reshape(S, TM, HC) * q[None, :, :]                     # f32
    scores = jnp.dot(qk.reshape(S * TM, HC), p_ref[...],
                     preferred_element_type=jnp.float32).reshape(S, TM, HC)
    scores = scores + bias_ref[...][:, None, :]                       # mask bias

    # --- masked, numerically stable softmax over the template axis -----------
    # Leading-axis array reductions: lane-preserving, small live set.
    m = jnp.max(scores, axis=0, keepdims=True)                        # [1, TM, HC]
    w = jnp.exp(scores - m)                                           # EUP, [S, TM, HC]
    den = jnp.sum(w, axis=0)                                          # [TM, HC]
    num = jnp.sum(w * v_all, axis=0)                                  # [TM, HC]

    inv = pl.reciprocal(den, approx=True)                             # EUP slot
    o = (num * inv).astype(wo_ref.dtype)                              # bf16 for MXU

    out = jnp.dot(o, wo_ref[...], preferred_element_type=jnp.float32)
    out_ref[...] = (out + bo_ref[...]).astype(out_ref.dtype)          # f32


def _vmem_budget_bytes():
    """Per-TensorCore VMEM limit with headroom (generation-aware)."""
    try:
        cap = int(pltpu.get_tpu_info().vmem_capacity_bytes)
    except Exception:
        try:
            kind = jax.devices()[0].device_kind.lower()
            cap = 64 * 1024 * 1024 if "v7" in kind else 128 * 1024 * 1024
        except Exception:
            cap = 64 * 1024 * 1024          # smallest current generation: safe
    # ~70% of physical: ~45 MiB on 64-MiB parts (v7x), ~90 MiB on v5e/v6e.
    return int(cap * 0.70)


def _pick_tile(N, S, c_t, c_z, HC, tile_m_max, vmem_limit):
    """Largest row-tile fitting the VMEM budget (HBM-bound kernel => go big)."""
    per_row = (3 * S * c_t * 2          # t tile, bf16, up to triple-buffered
               + 2 * c_z * 2            # z tile, bf16, double-buffered
               + 2 * c_z * 4            # out tile, f32, double-buffered
               + 4 * HC * (8 + 5 * S))  # f32 intermediates (k/v/scores/w/num/..)
    tm = int((vmem_limit * 0.6) // per_row)   # slack for compiler scratch
    tm = min(tm, int(tile_m_max))
    # keep >= ~8 grid steps when N is large (both v7x TensorCores get work and
    # the DMA pipeline has depth), but never shrink below a pipeline-efficient
    # ~512-row slab.
    tm = min(tm, max(512, -(-N // 8)))
    tm = min(tm, N)
    tm = max(16, (tm // 16) * 16)       # bf16 sublane-pack alignment
    return tm


def template_pointwise_attention(t, z, template_mask, params, *, no_heads,
                                 c_hidden, tile_m=4096,
                                 compute_dtype=jnp.bfloat16,
                                 vmem_limit_bytes=None):
    """Pallas wrapper. Returns the [N_res, N_res, c_z] pair-embedding update (f32)."""
    S, Nr, Nc, c_t = t.shape
    c_z = z.shape[-1]
    N = Nr * Nc
    H, C = no_heads, c_hidden
    HC = H * C

    if template_mask is None:
        template_mask = jnp.ones((S,), jnp.float32)
    bias = 1e9 * (template_mask.astype(jnp.float32) - 1.0)            # [S]
    bias_hc = jnp.broadcast_to(bias[:, None], (S, HC)).astype(jnp.float32)

    wq, wk, wv, wo, bo = params
    # Fold the 1/sqrt(C) softmax scale into Wq.
    wq_s = (wq.astype(jnp.float32) * (1.0 / math.sqrt(C))).astype(compute_dtype)
    wk_c = wk.astype(compute_dtype)
    wv_c = wv.astype(compute_dtype)
    wo_c = wo.astype(compute_dtype)
    bo2 = bo.astype(jnp.float32).reshape(1, c_z)

    # Block-diagonal head-membership matrix: (q*k) @ P broadcasts the per-head
    # score to all C lanes of that head.  Hoisted out of the kernel (constant
    # index_map -> stays VMEM-resident).
    heads = jnp.arange(HC, dtype=jnp.int32) // C
    p_mat = (heads[:, None] == heads[None, :]).astype(jnp.float32)    # [HC, HC]

    # Stream the big tensors as bf16 (no f32 up-cast / extra HBM pass).
    t2 = t.reshape(S, N, c_t).astype(compute_dtype)
    z2 = z.reshape(N, c_z).astype(compute_dtype)

    vmem_limit = (int(vmem_limit_bytes) if vmem_limit_bytes is not None
                  else _vmem_budget_bytes())
    tm = _pick_tile(N, S, c_t, c_z, HC, tile_m, vmem_limit)

    n_pad = (-N) % tm
    if n_pad:                                          # masked tail via zero pad
        t2 = jnp.pad(t2, ((0, 0), (0, n_pad), (0, 0)))
        z2 = jnp.pad(z2, ((0, n_pad), (0, 0)))
    Np = N + n_pad
    n_steps = Np // tm

    # t carries ~2x the bytes of z+out: triple-buffer it when the grid is deep
    # enough for the extra window to help hide DMA jitter.
    if n_steps >= 4:
        t_spec = pl.BlockSpec((S, tm, c_t), lambda i: (0, i, 0),
                              pipeline_mode=pl.Buffered(3))
    else:
        t_spec = pl.BlockSpec((S, tm, c_t), lambda i: (0, i, 0))

    cost = pl.CostEstimate(
        flops=2 * Np * HC * (2 * c_z + 2 * S * c_t + S * HC),
        transcendentals=Np * S * HC,
        bytes_accessed=Np * (2 * S * c_t + 2 * c_z + 4 * c_z))

    out = pl.pallas_call(
        _tpa_kernel,
        out_shape=jax.ShapeDtypeStruct((Np, c_z), jnp.float32),
        grid_spec=pltpu.PrefetchScalarGridSpec(
            num_scalar_prefetch=0,
            grid=(n_steps,),
            in_specs=[
                pl.BlockSpec((S, HC), lambda i: (0, 0)),       # bias (lane-dense)
                pl.BlockSpec((tm, c_z), lambda i: (i, 0)),     # z tile
                t_spec,                                        # t tile
                pl.BlockSpec((c_z, HC), lambda i: (0, 0)),     # Wq (scaled)
                pl.BlockSpec((c_t, HC), lambda i: (0, 0)),     # Wk
                pl.BlockSpec((c_t, HC), lambda i: (0, 0)),     # Wv
                pl.BlockSpec((HC, c_z), lambda i: (0, 0)),     # Wo
                pl.BlockSpec((1, c_z), lambda i: (0, 0)),      # bo
                pl.BlockSpec((HC, HC), lambda i: (0, 0)),      # P
            ],
            out_specs=pl.BlockSpec((tm, c_z), lambda i: (i, 0)),
        ),
        compiler_params=pltpu.CompilerParams(
            dimension_semantics=("parallel",),
            vmem_limit_bytes=vmem_limit),
        cost_estimate=cost,
    )(bias_hc, z2, t2, wq_s, wk_c, wv_c, wo_c, bo2, p_mat)

    if n_pad:
        out = out[:N]
    return out.reshape(Nr, Nc, c_z)


def _reference(t, z, mask, params, *, no_heads, c_hidden):
    """Pure-JAX f32 reference mirroring the PyTorch forward pass."""
    wq, wk, wv, wo, bo = params
    S, Nr, _, c_t = t.shape
    H, C = no_heads, c_hidden
    q = (z @ wq) / math.sqrt(C)                                      # [Nr,Nr,HC]
    k = jnp.einsum('sijc,ck->sijk', t, wk)
    v = jnp.einsum('sijc,ck->sijk', t, wv)
    q = q.reshape(Nr, Nr, H, C)
    k = k.reshape(S, Nr, Nr, H, C)
    v = v.reshape(S, Nr, Nr, H, C)
    bias = 1e9 * (mask - 1.0)
    logits = jnp.einsum('ijhc,sijhc->ijhs', q, k) + bias[None, None, None, :]
    a = jax.nn.softmax(logits, axis=-1)
    o = jnp.einsum('ijhs,sijhc->ijhc', a, v).reshape(Nr, Nr, H * C)
    return o @ wo + bo


if __name__ == "__main__":
    key = jax.random.PRNGKey(0)
    c_t, c_z, c_hidden, no_heads = 16, 32, 16, 4
    n_templ, n_res = 4, 16
    HC = no_heads * c_hidden

    ks = jax.random.split(key, 7)
    t = jax.random.normal(ks[0], (n_templ, n_res, n_res, c_t), jnp.float32)
    z = jax.random.normal(ks[1], (n_res, n_res, c_z), jnp.float32)
    template_mask = jnp.array([1.0, 1.0, 0.0, 1.0], jnp.float32)

    # Deterministic synthetic parameters (math layout: y = x @ W (+ b)).
    wq = jax.random.normal(ks[2], (c_z, HC), jnp.float32) * 0.1
    wk = jax.random.normal(ks[3], (c_t, HC), jnp.float32) * 0.1
    wv = jax.random.normal(ks[4], (c_t, HC), jnp.float32) * 0.1
    wo = jax.random.normal(ks[5], (HC, c_z), jnp.float32) * 0.1
    bo = jax.random.normal(ks[6], (c_z,), jnp.float32) * 0.1
    params = (wq, wk, wv, wo, bo)

    out = template_pointwise_attention(
        t, z, template_mask, params,
        no_heads=no_heads, c_hidden=c_hidden)
    out = jax.block_until_ready(out)

    # Reference in f32 on the same bf16-quantised tensors the kernel streams.
    bf = lambda x: x.astype(jnp.bfloat16).astype(jnp.float32)
    ref_params = (bf(wq), bf(wk), bf(wv), bf(wo), bo)
    ref = _reference(bf(t), bf(z), template_mask, ref_params,
                     no_heads=no_heads, c_hidden=c_hidden)

    err = float(jnp.max(jnp.abs(out.astype(jnp.float32) - ref)))
    assert out.shape == (n_res, n_res, c_z), out.shape
    assert err < 3e-2, f"max abs err vs reference: {err}"
    print("KERNEL_OK")
</pallas_src>

<mosaic_0001>
module attributes {stable_mosaic.version = 11 : i64} {
  func.func @_tpa_kernel(%arg0: i32, %arg1: memref<4x64xf32, #tpu.memory_space<vmem>>, %arg2: memref<256x32xbf16, #tpu.memory_space<vmem>>, %arg3: memref<4x256x16xbf16, #tpu.memory_space<vmem>>, %arg4: memref<32x64xbf16, #tpu.memory_space<vmem>>, %arg5: memref<16x64xbf16, #tpu.memory_space<vmem>>, %arg6: memref<16x64xbf16, #tpu.memory_space<vmem>>, %arg7: memref<64x32xbf16, #tpu.memory_space<vmem>>, %arg8: memref<1x32xf32, #tpu.memory_space<vmem>>, %arg9: memref<64x64xf32, #tpu.memory_space<vmem>>, %arg10: memref<256x32xf32, #tpu.memory_space<vmem>>) attributes {dimension_semantics = [#tpu.dimension_semantics<parallel>], iteration_bounds = array<i64: 1>, scalar_prefetch = 0 : i64, scratch_operands = 0 : i64, tpu.core_type = #tpu.core_type<tc>, window_params = [{pipeline_mode = #tpu.pipeline_mode<synchronous>, transform_indices = @transform_0, window_bounds = array<i64: 4, 64>}, {transform_indices = @transform_1, window_bounds = array<i64: 256, 32>}, {transform_indices = @transform_2, window_bounds = array<i64: 4, 256, 16>}, {pipeline_mode = #tpu.pipeline_mode<synchronous>, transform_indices = @transform_3, window_bounds = array<i64: 32, 64>}, {pipeline_mode = #tpu.pipeline_mode<synchronous>, transform_indices = @transform_4, window_bounds = array<i64: 16, 64>}, {pipeline_mode = #tpu.pipeline_mode<synchronous>, transform_indices = @transform_5, window_bounds = array<i64: 16, 64>}, {pipeline_mode = #tpu.pipeline_mode<synchronous>, transform_indices = @transform_6, window_bounds = array<i64: 64, 32>}, {pipeline_mode = #tpu.pipeline_mode<synchronous>, transform_indices = @transform_7, window_bounds = array<i64: 1, 32>}, {pipeline_mode = #tpu.pipeline_mode<synchronous>, transform_indices = @transform_8, window_bounds = array<i64: 64, 64>}, {transform_indices = @transform_9, window_bounds = array<i64: 256, 32>}]} {
    %c0 = arith.constant 0 : index
    %c0_0 = arith.constant 0 : index
    %0 = vector.load %arg2[%c0, %c0_0] : memref<256x32xbf16, #tpu.memory_space<vmem>>, vector<256x32xbf16>
    %c0_1 = arith.constant 0 : index
    %c0_2 = arith.constant 0 : index
    %1 = vector.load %arg4[%c0_1, %c0_2] : memref<32x64xbf16, #tpu.memory_space<vmem>>, vector<32x64xbf16>
    %cst = arith.constant dense<0.000000e+00> : vector<256x64xf32>
    %2 = tpu.matmul %0, %1, %cst {dimension_numbers = #tpu.dot_dimension_numbers<[1], [0], [0], [1], [0, 0, 1, 1], [], []>} : vector<256x32xbf16>, vector<32x64xbf16>, vector<256x64xf32> -> vector<256x64xf32>
    %c0_3 = arith.constant 0 : index
    %c0_4 = arith.constant 0 : index
    %c0_5 = arith.constant 0 : index
    %3 = vector.load %arg3[%c0_3, %c0_4, %c0_5] : memref<4x256x16xbf16, #tpu.memory_space<vmem>>, vector<4x256x16xbf16>
    %4 = vector.shape_cast %3 : vector<4x256x16xbf16> to vector<1024x16xbf16>
    %c0_6 = arith.constant 0 : index
    %c0_7 = arith.constant 0 : index
    %5 = vector.load %arg5[%c0_6, %c0_7] : memref<16x64xbf16, #tpu.memory_space<vmem>>, vector<16x64xbf16>
    %cst_8 = arith.constant dense<0.000000e+00> : vector<1024x64xf32>
    %6 = tpu.matmul %4, %5, %cst_8 {dimension_numbers = #tpu.dot_dimension_numbers<[1], [0], [0], [1], [0, 0, 1, 1], [], []>} : vector<1024x16xbf16>, vector<16x64xbf16>, vector<1024x64xf32> -> vector<1024x64xf32>
    %c0_9 = arith.constant 0 : index
    %c0_10 = arith.constant 0 : index
    %7 = vector.load %arg6[%c0_9, %c0_10] : memref<16x64xbf16, #tpu.memory_space<vmem>>, vector<16x64xbf16>
    %cst_11 = arith.constant dense<0.000000e+00> : vector<1024x64xf32>
    %8 = tpu.matmul %4, %7, %cst_11 {dimension_numbers = #tpu.dot_dimension_numbers<[1], [0], [0], [1], [0, 0, 1, 1], [], []>} : vector<1024x16xbf16>, vector<16x64xbf16>, vector<1024x64xf32> -> vector<1024x64xf32>
    %9 = vector.shape_cast %8 : vector<1024x64xf32> to vector<4x256x64xf32>
    %10 = vector.shape_cast %6 : vector<1024x64xf32> to vector<4x256x64xf32>
    %11 = vector.shape_cast %2 : vector<256x64xf32> to vector<1x256x64xf32>
    %12 = vector.broadcast %11 : vector<1x256x64xf32> to vector<4x256x64xf32>
    %13 = arith.mulf %10, %12 : vector<4x256x64xf32>
    %14 = vector.shape_cast %13 : vector<4x256x64xf32> to vector<1024x64xf32>
    %c0_12 = arith.constant 0 : index
    %c0_13 = arith.constant 0 : index
    %15 = vector.load %arg9[%c0_12, %c0_13] : memref<64x64xf32, #tpu.memory_space<vmem>>, vector<64x64xf32>
    %cst_14 = arith.constant dense<0.000000e+00> : vector<1024x64xf32>
    %16 = tpu.matmul %14, %15, %cst_14 {dimension_numbers = #tpu.dot_dimension_numbers<[1], [0], [0], [1], [0, 0, 1, 1], [], []>} : vector<1024x64xf32>, vector<64x64xf32>, vector<1024x64xf32> -> vector<1024x64xf32>
    %17 = vector.shape_cast %16 : vector<1024x64xf32> to vector<4x256x64xf32>
    %c0_15 = arith.constant 0 : index
    %c0_16 = arith.constant 0 : index
    %18 = vector.load %arg1[%c0_15, %c0_16] : memref<4x64xf32, #tpu.memory_space<vmem>>, vector<4x64xf32>
    %19 = vector.shape_cast %18 : vector<4x64xf32> to vector<4x1x64xf32>
    %20 = vector.broadcast %19 : vector<4x1x64xf32> to vector<4x256x64xf32>
    %21 = arith.addf %17, %20 : vector<4x256x64xf32>
    %cst_17 = arith.constant dense<0xFF800000> : vector<256x64xf32>
    %22 = vector.multi_reduction <maximumf>, %21, %cst_17 [0] : vector<4x256x64xf32> to vector<256x64xf32>
    %23 = vector.shape_cast %22 : vector<256x64xf32> to vector<1x256x64xf32>
    %24 = vector.broadcast %23 : vector<1x256x64xf32> to vector<4x256x64xf32>
    %25 = arith.subf %21, %24 : vector<4x256x64xf32>
    %26 = math.exp %25 : vector<4x256x64xf32>
    %cst_18 = arith.constant dense<0.000000e+00> : vector<256x64xf32>
    %27 = vector.multi_reduction <add>, %26, %cst_18 [0] : vector<4x256x64xf32> to vector<256x64xf32>
    %28 = arith.mulf %26, %9 : vector<4x256x64xf32>
    %cst_19 = arith.constant dense<0.000000e+00> : vector<256x64xf32>
    %29 = vector.multi_reduction <add>, %28, %cst_19 [0] : vector<4x256x64xf32> to vector<256x64xf32>
    %30 = tpu.reciprocal %27 {approx = true} : vector<256x64xf32> -> vector<256x64xf32>
    %31 = arith.mulf %29, %30 : vector<256x64xf32>
    %32 = arith.truncf %31 : vector<256x64xf32> to vector<256x64xbf16>
    %c0_20 = arith.constant 0 : index
    %c0_21 = arith.constant 0 : index
    %33 = vector.load %arg7[%c0_20, %c0_21] : memref<64x32xbf16, #tpu.memory_space<vmem>>, vector<64x32xbf16>
    %cst_22 = arith.constant dense<0.000000e+00> : vector<256x32xf32>
    %34 = tpu.matmul %32, %33, %cst_22 {dimension_numbers = #tpu.dot_dimension_numbers<[1], [0], [0], [1], [0, 0, 1, 1], [], []>} : vector<256x64xbf16>, vector<64x32xbf16>, vector<256x32xf32> -> vector<256x32xf32>
    %c0_23 = arith.constant 0 : index
    %c0_24 = arith.constant 0 : index
    %35 = vector.load %arg8[%c0_23, %c0_24] : memref<1x32xf32, #tpu.memory_space<vmem>>, vector<1x32xf32>
    %36 = vector.broadcast %35 : vector<1x32xf32> to vector<256x32xf32>
    %37 = arith.addf %34, %36 : vector<256x32xf32>
    %c0_25 = arith.constant 0 : index
    %c0_26 = arith.constant 0 : index
    %38 = vector.load %arg10[%c0_25, %c0_26] : memref<256x32xf32, #tpu.memory_space<vmem>>, vector<256x32xf32>
    tpu.vector_store %arg10[%c0_25, %c0_26], %37 {strides = array<i32>} : memref<256x32xf32, #tpu.memory_space<vmem>>, vector<256x32xf32>,
    return
  }
  func.func @transform_0(%arg0: i32) -> (i32, i32) {
    %c0_i32 = arith.constant 0 : i32
    %c0_i32_0 = arith.constant 0 : i32
    %c0_i32_1 = arith.constant 0 : i32
    return %c0_i32, %c0_i32_0 : i32, i32
  }
  func.func @transform_1(%arg0: i32) -> (i32, i32) {
    %c0_i32 = arith.constant 0 : i32
    %c0_i32_0 = arith.constant 0 : i32
    return %arg0, %c0_i32 : i32, i32
  }
  func.func @transform_2(%arg0: i32) -> (i32, i32, i32) {
    %c0_i32 = arith.constant 0 : i32
    %c0_i32_0 = arith.constant 0 : i32
    %c0_i32_1 = arith.constant 0 : i32
    return %c0_i32, %arg0, %c0_i32_0 : i32, i32, i32
  }
  func.func @transform_3(%arg0: i32) -> (i32, i32) {
    %c0_i32 = arith.constant 0 : i32
    %c0_i32_0 = arith.constant 0 : i32
    %c0_i32_1 = arith.constant 0 : i32
    return %c0_i32, %c0_i32_0 : i32, i32
  }
  func.func @transform_4(%arg0: i32) -> (i32, i32) {
    %c0_i32 = arith.constant 0 : i32
    %c0_i32_0 = arith.constant 0 : i32
    %c0_i32_1 = arith.constant 0 : i32
    return %c0_i32, %c0_i32_0 : i32, i32
  }
  func.func @transform_5(%arg0: i32) -> (i32, i32) {
    %c0_i32 = arith.constant 0 : i32
    %c0_i32_0 = arith.constant 0 : i32
    %c0_i32_1 = arith.constant 0 : i32
    return %c0_i32, %c0_i32_0 : i32, i32
  }
  func.func @transform_6(%arg0: i32) -> (i32, i32) {
    %c0_i32 = arith.constant 0 : i32
    %c0_i32_0 = arith.constant 0 : i32
    %c0_i32_1 = arith.constant 0 : i32
    return %c0_i32, %c0_i32_0 : i32, i32
  }
  func.func @transform_7(%arg0: i32) -> (i32, i32) {
    %c0_i32 = arith.constant 0 : i32
    %c0_i32_0 = arith.constant 0 : i32
    %c0_i32_1 = arith.constant 0 : i32
    return %c0_i32, %c0_i32_0 : i32, i32
  }
  func.func @transform_8(%arg0: i32) -> (i32, i32) {
    %c0_i32 = arith.constant 0 : i32
    %c0_i32_0 = arith.constant 0 : i32
    %c0_i32_1 = arith.constant 0 : i32
    return %c0_i32, %c0_i32_0 : i32, i32
  }
  func.func @transform_9(%arg0: i32) -> (i32, i32) {
    %c0_i32 = arith.constant 0 : i32
    %c0_i32_0 = arith.constant 0 : i32
    return %arg0, %c0_i32 : i32, i32
  }
}

</mosaic_0001>

<bundles_post_ra>
// kernel: tpu_custom_call.1
= control target key start
LH: loop header
LB: loop body
LE: loop exit
PB: predicated region body
PF: predicated region fallthrough
CT: control target
= control target key end

     0   :  { %14 = vsyncpa [#allocation3], 0  ;;  %s10567_s0 = inlined_call_operand.hbm [shape: f32[4,64], index: 0, kind: input, shape index: {}]   ;;  %s10568_s1 = inlined_call_operand.hbm [shape: bf16[256,32], index: 1, kind: input, shape index: {}]   ;;  %s10569_s2 = inlined_call_operand.hbm [shape: bf16[4,256,16], index: 2, kind: input, shape index: {}]   ;;  %s10570_s3 = inlined_call_operand.hbm [shape: bf16[32,64], index: 3, kind: input, shape index: {}]   ;;  %s10571_s4 = inlined_call_operand.hbm [shape: bf16[16,64], index: 4, kind: input, shape index: {}]   ;;  %s10572_s5 = inlined_call_operand.hbm [shape: bf16[16,64], index: 5, kind: input, shape index: {}]   ;;  %s10573_s6 = inlined_call_operand.hbm [shape: bf16[64,32], index: 6, kind: input, shape index: {}]   ;;  %s10574_s7 = inlined_call_operand.hbm [shape: f32[1,32], index: 7, kind: input, shape index: {}]   ;;  %s10575_s8 = inlined_call_operand.hbm [shape: f32[64,64], index: 8, kind: input, shape index: {}]   ;;  %s10576_s9 = inlined_call_operand.hbm [shape: f32[256,32], index: 9, kind: output, shape index: {}]  }
   0x1   :  { %15 = vsyncpa [#allocation6], 0 }
   0x2   :  { %16 = vsyncpa [#allocation9], 0 }
   0x3   :  { %17 = vsyncpa [#allocation12], 0 }
   0x4   :  { %18 = vsyncpa [#allocation15], 0 }
   0x5   :  { %19 = vsyncpa [#allocation4], 0  ;;  %s7107_s30 = smov [#allocation5]   ;;  %s6875_s13 = scalar_lea.hbm %s10568_s1, 2048 }
   0x6   :  { %s35_s10 = sshll.u32 %s7107_s30, 4  ;;  %p6876_p0 = scmp.ne.s32.totalorder %s10568_s1, %s6875_s13  ;;  %s36_s10 = int_to_ptr.vmem [resolvable:$true] %s35_s10 }
   0x7   :  { %p6879_p1 = scmp.lt.u32.totalorder %s6875_s13, %s10568_s1 }
   0x9   :  { %p6881_p2 = pnand %p6879_p1, %p6876_p0 }
   0xb   :  { %6884 = shalt.err (!%p6881_p2)
}
   0xc   :  { %s6885_s18 = scalar_lea.vmem %s36_s10, 2048  ;;  %p6890_p4 = scmp.lt.s32.totalorder %s36_s10, %s36_s10 }
   0xd   :  { %p6886_p3 = scmp.ne.s32.totalorder %s36_s10, %s6885_s18  ;;  %p6891_p5 = scmp.lt.s32.totalorder %s6885_s18, %s6885_s18 }
   0xf   :  { %p6892_p6 = por %p6891_p5, %p6890_p4 }
  0x11   :  { %p6893_p7 = pnand %p6892_p6, %p6886_p3 }
  0x13   :  { %6896 = shalt.err (!%p6893_p7)
}
  0x14   :  { %s7108_s19 = smov 64   ;;  %s7109_s20 = smov 4  }
  0x15   :  { %41 = dma.hbm_to_vmem [thread:$0]  %s10568_s1, 2048, %s36_s10, [#allocation6], %s7108_s19, %s7108_s19, %s7109_s20  }
  0x16   :  { %s7110_s23 = smov [#allocation8]   ;;  %s7111_s25 = smov [#allocation11]  }
  0x17   :  { %s59_s24 = sshll.u32 %s7110_s23, 4  ;;  %s83_s26 = sshll.u32 %s7111_s25, 4  ;;  %s60_s24 = int_to_ptr.vmem [resolvable:$true] %s59_s24  ;;  %s84_s26 = int_to_ptr.vmem [resolvable:$true] %s83_s26 }
  0x18   :  { %s6897_s29 = scalar_lea.hbm %s10570_s3, 256 }
  0x19   :  { %p6898_p8 = scmp.ne.s32.totalorder %s10570_s3, %s6897_s29  ;;  %p6901_p9 = scmp.lt.u32.totalorder %s6897_s29, %s10570_s3 }
  0x1b   :  { %p6903_p10 = pnand %p6901_p9, %p6898_p8 }
  0x1d   :  { %6906 = shalt.err (!%p6903_p10)
}
  0x1e   :  { %s6907_s1 = scalar_lea.vmem %s60_s24, 256  ;;  %p6912_p12 = scmp.lt.s32.totalorder %s60_s24, %s60_s24 }
  0x1f   :  { %p6908_p11 = scmp.ne.s32.totalorder %s60_s24, %s6907_s1  ;;  %p6913_p13 = scmp.lt.s32.totalorder %s6907_s1, %s6907_s1 }
  0x21   :  { %p6914_p0 = por %p6913_p13, %p6912_p12 }
  0x23   :  { %p6915_p1 = pnand %p6914_p0, %p6908_p11 }
  0x25   :  { %6918 = shalt.err (!%p6915_p1)
}
  0x26   :  { %65 = dma.hbm_to_vmem [thread:$0]  %s10570_s3, 256, %s60_s24, [#allocation9], %s7108_s19, %s7108_s19, %s7109_s20  }
  0x27   :  { %s6919_s17 = scalar_lea.hbm %s10572_s5, 128 }
  0x28   :  { %p6920_p2 = scmp.ne.s32.totalorder %s10572_s5, %s6919_s17  ;;  %p6923_p3 = scmp.lt.u32.totalorder %s6919_s17, %s10572_s5 }
  0x2a   :  { %p6925_p4 = pnand %p6923_p3, %p6920_p2 }
  0x2c   :  { %6928 = shalt.err (!%p6925_p4)
}
  0x2d   :  { %s6929_s25 = scalar_lea.vmem %s84_s26, 128  ;;  %p6934_p6 = scmp.lt.s32.totalorder %s84_s26, %s84_s26 }
  0x2e   :  { %p6930_p5 = scmp.ne.s32.totalorder %s84_s26, %s6929_s25  ;;  %p6935_p7 = scmp.lt.s32.totalorder %s6929_s25, %s6929_s25 }
  0x30   :  { %p6936_p8 = por %p6935_p7, %p6934_p6 }
  0x32   :  { %p6937_p9 = pnand %p6936_p8, %p6930_p5 }
  0x34   :  { %6940 = shalt.err (!%p6937_p9)
}
  0x35   :  { %89 = dma.hbm_to_vmem [thread:$0]  %s10572_s5, 128, %s84_s26, [#allocation12], %s7108_s19, %s7108_s19, %s7109_s20  }
  0x36   :  { %s7112_s27 = smov [#allocation14]   ;;  %s7113_s29 = smov [#allocation2]  }
  0x37   :  { %s108_s28 = sshll.u32 %s7112_s27, 4  ;;  %s26_s30 = sshll.u32 %s7113_s29, 4  ;;  %s109_s28 = int_to_ptr.vmem [resolvable:$true] %s108_s28  ;;  %s27_s30 = int_to_ptr.vmem [resolvable:$true] %s26_s30 }
  0x38   :  { %s6941_s13 = scalar_lea.hbm %s10574_s7, 16 }
  0x39   :  { %p6942_p10 = scmp.ne.s32.totalorder %s10574_s7, %s6941_s13  ;;  %p6945_p11 = scmp.lt.u32.totalorder %s6941_s13, %s10574_s7 }
  0x3b   :  { %p6947_p12 = pnand %p6945_p11, %p6942_p10 }
  0x3d   :  { %6950 = shalt.err (!%p6947_p12)
}
  0x3e   :  { %s6951_s5 = scalar_lea.vmem %s109_s28, 16  ;;  %s6955_s26 = scalar_lea.vmem %s109_s28, 32 }
  0x3f   :  { %p6952_p13 = scmp.ne.s32.totalorder %s109_s28, %s6951_s5  ;;  %p6956_p0 = scmp.lt.s32.totalorder %s109_s28, %s109_s28 }
  0x40   :  { %p6957_p1 = scmp.lt.s32.totalorder %s6955_s26, %s6951_s5 }
  0x42   :  { %p6958_p2 = por %p6957_p1, %p6956_p0 }
  0x44   :  { %p6959_p3 = pnand %p6958_p2, %p6952_p13 }
  0x46   :  { %6962 = shalt.err (!%p6959_p3)
}
  0x47   :  { %111 = dma.hbm_to_vmem [thread:$0]  %s10574_s7, 16, %s109_s28, [#allocation15]  }
  0x48   :  { %s6963_s22 = scalar_lea.hbm %s10567_s0, 64 }
  0x49   :  { %p6964_p4 = scmp.ne.s32.totalorder %s10567_s0, %s6963_s22  ;;  %p6967_p5 = scmp.lt.u32.totalorder %s6963_s22, %s10567_s0 }
  0x4b   :  { %p6969_p6 = pnand %p6967_p5, %p6964_p4 }
  0x4d   :  { %6972 = shalt.err (!%p6969_p6)
}
  0x4e   :  { %s6973_s27 = scalar_lea.vmem %s27_s30, 64  ;;  %p6978_p8 = scmp.lt.s32.totalorder %s27_s30, %s27_s30 }
  0x4f   :  { %p6974_p7 = scmp.ne.s32.totalorder %s27_s30, %s6973_s27  ;;  %p6979_p9 = scmp.lt.s32.totalorder %s6973_s27, %s6973_s27 }
  0x51   :  { %p6980_p10 = por %p6979_p9, %p6978_p8 }
  0x53   :  { %p6981_p11 = pnand %p6980_p10, %p6974_p7 }
  0x55   :  { %6984 = shalt.err (!%p6981_p11)
}
  0x56   :  { %29 = dma.hbm_to_vmem [thread:$0]  %s10567_s0, 64, %s27_s30, [#allocation3]  }
  0x57   :  { %s7114_s29 = smov [#allocation7]   ;;  %s7115_s12 = smov [#allocation10]  }
  0x58   :  { %s47_s11 = sshll.u32 %s7114_s29, 4  ;;  %s71_s13 = sshll.u32 %s7115_s12, 4  ;;  %s48_s11 = int_to_ptr.vmem [resolvable:$true] %s47_s11  ;;  %s72_s13 = int_to_ptr.vmem [resolvable:$true] %s71_s13 }
  0x59   :  { %s6985_s14 = scalar_lea.hbm %s10569_s2, 8192 }
  0x5a   :  { %p6986_p12 = scmp.ne.s32.totalorder %s10569_s2, %s6985_s14  ;;  %p6989_p13 = scmp.lt.u32.totalorder %s6985_s14, %s10569_s2 }
  0x5c   :  { %p6991_p0 = pnand %p6989_p13, %p6986_p12 }
  0x5e   :  { %6994 = shalt.err (!%p6991_p0)
}
  0x5f   :  { %s6995_s0 = scalar_lea.vmem %s48_s11, 8192  ;;  %p7000_p2 = scmp.lt.s32.totalorder %s48_s11, %s48_s11 }
  0x60   :  { %p6996_p1 = scmp.ne.s32.totalorder %s48_s11, %s6995_s0  ;;  %p7001_p3 = scmp.lt.s32.totalorder %s6995_s0, %s6995_s0 }
  0x62   :  { %p7002_p4 = por %p7001_p3, %p7000_p2 }
  0x64   :  { %p7003_p5 = pnand %p7002_p4, %p6996_p1 }
  0x66   :  { %7006 = shalt.err (!%p7003_p5)
}
  0x67   :  { %53 = dma.hbm_to_vmem [thread:$0]  %s10569_s2, 8192, %s48_s11, [#allocation6], %s7108_s19, %s7108_s19, %s7109_s20  }
  0x68   :  { %s7007_s22 = scalar_lea.hbm %s10571_s4, 128 }
  0x69   :  { %p7008_p6 = scmp.ne.s32.totalorder %s10571_s4, %s7007_s22  ;;  %p7011_p7 = scmp.lt.u32.totalorder %s7007_s22, %s10571_s4 }
  0x6b   :  { %p7013_p8 = pnand %p7011_p7, %p7008_p6 }
  0x6d   :  { %7016 = shalt.err (!%p7013_p8)
}
  0x6e   :  { %s7017_s27 = scalar_lea.vmem %s72_s13, 128  ;;  %p7022_p10 = scmp.lt.s32.totalorder %s72_s13, %s72_s13 }
  0x6f   :  { %p7018_p9 = scmp.ne.s32.totalorder %s72_s13, %s7017_s27  ;;  %p7023_p11 = scmp.lt.s32.totalorder %s7017_s27, %s7017_s27 }
  0x71   :  { %p7024_p12 = por %p7023_p11, %p7022_p10 }
  0x73   :  { %p7025_p13 = pnand %p7024_p12, %p7018_p9 }
  0x75   :  { %7028 = shalt.err (!%p7025_p13)
}
  0x76   :  { %77 = dma.hbm_to_vmem [thread:$0]  %s10571_s4, 128, %s72_s13, [#allocation9], %s7108_s19, %s7108_s19, %s7109_s20  }
  0x77   :  { %s7116_s28 = smov [#allocation13]   ;;  %s7117_s11 = smov [#allocation16]  }
  0x78   :  { %s95_s29 = sshll.u32 %s7116_s28, 4  ;;  %s117_s12 = sshll.u32 %s7117_s11, 4  ;;  %s96_s29 = int_to_ptr.vmem [resolvable:$true] %s95_s29  ;;  %s118_s12 = int_to_ptr.vmem [resolvable:$true] %s117_s12 }
  0x79   :  { %s7029_s14 = scalar_lea.hbm %s10573_s6, 512 }
  0x7a   :  { %p7030_p0 = scmp.ne.s32.totalorder %s10573_s6, %s7029_s14  ;;  %p7033_p1 = scmp.lt.u32.totalorder %s7029_s14, %s10573_s6 }
  0x7c   :  { %p7035_p2 = pnand %p7033_p1, %p7030_p0 }
  0x7e   :  { %7038 = shalt.err (!%p7035_p2)
}
  0x7f   :  { %s7039_s4 = scalar_lea.vmem %s96_s29, 512  ;;  %p7044_p4 = scmp.lt.s32.totalorder %s96_s29, %s96_s29 }
  0x80   :  { %p7040_p3 = scmp.ne.s32.totalorder %s96_s29, %s7039_s4  ;;  %p7045_p5 = scmp.lt.s32.totalorder %s7039_s4, %s7039_s4 }
  0x82   :  { %p7046_p6 = por %p7045_p5, %p7044_p4 }
  0x84   :  { %p7047_p7 = pnand %p7046_p6, %p7040_p3 }
  0x86   :  { %7050 = shalt.err (!%p7047_p7)
}
  0x87   :  { %101 = dma.hbm_to_vmem [thread:$0]  %s10573_s6, 512, %s96_s29, [#allocation12], %s7108_s19, %s7108_s19, %s7109_s20  }
  0x88   :  { %s7051_s18 = scalar_lea.hbm %s10575_s8, 1024 }
  0x89   :  { %p7052_p8 = scmp.ne.s32.totalorder %s10575_s8, %s7051_s18  ;;  %p7055_p9 = scmp.lt.u32.totalorder %s7051_s18, %s10575_s8 }
  0x8b   :  { %p7057_p10 = pnand %p7055_p9, %p7052_p8 }
  0x8d   :  { %7060 = shalt.err (!%p7057_p10)
}
  0x8e   :  { %s7061_s3 = scalar_lea.vmem %s118_s12, 1024  ;;  %p7066_p12 = scmp.lt.s32.totalorder %s118_s12, %s118_s12 }
  0x8f   :  { %p7062_p11 = scmp.ne.s32.totalorder %s118_s12, %s7061_s3  ;;  %p7067_p13 = scmp.lt.s32.totalorder %s7061_s3, %s7061_s3 }
  0x91   :  { %p7068_p0 = por %p7067_p13, %p7066_p12 }
  0x93   :  { %p7069_p1 = pnand %p7068_p0, %p7062_p11 }
  0x95   :  { %7072 = shalt.err (!%p7069_p1)
}
  0x96   :  { %s7118_s6 = smov 128   ;;  %s7119_s19 = smov 8  }
  0x97   :  { %123 = dma.hbm_to_vmem [thread:$0]  %s10575_s8, 1024, %s118_s12, [#allocation15], %s7118_s6, %s7118_s6, %s7119_s19  }
  0x98   :  { %7095 = dma.done.wait [#allocation3], 64  }
  0x99   :  { %7096 = vsyncadd [#allocation3], 4294967232 }
  0x9a   :  { %7097 = dma.done.wait [#allocation6], 10240  }
  0x9b   :  { %7098 = vsyncadd [#allocation6], 4294957056 }
  0x9c   :  { %7099 = dma.done.wait [#allocation9], 384  }
  0x9d   :  { %7100 = vsyncadd [#allocation9], 4294966912 }
  0x9e   :  { %7101 = dma.done.wait [#allocation12], 640  }
  0x9f   :  { %7102 = vsyncadd [#allocation12], 4294966656 }
  0xa0   :  { %7103 = dma.done.wait [#allocation15], 1040  }
  0xa1   :  { %7104 = vsyncadd [#allocation15], 4294966256  ;;  %v6467_v0 = vld [vmem:[#allocation8] sm:$0xff]   ;;  %v6468_v1 = vld [vmem:[#allocation10] sm:$0xff]   ;;  %vm946_vm0 = vcmask 130048   ;;  %vm280_vm1 = vcmask 261120  }
  0xa2   :  { %5884 = vmatprep.subr.bf16.mxu0 %v6467_v0  ;;  %v7301_v2 = vld [vmem:[#allocation7] sm:$0xff]   ;;  %5920 = vmatprep.subr.bf16.mxu1 %v6468_v1  ;;  %v6470_v3 = vld [vmem:[#allocation8 + $0x8] sm:$0xff]   ;;  %v7309_v7 = vld [vmem:[#allocation7 + $0x10] sm:$0xff]   ;;  %vm2373_vm2 = vcmask 523264   ;;  %s7121_s8 = smov [#allocation17]  }
  0xa3   :  { %5885 = vmatpush3.bf16.msra.mxu0 %v6467_v0  ;;  %5921 = vmatpush3.bf16.msra.mxu1 %v6468_v1  ;;  %v7305_v4 = vld [vmem:[#allocation7 + $0x8] sm:$0xff]   ;;  %v6472_v5 = vld [vmem:[#allocation5] sm:$0xff]   ;;  %v6476_v8 = vld [vmem:[#allocation5 + $0x10] sm:$0xff]   ;;  %s5186_s27 = sshll.u32 %s7121_s8, 4  ;;  %s5187_s27 = int_to_ptr.vmem [resolvable:$true] %s5186_s27 }
  0xa4   :  { %5922 = vmatprep.mubr.msk.bf16.mxu1 %vm946_vm0, %v7301_v2  ;;  %5886 = vmatprep.subr.bf16.mxu0 %v6470_v3  ;;  %v6473_v6 = vld [vmem:[#allocation5 + $0x8] sm:$0xff]   ;;  %v7315_v9 = vld [vmem:[#allocation7 + $0x18] sm:$0xff]   ;;  %v7318_v10 = vld [vmem:[#allocation7 + $0x20] sm:$0xff]   ;;  %s7073_s2 = scalar_lea.vmem %s5187_s27, 4096  ;;  %p7078_p3 = scmp.lt.s32.totalorder %s5187_s27, %s5187_s27 }
  0xa5   :  { %5888 = vmatprep.mubr.msk.bf16.mxu0 %vm280_vm1, %v6472_v5  ;;  %v6477_v11 = vld [vmem:[#allocation5 + $0x18] sm:$0xff]   ;;  %v6480_v12 = vld [vmem:[#allocation5 + $0x20] sm:$0xff]   ;;  %v2366_v14 = vld [vmem:[#allocation16 + $0x8] sm:$0xff]  ;;  %p7074_p2 = scmp.ne.s32.totalorder %s5187_s27, %s7073_s2  ;;  %p7079_p4 = scmp.lt.s32.totalorder %s7073_s2, %s7073_s2 }
  0xa6   :  { %5923 = vmatmul.mubr.msk.bf16.vlgmr.msra.gmra.mrb[0].mxu1 %vm946_vm0, %v7305_v4  ;;  %v2365_v13 = vld [vmem:[#allocation16] sm:$0xff]  ;;  %v7332_v17 = vld [vmem:[#allocation7 + $0x30] sm:$0xff]   ;;  %v7339_v20 = vld [vmem:[#allocation7 + $0x38] sm:$0xff]  }
  0xa7   :  { %5887 = vmatpush3.bf16.msra.mxu0 %v6470_v3  ;;  %5926 = vmatprep.mubr.msk.bf16.mxu1 %vm946_vm0, %v7309_v7  ;;  %v7324_v15 = vpack.c.bf16 %v2366_v14, %v2365_v13  ;;  %v7328_v16 = vld [vmem:[#allocation7 + $0x28] sm:$0xff]   ;;  %v6484_v19 = vld [vmem:[#allocation5 + $0x30] sm:$0xff]   ;;  %v7342_v21 = vld [vmem:[#allocation7 + $0x40] sm:$0xff]   ;;  %p7080_p5 = por %p7079_p4, %p7078_p3 }
  0xa8   :  { %v6481_v18 = vld [vmem:[#allocation5 + $0x28] sm:$0xff]   ;;  %v6485_v22 = vld [vmem:[#allocation5 + $0x38] sm:$0xff]   ;;  %v6488_v23 = vld [vmem:[#allocation5 + $0x40] sm:$0xff]  }
  0xa9   :  { %6444 = vmatprep.subr.bf16.mxu1 %v7324_v15  ;;  %v7349_v24 = vld [vmem:[#allocation7 + $0x48] sm:$0xff]   ;;  %v7352_v25 = vld [vmem:[#allocation7 + $0x50] sm:$0xff]   ;;  %v6504_v27 = vld [vmem:[#allocation11] sm:$0xff]   ;;  %p7081_p6 = pnand %p7080_p5, %p7074_p2 }
  0xaa   :  { %5889 = vmatmul.mubr.msk.bf16.vlgmr.msra.gmra.mrb[0].mxu0 %vm280_vm1, %v6473_v6  ;;  %6448 = vmatpush3.bf16.msra.mxu1 %v7324_v15  ;;  %v6489_v26 = vld [vmem:[#allocation5 + $0x48] sm:$0xff]   ;;  %v6492_v28 = vld [vmem:[#allocation5 + $0x50] sm:$0xff]   ;;  %v7359_v29 = vld [vmem:[#allocation7 + $0x58] sm:$0xff]  }
  0xab   :  { %5892 = vmatprep.mubr.msk.bf16.mxu0 %vm280_vm1, %v6476_v8  ;;  %6050 = vmatprep.subr.bf16.mxu0 %v6504_v27  ;;  %v2367_v30 = vld [vmem:[#allocation16 + $0x10] sm:$0xff]  ;;  %v2368_v31 = vld [vmem:[#allocation16 + $0x18] sm:$0xff]  ;;  %v7370_v36 = vld [vmem:[#allocation7 + $0x68] sm:$0xff]  }
  0xac   :  { %6051 = vmatpush3.bf16.msra.mxu0 %v6504_v27  ;;  %v7363_v32 = vld [vmem:[#allocation7 + $0x60] sm:$0xff]   ;;  %v6432_v33 = vpack.c.bf16 %v2368_v31, %v2367_v30  ;;  %v6493_v34 = vld [vmem:[#allocation5 + $0x58] sm:$0xff]   ;;  %v7373_v37 = vld [vmem:[#allocation7 + $0x70] sm:$0xff]  }
  0xad   :  { %6429 = vmatprep.subr.bf16.mxu0 %v7324_v15  ;;  %v6496_v35 = vld [vmem:[#allocation5 + $0x60] sm:$0xff]   ;;  %v6497_v38 = vld [vmem:[#allocation5 + $0x68] sm:$0xff]   ;;  %v6500_v39 = vld [vmem:[#allocation5 + $0x70] sm:$0xff]  }
  0xae   :  { %5927 = vmatmul.mubr.msk.bf16.gmra.mrb[4].mxu1 %vm946_vm0, %v7315_v9  ;;  %6445 = vmatprep.subr.bf16.mxu1 %v6432_v33  ;;  %v7380_v40 = vld [vmem:[#allocation7 + $0x78] sm:$0xff]   ;;  %v2369_v41 = vld [vmem:[#allocation16 + $0x20] sm:$0xff]  ;;  %v2370_v42 = vld [vmem:[#allocation16 + $0x28] sm:$0xff] }
  0xaf   :  { %5930 = vmatprep.mubr.msk.bf16.mxu1 %vm946_vm0, %v7318_v10  ;;  %6449 = vmatpush3.bf16.msra.mxu1 %v6432_v33  ;;  %v7383_v43 = vld [vmem:[#allocation7 + $0x80] sm:$0xff]   ;;  %v6436_v44 = vpack.c.bf16 %v2370_v42, %v2369_v41  ;;  %v6501_v45 = vld [vmem:[#allocation5 + $0x78] sm:$0xff]   ;;  %v7390_v46 = vld [vmem:[#allocation7 + $0x88] sm:$0xff]  }
  0xb0   :  { %v7394_v47 = vld [vmem:[#allocation7 + $0x90] sm:$0xff]   ;;  %v7402_v48 = vld [vmem:[#allocation7 + $0x98] sm:$0xff]   ;;  %v7404_v49 = vld [vmem:[#allocation7 + $0xa0] sm:$0xff]  }
  0xb1   :  { %6446 = vmatprep.subr.bf16.mxu1 %v6436_v44  ;;  %v6508_v50 = vld [vmem:[#allocation7 + $0xa8] sm:$0xff]   ;;  %v6509_v51 = vld [vmem:[#allocation7 + $0xb0] sm:$0xff]   ;;  %v6510_v52 = vld [vmem:[#allocation7 + $0xb8] sm:$0xff]  }
  0xb2   :  { %5893 = vmatmul.mubr.msk.bf16.gmra.mrb[4].mxu0 %vm280_vm1, %v6477_v11  ;;  %v2371_v53 = vld [vmem:[#allocation16 + $0x30] sm:$0xff]  ;;  %v2372_v54 = vld [vmem:[#allocation16 + $0x38] sm:$0xff]  ;;  %v6512_v57 = vld [vmem:[#allocation7 + $0xc8] sm:$0xff]  }
  0xb3   :  { %5896 = vmatprep.mubr.msk.bf16.mxu0 %vm280_vm1, %v6480_v12  ;;  %6450 = vmatpush3.bf16.msra.mxu1 %v6436_v44  ;;  %v6511_v55 = vld [vmem:[#allocation7 + $0xc0] sm:$0xff]   ;;  %v6440_v56 = vpack.c.bf16 %v2372_v54, %v2371_v53  ;;  %v6513_v58 = vld [vmem:[#allocation7 + $0xd0] sm:$0xff]   ;;  %v6514_v59 = vld [vmem:[#allocation7 + $0xd8] sm:$0xff]  }
  0xb4   :  { %v6515_v60 = vld [vmem:[#allocation7 + $0xe0] sm:$0xff]   ;;  %v6516_v61 = vld [vmem:[#allocation7 + $0xe8] sm:$0xff]   ;;  %v6517_v62 = vld [vmem:[#allocation7 + $0xf0] sm:$0xff]  }
  0xb5   :  { %6447 = vmatprep.subr.bf16.mxu1 %v6440_v56  ;;  %v6518_v63 = vld [vmem:[#allocation7 + $0xf8] sm:$0xff]   ;;  %v6519_v0 = vld [vmem:[#allocation7 + $0x100] sm:$0xff]   ;;  %v6520_v1 = vld [vmem:[#allocation7 + $0x108] sm:$0xff]  }
  0xb6   :  { %5931 = vmatmul.mubr.msk.bf16.gmra.mrb[8].mxu1 %vm946_vm0, %v7328_v16  ;;  %v6522_v3 = vld [vmem:[#allocation7 + $0x118] sm:$0xff]   ;;  %v6524_v5 = vld [vmem:[#allocation7 + $0x128] sm:$0xff]   ;;  %v6525_v6 = vld [vmem:[#allocation7 + $0x130] sm:$0xff]  }
  0xb7   :  { %5934 = vmatprep.mubr.msk.bf16.mxu1 %vm946_vm0, %v7332_v17  ;;  %6451 = vmatpush3.bf16.msra.mxu1 %v6440_v56  ;;  %v7471_v8 = vld [vmem:[#allocation7 + $0x140] sm:$0xff]   ;;  %v7488_v11 = vld [vmem:[#allocation7 + $0x158] sm:$0xff]   ;;  %v7498_v13 = vld [vmem:[#allocation7 + $0x168] sm:$0xff]  }
  0xb8   :  { %v7491_v12 = vld [vmem:[#allocation7 + $0x160] sm:$0xff]   ;;  %v7501_v14 = vld [vmem:[#allocation7 + $0x170] sm:$0xff]   ;;  %v7611_v53 = vld [vmem:[#allocation7 + $0x1d8] sm:$0xff]  }
  0xb9   :  { %v7551_v27 = vld [vmem:[#allocation7 + $0x1c0] sm:$0xff]   ;;  %v7583_v41 = vld [vmem:[#allocation7 + $0x1d0] sm:$0xff]  }
  0xba   :  { %5897 = vmatmul.mubr.msk.bf16.gmra.mrb[8].mxu0 %vm280_vm1, %v6481_v18  ;;  %v7521_v18 = vld [vmem:[#allocation7 + $0x190] sm:$0xff]  }
  0xbb   :  { %5900 = vmatprep.mubr.msk.bf16.mxu0 %vm280_vm1, %v6484_v19  ;;  %v7528_v19 = vld [vmem:[#allocation7 + $0x198] sm:$0xff]  }
  0xbe   :  { %5935 = vmatmul.mubr.msk.bf16.gmra.mrb[12].mxu1 %vm946_vm0, %v7339_v20 }
  0xbf   :  { %5938 = vmatprep.mubr.msk.bf16.mxu1 %vm946_vm0, %v7342_v21 }
  0xc2   :  { %5901 = vmatmul.mubr.msk.bf16.gmra.mrb[12].mxu0 %vm280_vm1, %v6485_v22  ;;  %v7541_v22 = vld [vmem:[#allocation7 + $0x1b0] sm:$0xff]  }
  0xc3   :  { %5904 = vmatprep.mubr.msk.bf16.mxu0 %vm280_vm1, %v6488_v23 }
  0xc6   :  { %5939 = vmatmul.mubr.msk.bf16.gmra.mrb[16].mxu1 %vm946_vm0, %v7349_v24 }
  0xc7   :  { %5942 = vmatprep.mubr.msk.bf16.mxu1 %vm946_vm0, %v7352_v25 }
  0xca   :  { %5905 = vmatmul.mubr.msk.bf16.gmra.mrb[16].mxu0 %vm280_vm1, %v6489_v26 }
  0xcb   :  { %5908 = vmatprep.mubr.msk.bf16.mxu0 %vm280_vm1, %v6492_v28 }
  0xce   :  { %5943 = vmatmul.mubr.msk.bf16.gmra.mrb[20].mxu1 %vm946_vm0, %v7359_v29 }
  0xcf   :  { %5946 = vmatprep.mubr.msk.bf16.mxu1 %vm946_vm0, %v7363_v32 }
  0xd2   :  { %5909 = vmatmul.mubr.msk.bf16.gmra.mrb[20].mxu0 %vm280_vm1, %v6493_v34 }
  0xd3   :  { %5912 = vmatprep.mubr.msk.bf16.mxu0 %vm280_vm1, %v6496_v35 }
  0xd6   :  { %5947 = vmatmul.mubr.msk.bf16.gmra.mrb[24].mxu1 %vm946_vm0, %v7370_v36 }
  0xd7   :  { %5950 = vmatprep.mubr.msk.bf16.mxu1 %vm946_vm0, %v7373_v37 }
  0xda   :  { %5913 = vmatmul.mubr.msk.bf16.gmra.mrb[24].mxu0 %vm280_vm1, %v6497_v38 }
  0xdb   :  { %5916 = vmatprep.mubr.msk.bf16.mxu0 %vm280_vm1, %v6500_v39  ;;  %v7579_v39 = vld [vmem:[#allocation7 + $0x1c8] sm:$0xff]  }
  0xde   :  { %5951 = vmatmul.mubr.msk.bf16.gmra.mrb[28].mxu1 %vm946_vm0, %v7380_v40 }
  0xdf   :  { %5954 = vmatprep.mubr.msk.bf16.mxu1 %vm946_vm0, %v7383_v43 }
  0xe2   :  { %5917 = vmatmul.mubr.msk.bf16.gmra.mrb[28].mxu0 %vm280_vm1, %v6501_v45 }
  0xe3   :  { %6052 = vmatprep.mubr.msk.bf16.mxu0 %vm946_vm0, %v7301_v2  ;;  %v6521_v2 = vld [vmem:[#allocation7 + $0x110] sm:$0xff]  }
  0xe6   :  { %5955 = vmatmul.mubr.msk.bf16.gmra.mrb[32].mxu1 %vm946_vm0, %v7390_v46 }
  0xe7   :  { %5958 = vmatprep.mubr.msk.bf16.mxu1 %vm946_vm0, %v7394_v47 }
  0xea   :  { %6053 = vmatmul.mubr.msk.bf16.vlgmr.msra.gmra.mrb[32].mxu0 %vm946_vm0, %v7305_v4  ;;  %v6523_v4 = vld [vmem:[#allocation7 + $0x120] sm:$0xff]  }
  0xeb   :  { %6056 = vmatprep.mubr.msk.bf16.mxu0 %vm946_vm0, %v7309_v7  ;;  %6431 = vmatpush3.bf16.msra.mxu0 %v7324_v15  ;;  %v7468_v7 = vld [vmem:[#allocation7 + $0x138] sm:$0xff]  }
  0xec   :  { %6433 = vmatprep.subr.bf16.mxu0 %v6432_v33  ;;  %v7508_v15 = vld [vmem:[#allocation7 + $0x178] sm:$0xff]  }
  0xee   :  { %5959 = vmatmul.mubr.msk.bf16.gmra.mrb[36].mxu1 %vm946_vm0, %v7402_v48 }
  0xef   :  { %6435 = vmatpush3.bf16.msra.mxu0 %v6432_v33  ;;  %5962 = vmatprep.mubr.msk.bf16.mxu1 %vm946_vm0, %v7404_v49 }
  0xf0   :  { %6437 = vmatprep.subr.bf16.mxu0 %v6436_v44 }
  0xf2   :  { %6057 = vmatmul.mubr.msk.bf16.gmra.mrb[36].mxu0 %vm946_vm0, %v7315_v9  ;;  %v7478_v9 = vld [vmem:[#allocation7 + $0x148] sm:$0xff]  }
  0xf3   :  { %6060 = vmatprep.mubr.msk.bf16.mxu0 %vm946_vm0, %v7318_v10  ;;  %6439 = vmatpush3.bf16.msra.mxu0 %v6436_v44  ;;  %v7481_v10 = vld [vmem:[#allocation7 + $0x150] sm:$0xff]  }
  0xf4   :  { %6441 = vmatprep.subr.bf16.mxu0 %v6440_v56 }
  0xf6   :  { %5963 = vmatmul.mubr.msk.bf16.gmra.mrb[40].mxu1 %vm946_vm0, %v6508_v50 }
  0xf7   :  { %5966 = vmatprep.mubr.msk.bf16.mxu1 %vm946_vm0, %v6509_v51  ;;  %6443 = vmatpush3.bf16.msra.mxu0 %v6440_v56 }
  0xfa   :  { %6061 = vmatmul.mubr.msk.bf16.gmra.mrb[40].mxu0 %vm946_vm0, %v7328_v16  ;;  %v7511_v16 = vld [vmem:[#allocation7 + $0x180] sm:$0xff]  }
  0xfb   :  { %6064 = vmatprep.mubr.msk.bf16.mxu0 %vm946_vm0, %v7332_v17  ;;  %v7518_v17 = vld [vmem:[#allocation7 + $0x188] sm:$0xff]  }
  0xfe   :  { %5967 = vmatmul.mubr.msk.bf16.gmra.mrb[44].mxu1 %vm946_vm0, %v6510_v52 }
  0xff   :  { %5970 = vmatprep.mubr.msk.bf16.mxu1 %vm946_vm0, %v6511_v55 }
 0x102   :  { %6065 = vmatmul.mubr.msk.bf16.gmra.mrb[44].mxu0 %vm946_vm0, %v7339_v20  ;;  %v7531_v20 = vld [vmem:[#allocation7 + $0x1a0] sm:$0xff]  }
 0x103   :  { %6068 = vmatprep.mubr.msk.bf16.mxu0 %vm946_vm0, %v7342_v21  ;;  %v7538_v21 = vld [vmem:[#allocation7 + $0x1a8] sm:$0xff]  }
 0x106   :  { %5971 = vmatmul.mubr.msk.bf16.gmra.mrb[48].mxu1 %vm946_vm0, %v6512_v57 }
 0x107   :  { %5974 = vmatprep.mubr.msk.bf16.mxu1 %vm946_vm0, %v6513_v58 }
 0x10a   :  { %6069 = vmatmul.mubr.msk.bf16.gmra.mrb[48].mxu0 %vm946_vm0, %v7349_v24 }
 0x10b   :  { %6072 = vmatprep.mubr.msk.bf16.mxu0 %vm946_vm0, %v7352_v25  ;;  %v7548_v25 = vld [vmem:[#allocation7 + $0x1b8] sm:$0xff]  }
 0x10e   :  { %5975 = vmatmul.mubr.msk.bf16.gmra.mrb[52].mxu1 %vm946_vm0, %v6514_v59 }
 0x10f   :  { %5978 = vmatprep.mubr.msk.bf16.mxu1 %vm946_vm0, %v6515_v60 }
 0x112   :  { %6073 = vmatmul.mubr.msk.bf16.gmra.mrb[52].mxu0 %vm946_vm0, %v7359_v29 }
 0x113   :  { %6076 = vmatprep.mubr.msk.bf16.mxu0 %vm946_vm0, %v7363_v32 }
 0x116   :  { %5979 = vmatmul.mubr.msk.bf16.gmra.mrb[56].mxu1 %vm946_vm0, %v6516_v61 }
 0x117   :  { %5982 = vmatprep.mubr.msk.bf16.mxu1 %vm946_vm0, %v6517_v62 }
 0x11a   :  { %6077 = vmatmul.mubr.msk.bf16.gmra.mrb[56].mxu0 %vm946_vm0, %v7370_v36 }
 0x11b   :  { %6080 = vmatprep.mubr.msk.bf16.mxu0 %vm946_vm0, %v7373_v37 }
 0x11e   :  { %5983 = vmatmul.mubr.msk.bf16.gmra.mrb[60].mxu1 %vm946_vm0, %v6518_v63 }
 0x11f   :  { %5986 = vmatprep.mubr.msk.bf16.mxu1 %vm946_vm0, %v6519_v0 }
 0x122   :  { %6081 = vmatmul.mubr.msk.bf16.gmra.mrb[60].mxu0 %vm946_vm0, %v7380_v40 }
 0x123   :  { %6084 = vmatprep.mubr.msk.bf16.mxu0 %vm946_vm0, %v7383_v43 }
 0x126   :  { %5987 = vmatmul.mubr.msk.bf16.gmra.mrb[64].mxu1 %vm946_vm0, %v6520_v1 }
 0x127   :  { %5990 = vmatprep.mubr.msk.bf16.mxu1 %vm946_vm0, %v6521_v2 }
 0x12a   :  { %6085 = vmatmul.mubr.msk.bf16.gmra.mrb[64].mxu0 %vm946_vm0, %v7390_v46 }
 0x12b   :  { %6088 = vmatprep.mubr.msk.bf16.mxu0 %vm946_vm0, %v7394_v47 }
 0x12e   :  { %5991 = vmatmul.mubr.msk.bf16.gmra.mrb[68].mxu1 %vm946_vm0, %v6522_v3 }
 0x12f   :  { %5994 = vmatprep.mubr.msk.bf16.mxu1 %vm946_vm0, %v6523_v4 }
 0x132   :  { %6089 = vmatmul.mubr.msk.bf16.gmra.mrb[68].mxu0 %vm946_vm0, %v7402_v48 }
 0x133   :  { %6092 = vmatprep.mubr.msk.bf16.mxu0 %vm946_vm0, %v7404_v49 }
 0x136   :  { %5995 = vmatmul.mubr.msk.bf16.gmra.mrb[72].mxu1 %vm946_vm0, %v6524_v5 }
 0x137   :  { %5998 = vmatprep.mubr.msk.bf16.mxu1 %vm946_vm0, %v6525_v6 }
 0x13a   :  { %6093 = vmatmul.mubr.msk.bf16.gmra.mrb[72].mxu0 %vm946_vm0, %v6508_v50 }
 0x13b   :  { %6096 = vmatprep.mubr.msk.bf16.mxu0 %vm946_vm0, %v6509_v51 }
 0x13e   :  { %5999 = vmatmul.mubr.msk.bf16.gmra.mrb[76].mxu1 %vm946_vm0, %v7468_v7 }
 0x13f   :  { %6002 = vmatprep.mubr.msk.bf16.mxu1 %vm946_vm0, %v7471_v8 }
 0x142   :  { %6097 = vmatmul.mubr.msk.bf16.gmra.mrb[76].mxu0 %vm946_vm0, %v6510_v52 }
 0x143   :  { %6100 = vmatprep.mubr.msk.bf16.mxu0 %vm946_vm0, %v6511_v55  ;;  %v7615_v55 = vld [vmem:[#allocation7 + $0x1e0] sm:$0xff]  }
 0x146   :  { %6003 = vmatmul.mubr.msk.bf16.gmra.mrb[80].mxu1 %vm946_vm0, %v7478_v9 }
 0x147   :  { %6006 = vmatprep.mubr.msk.bf16.mxu1 %vm946_vm0, %v7481_v10 }
 0x14a   :  { %6101 = vmatmul.mubr.msk.bf16.gmra.mrb[80].mxu0 %vm946_vm0, %v6512_v57 }
 0x14b   :  { %6104 = vmatprep.mubr.msk.bf16.mxu0 %vm946_vm0, %v6513_v58 }
 0x14e   :  { %6007 = vmatmul.mubr.msk.bf16.gmra.mrb[84].mxu1 %vm946_vm0, %v7488_v11 }
 0x14f   :  { %6010 = vmatprep.mubr.msk.bf16.mxu1 %vm946_vm0, %v7491_v12 }
 0x152   :  { %6105 = vmatmul.mubr.msk.bf16.gmra.mrb[84].mxu0 %vm946_vm0, %v6514_v59 }
 0x153   :  { %6108 = vmatprep.mubr.msk.bf16.mxu0 %vm946_vm0, %v6515_v60 }
 0x156   :  { %6011 = vmatmul.mubr.msk.bf16.gmra.mrb[88].mxu1 %vm946_vm0, %v7498_v13 }
 0x157   :  { %6014 = vmatprep.mubr.msk.bf16.mxu1 %vm946_vm0, %v7501_v14 }
 0x15a   :  { %6109 = vmatmul.mubr.msk.bf16.gmra.mrb[88].mxu0 %vm946_vm0, %v6516_v61 }
 0x15b   :  { %6112 = vmatprep.mubr.msk.bf16.mxu0 %vm946_vm0, %v6517_v62 }
 0x15e   :  { %6015 = vmatmul.mubr.msk.bf16.gmra.mrb[92].mxu1 %vm946_vm0, %v7508_v15 }
 0x15f   :  { %6018 = vmatprep.mubr.msk.bf16.mxu1 %vm946_vm0, %v7511_v16 }
 0x162   :  { %6113 = vmatmul.mubr.msk.bf16.gmra.mrb[92].mxu0 %vm946_vm0, %v6518_v63 }
 0x163   :  { %6116 = vmatprep.mubr.msk.bf16.mxu0 %vm946_vm0, %v6519_v0 }
 0x166   :  { %6019 = vmatmul.mubr.msk.bf16.gmra.mrb[96].mxu1 %vm946_vm0, %v7518_v17 }
 0x167   :  { %6022 = vmatprep.mubr.msk.bf16.mxu1 %vm946_vm0, %v7521_v18 }
 0x16a   :  { %6117 = vmatmul.mubr.msk.bf16.gmra.mrb[96].mxu0 %vm946_vm0, %v6520_v1 }
 0x16b   :  { %6120 = vmatprep.mubr.msk.bf16.mxu0 %vm946_vm0, %v6521_v2 }
 0x16e   :  { %6023 = vmatmul.mubr.msk.bf16.gmra.mrb[100].mxu1 %vm946_vm0, %v7528_v19 }
 0x16f   :  { %6026 = vmatprep.mubr.msk.bf16.mxu1 %vm946_vm0, %v7531_v20 }
 0x172   :  { %6121 = vmatmul.mubr.msk.bf16.gmra.mrb[100].mxu0 %vm946_vm0, %v6522_v3  ;;  %v7643_v3 = vld [vmem:[#allocation7 + $0x1e8] sm:$0xff]  }
 0x173   :  { %6124 = vmatprep.mubr.msk.bf16.mxu0 %vm946_vm0, %v6523_v4 }
 0x176   :  { %6027 = vmatmul.mubr.msk.bf16.gmra.mrb[104].mxu1 %vm946_vm0, %v7538_v21 }
 0x177   :  { %6030 = vmatprep.mubr.msk.bf16.mxu1 %vm946_vm0, %v7541_v22 }
 0x179   :  { %v5924_v23 = vpop.f32.mrb[0].mxu1 }
 0x17a   :  { %6125 = vmatmul.mubr.msk.bf16.gmra.mrb[104].mxu0 %vm946_vm0, %v6524_v5  ;;  %v1173_v24 = vpop.f32.mrb[1].mxu1  ;;  %v7647_v5 = vld [vmem:[#allocation7 + $0x1f0] sm:$0xff]  }
 0x17b   :  { %6128 = vmatprep.mubr.msk.bf16.mxu0 %vm946_vm0, %v6525_v6  ;;  %v5925_v26 = vpop.f32.mrb[2].mxu1 }
 0x17c   :  { %v1176_v28 = vpop.f32.mrb[3].mxu1 }
 0x17d   :  { %v7553_v29 = vpop.f32.mrb[0].mxu0 }
 0x17e   :  { %v7556_v30 = vmul.f32 %v5924_v23, %v7553_v29  ;;  %v7558_v31 = vpop.f32.mrb[1].mxu0  ;;  %6031 = vmatmul.mubr.msk.bf16.gmra.mrb[108].mxu1 %vm946_vm0, %v7548_v25 }
 0x17f   :  { %v7561_v32 = vmul.f32 %v1173_v24, %v7558_v31  ;;  %v7565_v33 = vpop.f32.mrb[2].mxu0  ;;  %6034 = vmatprep.mubr.msk.bf16.mxu1 %vm946_vm0, %v7551_v27 }
 0x180   :  { %v7568_v34 = vmul.f32 %v5925_v26, %v7565_v33  ;;  %v7570_v35 = vpop.f32.mrb[3].mxu0 }
 0x181   :  { %v7575_v36 = vmul.f32 %v1176_v28, %v7570_v35  ;;  %v5928_v37 = vpop.f32.mrb[4].mxu1 }
 0x182   :  { %6129 = vmatmul.mubr.msk.bf16.gmra.mrb[108].mxu0 %vm946_vm0, %v7468_v7  ;;  %v1189_v38 = vpop.f32.mrb[5].mxu1 }
 0x183   :  { %6132 = vmatprep.mubr.msk.bf16.mxu0 %vm946_vm0, %v7471_v8  ;;  %v5929_v40 = vpop.f32.mrb[6].mxu1 }
 0x184   :  { %v1192_v42 = vpop.f32.mrb[7].mxu1 }
 0x185   :  { %v7585_v43 = vpop.f32.mrb[4].mxu0 }
 0x186   :  { %v7588_v44 = vmul.f32 %v5928_v37, %v7585_v43  ;;  %v7590_v45 = vpop.f32.mrb[5].mxu0  ;;  %6035 = vmatmul.mubr.msk.bf16.gmra.mrb[112].mxu1 %vm946_vm0, %v7579_v39  ;;  %v7675_v37 = vld [vmem:[#allocation7 + $0x1f8] sm:$0xff]  }
 0x187   :  { %v7593_v46 = vmul.f32 %v1189_v38, %v7590_v45  ;;  %v7597_v47 = vpop.f32.mrb[6].mxu0  ;;  %6038 = vmatprep.mubr.msk.bf16.mxu1 %vm946_vm0, %v7583_v41 }
 0x188   :  { %v7600_v48 = vmul.f32 %v5929_v40, %v7597_v47  ;;  %v7602_v49 = vpop.f32.mrb[7].mxu0 }
 0x189   :  { %v7607_v50 = vmul.f32 %v1192_v42, %v7602_v49  ;;  %v5932_v51 = vpop.f32.mrb[8].mxu1 }
 0x18a   :  { %6133 = vmatmul.mubr.msk.bf16.gmra.mrb[112].mxu0 %vm946_vm0, %v7478_v9  ;;  %v1205_v52 = vpop.f32.mrb[9].mxu1 }
 0x18b   :  { %6136 = vmatprep.mubr.msk.bf16.mxu0 %vm946_vm0, %v7481_v10  ;;  %v5933_v54 = vpop.f32.mrb[10].mxu1 }
 0x18c   :  { %v1208_v56 = vpop.f32.mrb[11].mxu1 }
 0x18d   :  { %v7617_v57 = vpop.f32.mrb[8].mxu0 }
 0x18e   :  { %v7620_v58 = vmul.f32 %v5932_v51, %v7617_v57  ;;  %v7622_v59 = vpop.f32.mrb[9].mxu0  ;;  %6039 = vmatmul.mubr.msk.bf16.gmra.mrb[116].mxu1 %vm946_vm0, %v7611_v53 }
 0x18f   :  { %v7625_v60 = vmul.f32 %v1205_v52, %v7622_v59  ;;  %v7629_v61 = vpop.f32.mrb[10].mxu0  ;;  %6042 = vmatprep.mubr.msk.bf16.mxu1 %vm946_vm0, %v7615_v55 }
 0x190   :  { %v7632_v62 = vmul.f32 %v5933_v54, %v7629_v61  ;;  %v7634_v63 = vpop.f32.mrb[11].mxu0 }
 0x191   :  { %v7639_v0 = vmul.f32 %v1208_v56, %v7634_v63  ;;  %v5936_v1 = vpop.f32.mrb[12].mxu1 }
 0x192   :  { %10742 = vst [vmem:[#allocation24_spill] sm:$0xff] %v7632_v62  ;;  %6137 = vmatmul.mubr.msk.bf16.gmra.mrb[116].mxu0 %vm946_vm0, %v7488_v11  ;;  %v1221_v2 = vpop.f32.mrb[13].mxu1 }
 0x193   :  { %6140 = vmatprep.mubr.msk.bf16.mxu0 %vm946_vm0, %v7491_v12  ;;  %v5937_v4 = vpop.f32.mrb[14].mxu1 }
 0x194   :  { %v1224_v6 = vpop.f32.mrb[15].mxu1 }
 0x195   :  { %v7649_v7 = vpop.f32.mrb[12].mxu0 }
 0x196   :  { %v7652_v8 = vmul.f32 %v5936_v1, %v7649_v7  ;;  %v7654_v9 = vpop.f32.mrb[13].mxu0  ;;  %6043 = vmatmul.mubr.msk.bf16.gmra.mrb[120].mxu1 %vm946_vm0, %v7643_v3 }
 0x197   :  { %v7657_v10 = vmul.f32 %v1221_v2, %v7654_v9  ;;  %v7661_v11 = vpop.f32.mrb[14].mxu0  ;;  %6046 = vmatprep.mubr.msk.bf16.mxu1 %vm946_vm0, %v7647_v5 }
 0x198   :  { %10743 = vst [vmem:[#allocation25_spill] sm:$0xff] %v7652_v8  ;;  %v7664_v12 = vmul.f32 %v5937_v4, %v7661_v11  ;;  %v7666_v23 = vpop.f32.mrb[15].mxu0 }
 0x199   :  { %10744 = vst [vmem:[#allocation26_spill] sm:$0xff] %v7657_v10  ;;  %v7671_v24 = vmul.f32 %v1224_v6, %v7666_v23  ;;  %v5940_v26 = vpop.f32.mrb[16].mxu1 }
 0x19a   :  { %10745 = vst [vmem:[#allocation27_spill] sm:$0xff] %v7664_v12  ;;  %6141 = vmatmul.mubr.msk.bf16.gmra.mrb[120].mxu0 %vm946_vm0, %v7498_v13  ;;  %v1237_v28 = vpop.f32.mrb[17].mxu1 }
 0x19b   :  { %10746 = vst [vmem:[#allocation28_spill] sm:$0xff] %v7671_v24  ;;  %6144 = vmatprep.mubr.msk.bf16.mxu0 %vm946_vm0, %v7501_v14  ;;  %v5941_v38 = vpop.f32.mrb[18].mxu1 }
 0x19c   :  { %v1240_v40 = vpop.f32.mrb[19].mxu1 }
 0x19d   :  { %v7679_v42 = vpop.f32.mrb[16].mxu0 }
 0x19e   :  { %v7682_v51 = vmul.f32 %v5940_v26, %v7679_v42  ;;  %v7684_v52 = vpop.f32.mrb[17].mxu0  ;;  %6047 = vmatmul.mubr.msk.bf16.gmra.mrb[124].mxu1 %vm946_vm0, %v7675_v37 }
 0x19f   :  { %v7687_v54 = vmul.f32 %v1237_v28, %v7684_v52  ;;  %v7691_v13 = vpop.f32.mrb[18].mxu0 }
 0x1a0   :  { %10747 = vst [vmem:[#allocation29_spill] sm:$0xff] %v7682_v51  ;;  %v7694_v56 = vmul.f32 %v5941_v38, %v7691_v13  ;;  %v7696_v14 = vpop.f32.mrb[19].mxu0 }
 0x1a1   :  { %10748 = vst [vmem:[#allocation30_spill] sm:$0xff] %v7687_v54  ;;  %v7699_v1 = vmul.f32 %v1240_v40, %v7696_v14  ;;  %v5944_v2 = vpop.f32.mrb[20].mxu1 }
 0x1a2   :  { %10749 = vst [vmem:[#allocation31_spill] sm:$0xff] %v7694_v56  ;;  %6145 = vmatmul.mubr.msk.bf16.gmra.mrb[124].mxu0 %vm946_vm0, %v7508_v15  ;;  %v1253_v4 = vpop.f32.mrb[21].mxu1 }
 0x1a3   :  { %10750 = vst [vmem:[#allocation32_spill] sm:$0xff] %v7699_v1  ;;  %6148 = vmatprep.mubr.msk.bf16.mxu0 %vm946_vm0, %v7511_v16  ;;  %v5945_v6 = vpop.f32.mrb[22].mxu1 }
 0x1a4   :  { %v1256_v26 = vpop.f32.mrb[23].mxu1 }
 0x1a5   :  { %v7705_v28 = vpop.f32.mrb[20].mxu0 }
 0x1a6   :  { %v7708_v38 = vmul.f32 %v5944_v2, %v7705_v28  ;;  %v7710_v56 = vpop.f32.mrb[21].mxu0 }
 0x1a7   :  { %v7713_v40 = vmul.f32 %v1253_v4, %v7710_v56  ;;  %v7715_v51 = vpop.f32.mrb[22].mxu0 }
 0x1a8   :  { %10751 = vst [vmem:[#allocation33_spill] sm:$0xff] %v7708_v38  ;;  %v7718_v15 = vmul.f32 %v5945_v6, %v7715_v51  ;;  %v7720_v1 = vpop.f32.mrb[23].mxu0 }
 0x1a9   :  { %10752 = vst [vmem:[#allocation34_spill] sm:$0xff] %v7713_v40  ;;  %v7723_v16 = vmul.f32 %v1256_v26, %v7720_v1  ;;  %v5948_v54 = vpop.f32.mrb[24].mxu1 }
 0x1aa   :  { %10753 = vst [vmem:[#allocation35_spill] sm:$0xff] %v7718_v15  ;;  %6149 = vmatmul.mubr.msk.bf16.gmra.mrb[128].mxu0 %vm946_vm0, %v7518_v17  ;;  %v1269_v2 = vpop.f32.mrb[25].mxu1 }
 0x1ab   :  { %10754 = vst [vmem:[#allocation36_spill] sm:$0xff] %v7723_v16  ;;  %6152 = vmatprep.mubr.msk.bf16.mxu0 %vm946_vm0, %v7521_v18  ;;  %v5949_v4 = vpop.f32.mrb[26].mxu1 }
 0x1ac   :  { %v1272_v38 = vpop.f32.mrb[27].mxu1 }
 0x1ad   :  { %v7729_v40 = vpop.f32.mrb[24].mxu0 }
 0x1ae   :  { %v7732_v6 = vmul.f32 %v5948_v54, %v7729_v40  ;;  %v7734_v15 = vpop.f32.mrb[25].mxu0 }
 0x1af   :  { %v7737_v26 = vmul.f32 %v1269_v2, %v7734_v15  ;;  %v7739_v16 = vpop.f32.mrb[26].mxu0 }
 0x1b0   :  { %10755 = vst [vmem:[#allocation37_spill] sm:$0xff] %v7732_v6  ;;  %v7742_v17 = vmul.f32 %v5949_v4, %v7739_v16  ;;  %v7744_v12 = vpop.f32.mrb[27].mxu0 }
 0x1b1   :  { %10756 = vst [vmem:[#allocation38_spill] sm:$0xff] %v7737_v26  ;;  %v7747_v18 = vmul.f32 %v1272_v38, %v7744_v12  ;;  %v5952_v8 = vpop.f32.mrb[28].mxu1 }
 0x1b2   :  { %10757 = vst [vmem:[#allocation39_spill] sm:$0xff] %v7742_v17  ;;  %6153 = vmatmul.mubr.msk.bf16.gmra.mrb[132].mxu0 %vm946_vm0, %v7528_v19  ;;  %v1285_v54 = vpop.f32.mrb[29].mxu1 }
 0x1b3   :  { %10758 = vst [vmem:[#allocation40_spill] sm:$0xff] %v7747_v18  ;;  %6156 = vmatprep.mubr.msk.bf16.mxu0 %vm946_vm0, %v7531_v20  ;;  %v5953_v2 = vpop.f32.mrb[30].mxu1 }
 0x1b4   :  { %v1288_v6 = vpop.f32.mrb[31].mxu1 }
 0x1b5   :  { %v7753_v26 = vpop.f32.mrb[28].mxu0 }
 0x1b6   :  { %v2267_v4 = vmul.f32 %v5952_v8, %v7753_v26  ;;  %v7756_v17 = vpop.f32.mrb[29].mxu0 }
 0x1b7   :  { %v7759_v38 = vmul.f32 %v1285_v54, %v7756_v17  ;;  %v7761_v18 = vpop.f32.mrb[30].mxu0 }
 0x1b8   :  { %v2268_v19 = vmul.f32 %v5953_v2, %v7761_v18  ;;  %v7764_v24 = vpop.f32.mrb[31].mxu0  ;;  %6241 = vmatprep.mubr.msk.f32.mxu1 %vm2373_vm2, %v2267_v4 }
 0x1b9   :  { %10759 = vst [vmem:[#allocation41_spill] sm:$0xff] %v7759_v38  ;;  %v7768_v20 = vmul.f32 %v1288_v6, %v7764_v24  ;;  %v5956_v10 = vpop.f32.mrb[32].mxu1 }
 0x1ba   :  { %6157 = vmatmul.mubr.msk.bf16.gmra.mrb[136].mxu0 %vm946_vm0, %v7538_v21  ;;  %6242 = vmatmul.mubr.msk.f32.vlgmr.msra.gmra.mrb[128].mxu1 %vm2373_vm2, %v2268_v19  ;;  %v2271_v8 = vmul.f32 %v5956_v10, %v7553_v29  ;;  %v1301_v54 = vpop.f32.mrb[33].mxu1 }
 0x1bb   :  { %10760 = vst [vmem:[#allocation42_spill] sm:$0xff] %v7768_v20  ;;  %6160 = vmatprep.mubr.msk.bf16.mxu0 %vm946_vm0, %v7541_v22  ;;  %v2269_v2 = vmul.f32 %v1301_v54, %v7558_v31  ;;  %v5957_v38 = vpop.f32.mrb[34].mxu1 }
 0x1bc   :  { %v2272_v4 = vmul.f32 %v5957_v38, %v7565_v33  ;;  %v1304_v62 = vpop.f32.mrb[35].mxu1 }
 0x1bd   :  { %v7778_v6 = vpop.f32.mrb[32].mxu0  ;;  %v2270_v20 = vmul.f32 %v1304_v62, %v7570_v35  ;;  %6244 = vmatprep.mubr.msk.f32.mxu1 %vm2373_vm2, %v2269_v2 }
 0x1be   :  { %10761 = vst [vmem:[#allocation43_spill] sm:$0xff] %v7778_v6  ;;  %v7782_v21 = vpop.f32.mrb[33].mxu0 }
 0x1bf   :  { %10762 = vst [vmem:[#allocation44_spill] sm:$0xff] %v7782_v21  ;;  %v7784_v19 = vpop.f32.mrb[34].mxu0  ;;  %6245 = vmatmul.mubr.msk.f32.gmra.mrb[130].mxu1 %vm2373_vm2, %v2270_v20 }
 0x1c0   :  { %10763 = vst [vmem:[#allocation45_spill] sm:$0xff] %v7784_v19  ;;  %v7787_v10 = vpop.f32.mrb[35].mxu0  ;;  %6247 = vmatprep.mubr.msk.f32.mxu1 %vm2373_vm2, %v2271_v8 }
 0x1c1   :  { %10764 = vst [vmem:[#allocation46_spill] sm:$0xff] %v7787_v10  ;;  %v5960_v22 = vpop.f32.mrb[36].mxu1 }
 0x1c2   :  { %6161 = vmatmul.mubr.msk.bf16.gmra.mrb[140].mxu0 %vm946_vm0, %v7548_v25  ;;  %v2275_v38 = vmul.f32 %v5960_v22, %v7585_v43  ;;  %v1317_v54 = vpop.f32.mrb[37].mxu1 }
 0x1c3   :  { %6164 = vmatprep.mubr.msk.bf16.mxu0 %vm946_vm0, %v7551_v27  ;;  %v2273_v62 = vmul.f32 %v1317_v54, %v7590_v45  ;;  %v5961_v2 = vpop.f32.mrb[38].mxu1  ;;  %6248 = vmatmul.mubr.msk.f32.gmra.mrb[132].mxu1 %vm2373_vm2, %v2272_v4 }
 0x1c4   :  { %v2276_v20 = vmul.f32 %v5961_v2, %v7597_v47  ;;  %v1320_v10 = vpop.f32.mrb[39].mxu1 }
 0x1c5   :  { %v7798_v21 = vpop.f32.mrb[36].mxu0  ;;  %v2274_v8 = vmul.f32 %v1320_v10, %v7602_v49  ;;  %6250 = vmatprep.mubr.msk.f32.mxu1 %vm2373_vm2, %v2273_v62 }
 0x1c6   :  { %10765 = vst [vmem:[#allocation47_spill] sm:$0xff] %v7798_v21  ;;  %v7802_v25 = vpop.f32.mrb[37].mxu0 }
 0x1c7   :  { %10766 = vst [vmem:[#allocation48_spill] sm:$0xff] %v7802_v25  ;;  %v7804_v22 = vpop.f32.mrb[38].mxu0  ;;  %6251 = vmatmul.mubr.msk.f32.gmra.mrb[134].mxu1 %vm2373_vm2, %v2274_v8 }
 0x1c8   :  { %10767 = vst [vmem:[#allocation49_spill] sm:$0xff] %v7804_v22  ;;  %v7807_v27 = vpop.f32.mrb[39].mxu0  ;;  %6253 = vmatprep.mubr.msk.f32.mxu1 %vm2373_vm2, %v2275_v38 }
 0x1c9   :  { %10768 = vst [vmem:[#allocation50_spill] sm:$0xff] %v7807_v27  ;;  %v5964_v4 = vpop.f32.mrb[40].mxu1 }
 0x1ca   :  { %6165 = vmatmul.mubr.msk.bf16.gmra.mrb[144].mxu0 %vm946_vm0, %v7579_v39  ;;  %v2279_v54 = vmul.f32 %v5964_v4, %v7617_v57  ;;  %v1333_v2 = vpop.f32.mrb[41].mxu1 }
 0x1cb   :  { %6168 = vmatprep.mubr.msk.bf16.mxu0 %vm946_vm0, %v7583_v41  ;;  %v2277_v10 = vmul.f32 %v1333_v2, %v7622_v59  ;;  %v5965_v62 = vpop.f32.mrb[42].mxu1  ;;  %6254 = vmatmul.mubr.msk.f32.gmra.mrb[136].mxu1 %vm2373_vm2, %v2276_v20 }
 0x1cc   :  { %v2280_v8 = vmul.f32 %v5965_v62, %v7629_v61  ;;  %v1336_v22 = vpop.f32.mrb[43].mxu1 }
 0x1cd   :  { %v7818_v21 = vpop.f32.mrb[40].mxu0  ;;  %v2278_v38 = vmul.f32 %v1336_v22, %v7634_v63  ;;  %6256 = vmatprep.mubr.msk.f32.mxu1 %vm2373_vm2, %v2277_v10 }
 0x1ce   :  { %10769 = vst [vmem:[#allocation51_spill] sm:$0xff] %v7818_v21  ;;  %v7822_v39 = vpop.f32.mrb[41].mxu0 }
 0x1cf   :  { %10770 = vst [vmem:[#allocation52_spill] sm:$0xff] %v7822_v39  ;;  %v7824_v4 = vpop.f32.mrb[42].mxu0  ;;  %6257 = vmatmul.mubr.msk.f32.gmra.mrb[138].mxu1 %vm2373_vm2, %v2278_v38 }
 0x1d0   :  { %10771 = vst [vmem:[#allocation53_spill] sm:$0xff] %v7824_v4  ;;  %v7827_v41 = vpop.f32.mrb[43].mxu0  ;;  %6259 = vmatprep.mubr.msk.f32.mxu1 %vm2373_vm2, %v2279_v54 }
 0x1d1   :  { %10772 = vst [vmem:[#allocation54_spill] sm:$0xff] %v7827_v41  ;;  %v5968_v20 = vpop.f32.mrb[44].mxu1 }
 0x1d2   :  { %6169 = vmatmul.mubr.msk.bf16.gmra.mrb[148].mxu0 %vm946_vm0, %v7611_v53  ;;  %v2283_v2 = vmul.f32 %v5968_v20, %v7649_v7  ;;  %v1349_v62 = vpop.f32.mrb[45].mxu1 }
 0x1d3   :  { %6172 = vmatprep.mubr.msk.bf16.mxu0 %vm946_vm0, %v7615_v55  ;;  %v2281_v22 = vmul.f32 %v1349_v62, %v7654_v9  ;;  %v5969_v10 = vpop.f32.mrb[46].mxu1  ;;  %6260 = vmatmul.mubr.msk.f32.gmra.mrb[140].mxu1 %vm2373_vm2, %v2280_v8 }
 0x1d4   :  { %v2284_v38 = vmul.f32 %v5969_v10, %v7661_v11  ;;  %v1352_v4 = vpop.f32.mrb[47].mxu1 }
 0x1d5   :  { %v7838_v21 = vpop.f32.mrb[44].mxu0  ;;  %v2282_v54 = vmul.f32 %v1352_v4, %v7666_v23  ;;  %6262 = vmatprep.mubr.msk.f32.mxu1 %vm2373_vm2, %v2281_v22 }
 0x1d6   :  { %10773 = vst [vmem:[#allocation55_spill] sm:$0xff] %v7838_v21  ;;  %v7842_v53 = vpop.f32.mrb[45].mxu0 }
 0x1d7   :  { %10774 = vst [vmem:[#allocation56_spill] sm:$0xff] %v7842_v53  ;;  %v7844_v20 = vpop.f32.mrb[46].mxu0  ;;  %6263 = vmatmul.mubr.msk.f32.gmra.mrb[142].mxu1 %vm2373_vm2, %v2282_v54 }
 0x1d8   :  { %10775 = vst [vmem:[#allocation57_spill] sm:$0xff] %v7844_v20  ;;  %v7847_v55 = vpop.f32.mrb[47].mxu0  ;;  %6265 = vmatprep.mubr.msk.f32.mxu1 %vm2373_vm2, %v2283_v2 }
 0x1d9   :  { %10776 = vst [vmem:[#allocation58_spill] sm:$0xff] %v7847_v55  ;;  %v5972_v8 = vpop.f32.mrb[48].mxu1 }
 0x1da   :  { %6173 = vmatmul.mubr.msk.bf16.gmra.mrb[152].mxu0 %vm946_vm0, %v7643_v3  ;;  %v2287_v62 = vmul.f32 %v5972_v8, %v7679_v42  ;;  %v1365_v10 = vpop.f32.mrb[49].mxu1 }
 0x1db   :  { %6176 = vmatprep.mubr.msk.bf16.mxu0 %vm946_vm0, %v7647_v5  ;;  %v2285_v4 = vmul.f32 %v1365_v10, %v7684_v52  ;;  %v5973_v22 = vpop.f32.mrb[50].mxu1  ;;  %6266 = vmatmul.mubr.msk.f32.gmra.mrb[144].mxu1 %vm2373_vm2, %v2284_v38 }
 0x1dc   :  { %v2288_v54 = vmul.f32 %v5973_v22, %v7691_v13  ;;  %v1368_v20 = vpop.f32.mrb[51].mxu1 }
 0x1dd   :  { %v7858_v21 = vpop.f32.mrb[48].mxu0  ;;  %v2286_v2 = vmul.f32 %v1368_v20, %v7696_v14  ;;  %6268 = vmatprep.mubr.msk.f32.mxu1 %vm2373_vm2, %v2285_v4 }
 0x1de   :  { %10777 = vst [vmem:[#allocation59_spill] sm:$0xff] %v7858_v21  ;;  %v7862_v3 = vpop.f32.mrb[49].mxu0 }
 0x1df   :  { %10778 = vst [vmem:[#allocation60_spill] sm:$0xff] %v7862_v3  ;;  %v7864_v8 = vpop.f32.mrb[50].mxu0  ;;  %6269 = vmatmul.mubr.msk.f32.gmra.mrb[146].mxu1 %vm2373_vm2, %v2286_v2 }
 0x1e0   :  { %10779 = vst [vmem:[#allocation61_spill] sm:$0xff] %v7864_v8  ;;  %v7867_v5 = vpop.f32.mrb[51].mxu0  ;;  %6271 = vmatprep.mubr.msk.f32.mxu1 %vm2373_vm2, %v2287_v62 }
 0x1e1   :  { %10780 = vst [vmem:[#allocation62_spill] sm:$0xff] %v7867_v5  ;;  %v5976_v38 = vpop.f32.mrb[52].mxu1 }
 0x1e2   :  { %6177 = vmatmul.mubr.msk.bf16.gmra.mrb[156].mxu0 %vm946_vm0, %v7675_v37  ;;  %v2291_v10 = vmul.f32 %v5976_v38, %v7705_v28  ;;  %v1381_v22 = vpop.f32.mrb[53].mxu1 }
 0x1e3   :  { %6196 = vmatprep.mubr.msk.f32.mxu0 %vm2373_vm2, %v7561_v32  ;;  %v2289_v20 = vmul.f32 %v1381_v22, %v7710_v56  ;;  %v5977_v4 = vpop.f32.mrb[54].mxu1  ;;  %6272 = vmatmul.mubr.msk.f32.gmra.mrb[148].mxu1 %vm2373_vm2, %v2288_v54 }
 0x1e4   :  { %v2292_v2 = vmul.f32 %v5977_v4, %v7715_v51  ;;  %v1384_v8 = vpop.f32.mrb[55].mxu1 }
 0x1e5   :  { %v7878_v21 = vpop.f32.mrb[52].mxu0  ;;  %v2290_v62 = vmul.f32 %v1384_v8, %v7720_v1  ;;  %6274 = vmatprep.mubr.msk.f32.mxu1 %vm2373_vm2, %v2289_v20 }
 0x1e6   :  { %10781 = vst [vmem:[#allocation63_spill] sm:$0xff] %v7878_v21  ;;  %v7882_v37 = vpop.f32.mrb[53].mxu0 }
 0x1e7   :  { %10782 = vst [vmem:[#allocation64_spill] sm:$0xff] %v7882_v37  ;;  %v7884_v38 = vpop.f32.mrb[54].mxu0  ;;  %6275 = vmatmul.mubr.msk.f32.gmra.mrb[150].mxu1 %vm2373_vm2, %v2290_v62 }
 0x1e8   :  { %10783 = vst [vmem:[#allocation65_spill] sm:$0xff] %v7884_v38  ;;  %v7887_v32 = vpop.f32.mrb[55].mxu0  ;;  %6277 = vmatprep.mubr.msk.f32.mxu1 %vm2373_vm2, %v2291_v10 }
 0x1e9   :  { %10784 = vst [vmem:[#allocation66_spill] sm:$0xff] %v7887_v32  ;;  %v5980_v54 = vpop.f32.mrb[56].mxu1  ;;  %v10816_v32 = vld [vmem:[#allocation33_spill] sm:$0xff] }
 0x1ea   :  { %6197 = vmatmul.mubr.msk.f32.vlgmr.msra.gmra.mrb[160].mxu0 %vm2373_vm2, %v7575_v36  ;;  %v2295_v22 = vmul.f32 %v5980_v54, %v7729_v40  ;;  %v1397_v4 = vpop.f32.mrb[57].mxu1 }
 0x1eb   :  { %6199 = vmatprep.mubr.msk.f32.mxu0 %vm2373_vm2, %v7556_v30  ;;  %v2293_v8 = vmul.f32 %v1397_v4, %v7734_v15  ;;  %v5981_v20 = vpop.f32.mrb[58].mxu1  ;;  %6278 = vmatmul.mubr.msk.f32.gmra.mrb[152].mxu1 %vm2373_vm2, %v2292_v2 }
 0x1ec   :  { %v2296_v62 = vmul.f32 %v5981_v20, %v7739_v16  ;;  %v1400_v38 = vpop.f32.mrb[59].mxu1 }
 0x1ed   :  { %v7898_v21 = vpop.f32.mrb[56].mxu0  ;;  %v2294_v10 = vmul.f32 %v1400_v38, %v7744_v12  ;;  %6280 = vmatprep.mubr.msk.f32.mxu1 %vm2373_vm2, %v2293_v8 }
 0x1ee   :  { %10785 = vst [vmem:[#allocation67_spill] sm:$0xff] %v7898_v21  ;;  %6200 = vmatmul.mubr.msk.f32.gmra.mrb[162].mxu0 %vm2373_vm2, %v7568_v34  ;;  %v7904_v36 = vpop.f32.mrb[57].mxu0 }
 0x1ef   :  { %10786 = vst [vmem:[#allocation68_spill] sm:$0xff] %v7904_v36  ;;  %6202 = vmatprep.mubr.msk.f32.mxu0 %vm2373_vm2, %v7593_v46  ;;  %v7908_v30 = vpop.f32.mrb[58].mxu0  ;;  %6281 = vmatmul.mubr.msk.f32.gmra.mrb[154].mxu1 %vm2373_vm2, %v2294_v10 }
 0x1f0   :  { %10787 = vst [vmem:[#allocation69_spill] sm:$0xff] %v7908_v30  ;;  %v7911_v2 = vpop.f32.mrb[59].mxu0  ;;  %6283 = vmatprep.mubr.msk.f32.mxu1 %vm2373_vm2, %v2295_v22  ;;  %v10808_v30 = vld [vmem:[#allocation29_spill] sm:$0xff] }
 0x1f1   :  { %10788 = vst [vmem:[#allocation70_spill] sm:$0xff] %v7911_v2  ;;  %v5984_v54 = vpop.f32.mrb[60].mxu1 }
 0x1f2   :  { %6203 = vmatmul.mubr.msk.f32.gmra.mrb[164].mxu0 %vm2373_vm2, %v7607_v50  ;;  %v2299_v38 = vmul.f32 %v5984_v54, %v7753_v26  ;;  %v1413_v34 = vpop.f32.mrb[61].mxu1 }
 0x1f3   :  { %6205 = vmatprep.mubr.msk.f32.mxu0 %vm2373_vm2, %v7588_v44  ;;  %v2297_v46 = vmul.f32 %v1413_v34, %v7756_v17  ;;  %v5985_v4 = vpop.f32.mrb[62].mxu1  ;;  %6284 = vmatmul.mubr.msk.f32.gmra.mrb[156].mxu1 %vm2373_vm2, %v2296_v62 }
 0x1f4   :  { %v2300_v8 = vmul.f32 %v5985_v4, %v7761_v18  ;;  %v1416_v20 = vpop.f32.mrb[63].mxu1 }
 0x1f5   :  { %v7922_v10 = vpop.f32.mrb[60].mxu0  ;;  %v2298_v22 = vmul.f32 %v1416_v20, %v7764_v24  ;;  %6286 = vmatprep.mubr.msk.f32.mxu1 %vm2373_vm2, %v2297_v46 }
 0x1f6   :  { %10789 = vst [vmem:[#allocation71_spill] sm:$0xff] %v7922_v10  ;;  %6206 = vmatmul.mubr.msk.f32.gmra.mrb[166].mxu0 %vm2373_vm2, %v7600_v48  ;;  %v7928_v50 = vpop.f32.mrb[61].mxu0 }
 0x1f7   :  { %10790 = vst [vmem:[#allocation72_spill] sm:$0xff] %v7928_v50  ;;  %6208 = vmatprep.mubr.msk.f32.mxu0 %vm2373_vm2, %v7625_v60  ;;  %v7932_v44 = vpop.f32.mrb[62].mxu0  ;;  %6287 = vmatmul.mubr.msk.f32.gmra.mrb[158].mxu1 %vm2373_vm2, %v2298_v22 }
 0x1f8   :  { %10791 = vst [vmem:[#allocation73_spill] sm:$0xff] %v7932_v44  ;;  %v7935_v62 = vpop.f32.mrb[63].mxu0  ;;  %6289 = vmatprep.mubr.msk.f32.mxu1 %vm2373_vm2, %v2299_v38  ;;  %v10800_v44 = vld [vmem:[#allocation25_spill] sm:$0xff] }
 0x1f9   :  { %10792 = vst [vmem:[#allocation74_spill] sm:$0xff] %v7935_v62  ;;  %v5988_v54 = vpop.f32.mrb[64].mxu1 }
 0x1fa   :  { %6209 = vmatmul.mubr.msk.f32.gmra.mrb[168].mxu0 %vm2373_vm2, %v7639_v0  ;;  %v2303_v34 = vmul.f32 %v5988_v54, %v7553_v29  ;;  %v1429_v48 = vpop.f32.mrb[65].mxu1  ;;  %v10794_v0 = vld [vmem:[#allocation24_spill] sm:$0xff] }
 0x1fb   :  { %6211 = vmatprep.mubr.msk.f32.mxu0 %vm2373_vm2, %v7620_v58  ;;  %v2301_v60 = vmul.f32 %v1429_v48, %v7558_v31  ;;  %v5989_v46 = vpop.f32.mrb[66].mxu1  ;;  %6290 = vmatmul.mubr.msk.f32.gmra.mrb[160].mxu1 %vm2373_vm2, %v2300_v8  ;;  %v10796_v58 = vld [vmem:[#allocation26_spill] sm:$0xff] }
 0x1fc   :  { %v2304_v4 = vmul.f32 %v5989_v46, %v7565_v33  ;;  %v1432_v20 = vpop.f32.mrb[67].mxu1 }
 0x1fd   :  { %v7946_v22 = vpop.f32.mrb[64].mxu0  ;;  %v2302_v38 = vmul.f32 %v1432_v20, %v7570_v35  ;;  %6292 = vmatprep.mubr.msk.f32.mxu1 %vm2373_vm2, %v2301_v60  ;;  %v10799_v20 = vld [vmem:[#allocation28_spill] sm:$0xff] }
 0x1fe   :  { %10793 = vst [vmem:[#allocation75_spill] sm:$0xff] %v7946_v22  ;;  %6212 = vmatmul.mubr.msk.f32.gmra.mrb[170].mxu0 %vm2373_vm2, %v10794_v0  ;;  %v7952_v54 = vpop.f32.mrb[65].mxu0 }
 0x1ff   :  { %10795 = vst [vmem:[#allocation24_spill] sm:$0xff] %v7952_v54  ;;  %6214 = vmatprep.mubr.msk.f32.mxu0 %vm2373_vm2, %v10796_v58  ;;  %v7956_v48 = vpop.f32.mrb[66].mxu0  ;;  %6293 = vmatmul.mubr.msk.f32.gmra.mrb[162].mxu1 %vm2373_vm2, %v2302_v38 }
 0x200   :  { %10797 = vst [vmem:[#allocation26_spill] sm:$0xff] %v7956_v48  ;;  %v7959_v8 = vpop.f32.mrb[67].mxu0  ;;  %6295 = vmatprep.mubr.msk.f32.mxu1 %vm2373_vm2, %v2303_v34 }
 0x201   :  { %10798 = vst [vmem:[#allocation76_spill] sm:$0xff] %v7959_v8  ;;  %v5992_v46 = vpop.f32.mrb[68].mxu1 }
 0x202   :  { %6215 = vmatmul.mubr.msk.f32.gmra.mrb[172].mxu0 %vm2373_vm2, %v10799_v20  ;;  %v2307_v60 = vmul.f32 %v5992_v46, %v7585_v43  ;;  %v1445_v0 = vpop.f32.mrb[69].mxu1  ;;  %v10802_v20 = vld [vmem:[#allocation27_spill] sm:$0xff] }
 0x203   :  { %6217 = vmatprep.mubr.msk.f32.mxu0 %vm2373_vm2, %v10800_v44  ;;  %v2305_v58 = vmul.f32 %v1445_v0, %v7590_v45  ;;  %v5993_v10 = vpop.f32.mrb[70].mxu1  ;;  %6296 = vmatmul.mubr.msk.f32.gmra.mrb[164].mxu1 %vm2373_vm2, %v2304_v4  ;;  %v10804_v44 = vld [vmem:[#allocation30_spill] sm:$0xff] }
 0x204   :  { %v2308_v38 = vmul.f32 %v5993_v10, %v7597_v47  ;;  %v1448_v62 = vpop.f32.mrb[71].mxu1 }
 0x205   :  { %v7970_v50 = vpop.f32.mrb[68].mxu0  ;;  %v2306_v34 = vmul.f32 %v1448_v62, %v7602_v49  ;;  %6298 = vmatprep.mubr.msk.f32.mxu1 %vm2373_vm2, %v2305_v58  ;;  %v10807_v62 = vld [vmem:[#allocation32_spill] sm:$0xff] }
 0x206   :  { %10801 = vst [vmem:[#allocation28_spill] sm:$0xff] %v7970_v50  ;;  %6218 = vmatmul.mubr.msk.f32.gmra.mrb[174].mxu0 %vm2373_vm2, %v10802_v20  ;;  %v7976_v46 = vpop.f32.mrb[69].mxu0 }
 0x207   :  { %10803 = vst [vmem:[#allocation25_spill] sm:$0xff] %v7976_v46  ;;  %6220 = vmatprep.mubr.msk.f32.mxu0 %vm2373_vm2, %v10804_v44  ;;  %v7980_v0 = vpop.f32.mrb[70].mxu0  ;;  %6299 = vmatmul.mubr.msk.f32.gmra.mrb[166].mxu1 %vm2373_vm2, %v2306_v34 }
 0x208   :  { %10805 = vst [vmem:[#allocation27_spill] sm:$0xff] %v7980_v0  ;;  %v7983_v10 = vpop.f32.mrb[71].mxu0  ;;  %6301 = vmatprep.mubr.msk.f32.mxu1 %vm2373_vm2, %v2307_v60 }
 0x209   :  { %10806 = vst [vmem:[#allocation30_spill] sm:$0xff] %v7983_v10  ;;  %v5996_v4 = vpop.f32.mrb[72].mxu1 }
 0x20a   :  { %6221 = vmatmul.mubr.msk.f32.gmra.mrb[176].mxu0 %vm2373_vm2, %v10807_v62  ;;  %v2311_v58 = vmul.f32 %v5996_v4, %v7617_v57  ;;  %v1461_v20 = vpop.f32.mrb[73].mxu1  ;;  %v10810_v62 = vld [vmem:[#allocation31_spill] sm:$0xff] }
 0x20b   :  { %6223 = vmatprep.mubr.msk.f32.mxu0 %vm2373_vm2, %v10808_v30  ;;  %v2309_v44 = vmul.f32 %v1461_v20, %v7622_v59  ;;  %v5997_v21 = vpop.f32.mrb[74].mxu1  ;;  %6302 = vmatmul.mubr.msk.f32.gmra.mrb[168].mxu1 %vm2373_vm2, %v2308_v38  ;;  %v10812_v30 = vld [vmem:[#allocation34_spill] sm:$0xff] }
 0x20c   :  { %v2312_v34 = vmul.f32 %v5997_v21, %v7629_v61  ;;  %v1464_v2 = vpop.f32.mrb[75].mxu1 }
 0x20d   :  { %v7994_v36 = vpop.f32.mrb[72].mxu0  ;;  %v2310_v60 = vmul.f32 %v1464_v2, %v7634_v63  ;;  %6304 = vmatprep.mubr.msk.f32.mxu1 %vm2373_vm2, %v2309_v44  ;;  %v10815_v2 = vld [vmem:[#allocation36_spill] sm:$0xff] }
 0x20e   :  { %10809 = vst [vmem:[#allocation32_spill] sm:$0xff] %v7994_v36  ;;  %6224 = vmatmul.mubr.msk.f32.gmra.mrb[178].mxu0 %vm2373_vm2, %v10810_v62  ;;  %v8000_v4 = vpop.f32.mrb[73].mxu0 }
 0x20f   :  { %10811 = vst [vmem:[#allocation29_spill] sm:$0xff] %v8000_v4  ;;  %6226 = vmatprep.mubr.msk.f32.mxu0 %vm2373_vm2, %v10812_v30  ;;  %v8004_v20 = vpop.f32.mrb[74].mxu0  ;;  %6305 = vmatmul.mubr.msk.f32.gmra.mrb[170].mxu1 %vm2373_vm2, %v2310_v60 }
 0x210   :  { %10813 = vst [vmem:[#allocation31_spill] sm:$0xff] %v8004_v20  ;;  %v8007_v21 = vpop.f32.mrb[75].mxu0  ;;  %6307 = vmatprep.mubr.msk.f32.mxu1 %vm2373_vm2, %v2311_v58 }
 0x211   :  { %10814 = vst [vmem:[#allocation34_spill] sm:$0xff] %v8007_v21  ;;  %v6000_v38 = vpop.f32.mrb[76].mxu1 }
 0x212   :  { %6227 = vmatmul.mubr.msk.f32.gmra.mrb[180].mxu0 %vm2373_vm2, %v10815_v2  ;;  %v2315_v44 = vmul.f32 %v6000_v38, %v7649_v7  ;;  %v1477_v62 = vpop.f32.mrb[77].mxu1  ;;  %v10818_v2 = vld [vmem:[#allocation35_spill] sm:$0xff] }
 0x213   :  { %6229 = vmatprep.mubr.msk.f32.mxu0 %vm2373_vm2, %v10816_v32  ;;  %v2313_v30 = vmul.f32 %v1477_v62, %v7654_v9  ;;  %v6001_v37 = vpop.f32.mrb[78].mxu1  ;;  %6308 = vmatmul.mubr.msk.f32.gmra.mrb[172].mxu1 %vm2373_vm2, %v2312_v34  ;;  %v10820_v32 = vld [vmem:[#allocation38_spill] sm:$0xff] }
 0x214   :  { %v2316_v60 = vmul.f32 %v6001_v37, %v7661_v11  ;;  %v1480_v5 = vpop.f32.mrb[79].mxu1 }
 0x215   :  { %v8018_v3 = vpop.f32.mrb[76].mxu0  ;;  %v2314_v58 = vmul.f32 %v1480_v5, %v7666_v23  ;;  %6310 = vmatprep.mubr.msk.f32.mxu1 %vm2373_vm2, %v2313_v30  ;;  %v10823_v5 = vld [vmem:[#allocation40_spill] sm:$0xff] }
 0x216   :  { %10817 = vst [vmem:[#allocation36_spill] sm:$0xff] %v8018_v3  ;;  %6230 = vmatmul.mubr.msk.f32.gmra.mrb[182].mxu0 %vm2373_vm2, %v10818_v2  ;;  %v8024_v38 = vpop.f32.mrb[77].mxu0  ;;  %v10824_v3 = vld [vmem:[#allocation37_spill] sm:$0xff] }
 0x217   :  { %10819 = vst [vmem:[#allocation33_spill] sm:$0xff] %v8024_v38  ;;  %6232 = vmatprep.mubr.msk.f32.mxu0 %vm2373_vm2, %v10820_v32  ;;  %v8028_v62 = vpop.f32.mrb[78].mxu0  ;;  %6311 = vmatmul.mubr.msk.f32.gmra.mrb[174].mxu1 %vm2373_vm2, %v2314_v58 }
 0x218   :  { %10821 = vst [vmem:[#allocation35_spill] sm:$0xff] %v8028_v62  ;;  %v8031_v37 = vpop.f32.mrb[79].mxu0  ;;  %6313 = vmatprep.mubr.msk.f32.mxu1 %vm2373_vm2, %v2315_v44 }
 0x219   :  { %10822 = vst [vmem:[#allocation38_spill] sm:$0xff] %v8031_v37  ;;  %v6004_v34 = vpop.f32.mrb[80].mxu1 }
 0x21a   :  { %6233 = vmatmul.mubr.msk.f32.gmra.mrb[184].mxu0 %vm2373_vm2, %v10823_v5  ;;  %v2319_v30 = vmul.f32 %v6004_v34, %v7679_v42  ;;  %v1493_v2 = vpop.f32.mrb[81].mxu1  ;;  %v10826_v5 = vld [vmem:[#allocation39_spill] sm:$0xff] }
 0x21b   :  { %6235 = vmatprep.mubr.msk.f32.mxu0 %vm2373_vm2, %v10824_v3  ;;  %v2317_v32 = vmul.f32 %v1493_v2, %v7684_v52  ;;  %v6005_v38 = vpop.f32.mrb[82].mxu1  ;;  %6314 = vmatmul.mubr.msk.f32.gmra.mrb[176].mxu1 %vm2373_vm2, %v2316_v60  ;;  %v10828_v3 = vld [vmem:[#allocation41_spill] sm:$0xff] }
 0x21c   :  { %v2320_v58 = vmul.f32 %v6005_v38, %v7691_v13  ;;  %v1496_v62 = vpop.f32.mrb[83].mxu1 }
 0x21d   :  { %v8042_v37 = vpop.f32.mrb[80].mxu0  ;;  %v2318_v44 = vmul.f32 %v1496_v62, %v7696_v14  ;;  %6316 = vmatprep.mubr.msk.f32.mxu1 %vm2373_vm2, %v2317_v32  ;;  %v10831_v62 = vld [vmem:[#allocation42_spill] sm:$0xff] }
 0x21e   :  { %10825 = vst [vmem:[#allocation40_spill] sm:$0xff] %v8042_v37  ;;  %6236 = vmatmul.mubr.msk.f32.gmra.mrb[186].mxu0 %vm2373_vm2, %v10826_v5  ;;  %v8048_v34 = vpop.f32.mrb[81].mxu0 }
 0x21f   :  { %10827 = vst [vmem:[#allocation37_spill] sm:$0xff] %v8048_v34  ;;  %6238 = vmatprep.mubr.msk.f32.mxu0 %vm2373_vm2, %v10828_v3  ;;  %v8052_v2 = vpop.f32.mrb[82].mxu0  ;;  %6317 = vmatmul.mubr.msk.f32.gmra.mrb[178].mxu1 %vm2373_vm2, %v2318_v44 }
 0x220   :  { %10829 = vst [vmem:[#allocation39_spill] sm:$0xff] %v8052_v2  ;;  %v8055_v60 = vpop.f32.mrb[83].mxu0  ;;  %6319 = vmatprep.mubr.msk.f32.mxu1 %vm2373_vm2, %v2319_v30 }
 0x221   :  { %10830 = vst [vmem:[#allocation41_spill] sm:$0xff] %v8055_v60  ;;  %v6008_v38 = vpop.f32.mrb[84].mxu1 }
 0x222   :  { %6239 = vmatmul.mubr.msk.f32.gmra.mrb[188].mxu0 %vm2373_vm2, %v10831_v62  ;;  %v2323_v32 = vmul.f32 %v6008_v38, %v7705_v28  ;;  %v1509_v5 = vpop.f32.mrb[85].mxu1 }
 0x223   :  { %v2321_v37 = vmul.f32 %v1509_v5, %v7710_v56  ;;  %v6009_v34 = vpop.f32.mrb[86].mxu1  ;;  %6320 = vmatmul.mubr.msk.f32.gmra.mrb[180].mxu1 %vm2373_vm2, %v2320_v58 }
 0x224   :  { %v2324_v3 = vmul.f32 %v6009_v34, %v7715_v51  ;;  %v1512_v2 = vpop.f32.mrb[87].mxu1 }
 0x225   :  { %v8064_v44 = vpop.f32.mrb[84].mxu0  ;;  %v2322_v60 = vmul.f32 %v1512_v2, %v7720_v1  ;;  %6322 = vmatprep.mubr.msk.f32.mxu1 %vm2373_vm2, %v2321_v37 }
 0x226   :  { %10832 = vst [vmem:[#allocation42_spill] sm:$0xff] %v8064_v44  ;;  %v8068_v30 = vpop.f32.mrb[85].mxu0 }
 0x227   :  { %10833 = vst [vmem:[#allocation77_spill] sm:$0xff] %v8068_v30  ;;  %v8070_v62 = vpop.f32.mrb[86].mxu0  ;;  %6323 = vmatmul.mubr.msk.f32.gmra.mrb[182].mxu1 %vm2373_vm2, %v2322_v60 }
 0x228   :  { %10834 = vst [vmem:[#allocation78_spill] sm:$0xff] %v8070_v62  ;;  %v8073_v38 = vpop.f32.mrb[87].mxu0  ;;  %6325 = vmatprep.mubr.msk.f32.mxu1 %vm2373_vm2, %v2323_v32 }
 0x229   :  { %10835 = vst [vmem:[#allocation79_spill] sm:$0xff] %v8073_v38  ;;  %v6012_v58 = vpop.f32.mrb[88].mxu1 }
 0x22a   :  { %v2327_v34 = vmul.f32 %v6012_v58, %v7729_v40  ;;  %v1525_v5 = vpop.f32.mrb[89].mxu1 }
 0x22b   :  { %v2325_v44 = vmul.f32 %v1525_v5, %v7734_v15  ;;  %v6013_v55 = vpop.f32.mrb[90].mxu1  ;;  %6326 = vmatmul.mubr.msk.f32.gmra.mrb[184].mxu1 %vm2373_vm2, %v2324_v3 }
 0x22c   :  { %v2328_v37 = vmul.f32 %v6013_v55, %v7739_v16  ;;  %v1528_v2 = vpop.f32.mrb[91].mxu1 }
 0x22d   :  { %v8080_v30 = vpop.f32.mrb[88].mxu0  ;;  %v2326_v60 = vmul.f32 %v1528_v2, %v7744_v12  ;;  %6328 = vmatprep.mubr.msk.f32.mxu1 %vm2373_vm2, %v2325_v44 }
 0x22e   :  { %10836 = vst [vmem:[#allocation80_spill] sm:$0xff] %v8080_v30  ;;  %v8084_v62 = vpop.f32.mrb[89].mxu0 }
 0x22f   :  { %10837 = vst [vmem:[#allocation81_spill] sm:$0xff] %v8084_v62  ;;  %v8086_v32 = vpop.f32.mrb[90].mxu0  ;;  %6329 = vmatmul.mubr.msk.f32.gmra.mrb[186].mxu1 %vm2373_vm2, %v2326_v60 }
 0x230   :  { %10838 = vst [vmem:[#allocation82_spill] sm:$0xff] %v8086_v32  ;;  %v8089_v58 = vpop.f32.mrb[91].mxu0  ;;  %6331 = vmatprep.mubr.msk.f32.mxu1 %vm2373_vm2, %v2327_v34 }
 0x231   :  { %10839 = vst [vmem:[#allocation83_spill] sm:$0xff] %v8089_v58  ;;  %v6016_v3 = vpop.f32.mrb[92].mxu1 }
 0x232   :  { %v2331_v55 = vmul.f32 %v6016_v3, %v7753_v26  ;;  %v1541_v5 = vpop.f32.mrb[93].mxu1 }
 0x233   :  { %v2329_v30 = vmul.f32 %v1541_v5, %v7756_v17  ;;  %v6017_v38 = vpop.f32.mrb[94].mxu1  ;;  %6332 = vmatmul.mubr.msk.f32.gmra.mrb[188].mxu1 %vm2373_vm2, %v2328_v37 }
 0x234   :  { %v2332_v44 = vmul.f32 %v6017_v38, %v7761_v18  ;;  %v1544_v2 = vpop.f32.mrb[95].mxu1 }
 0x235   :  { %v8096_v62 = vpop.f32.mrb[92].mxu0  ;;  %v2330_v60 = vmul.f32 %v1544_v2, %v7764_v24  ;;  %6334 = vmatprep.mubr.msk.f32.mxu1 %vm2373_vm2, %v2329_v30 }
 0x236   :  { %10840 = vst [vmem:[#allocation84_spill] sm:$0xff] %v8096_v62  ;;  %v8100_v32 = vpop.f32.mrb[93].mxu0 }
 0x237   :  { %10841 = vst [vmem:[#allocation85_spill] sm:$0xff] %v8100_v32  ;;  %v8102_v34 = vpop.f32.mrb[94].mxu0  ;;  %6335 = vmatmul.mubr.msk.f32.gmra.mrb[190].mxu1 %vm2373_vm2, %v2330_v60 }
 0x238   :  { %10842 = vst [vmem:[#allocation86_spill] sm:$0xff] %v8102_v34  ;;  %v8105_v3 = vpop.f32.mrb[95].mxu0  ;;  %6337 = vmatprep.mubr.msk.f32.mxu1 %vm2373_vm2, %v2331_v55 }
 0x239   :  { %10843 = vst [vmem:[#allocation87_spill] sm:$0xff] %v8105_v3  ;;  %v6020_v37 = vpop.f32.mrb[96].mxu1  ;;  %v7120_v3 = vmov 1966171168  }
 0x23a   :  { %v2335_v38 = vmul.f32 %v6020_v37, %v7553_v29  ;;  %v1557_v5 = vpop.f32.mrb[97].mxu1 }
 0x23b   :  { %v2333_v62 = vmul.f32 %v1557_v5, %v7558_v31  ;;  %v6021_v58 = vpop.f32.mrb[98].mxu1  ;;  %6338 = vmatmul.mubr.msk.f32.gmra.mrb[192].mxu1 %vm2373_vm2, %v2332_v44 }
 0x23c   :  { %v2336_v30 = vmul.f32 %v6021_v58, %v7565_v33  ;;  %v1560_v2 = vpop.f32.mrb[99].mxu1 }
 0x23d   :  { %v8112_v32 = vpop.f32.mrb[96].mxu0  ;;  %v2334_v60 = vmul.f32 %v1560_v2, %v7570_v35  ;;  %6340 = vmatprep.mubr.msk.f32.mxu1 %vm2373_vm2, %v2333_v62 }
 0x23e   :  { %10844 = vst [vmem:[#allocation88_spill] sm:$0xff] %v8112_v32  ;;  %v8116_v34 = vpop.f32.mrb[97].mxu0 }
 0x23f   :  { %10845 = vst [vmem:[#allocation89_spill] sm:$0xff] %v8116_v34  ;;  %v8118_v55 = vpop.f32.mrb[98].mxu0  ;;  %6341 = vmatmul.mubr.msk.f32.gmra.mrb[194].mxu1 %vm2373_vm2, %v2334_v60 }
 0x240   :  { %10846 = vst [vmem:[#allocation90_spill] sm:$0xff] %v8118_v55  ;;  %v8121_v29 = vpop.f32.mrb[99].mxu0  ;;  %6343 = vmatprep.mubr.msk.f32.mxu1 %vm2373_vm2, %v2335_v38 }
 0x241   :  { %10847 = vst [vmem:[#allocation91_spill] sm:$0xff] %v8121_v29  ;;  %v6024_v31 = vpop.f32.mrb[100].mxu1 }
 0x242   :  { %v2339_v33 = vmul.f32 %v6024_v31, %v7585_v43  ;;  %v1573_v58 = vpop.f32.mrb[101].mxu1 }
 0x243   :  { %v2337_v44 = vmul.f32 %v1573_v58, %v7590_v45  ;;  %v6025_v37 = vpop.f32.mrb[102].mxu1  ;;  %6344 = vmatmul.mubr.msk.f32.gmra.mrb[196].mxu1 %vm2373_vm2, %v2336_v30 }
 0x244   :  { %v2340_v35 = vmul.f32 %v6025_v37, %v7597_v47  ;;  %v1576_v62 = vpop.f32.mrb[103].mxu1 }
 0x245   :  { %v8128_v5 = vpop.f32.mrb[100].mxu0  ;;  %v2338_v2 = vmul.f32 %v1576_v62, %v7602_v49  ;;  %6346 = vmatprep.mubr.msk.f32.mxu1 %vm2373_vm2, %v2337_v44 }
 0x246   :  { %10848 = vst [vmem:[#allocation92_spill] sm:$0xff] %v8128_v5  ;;  %v8132_v60 = vpop.f32.mrb[101].mxu0 }
 0x247   :  { %10849 = vst [vmem:[#allocation93_spill] sm:$0xff] %v8132_v60  ;;  %v8134_v38 = vpop.f32.mrb[102].mxu0  ;;  %6347 = vmatmul.mubr.msk.f32.gmra.mrb[198].mxu1 %vm2373_vm2, %v2338_v2 }
 0x248   :  { %10850 = vst [vmem:[#allocation94_spill] sm:$0xff] %v8134_v38  ;;  %v8137_v43 = vpop.f32.mrb[103].mxu0  ;;  %6349 = vmatprep.mubr.msk.f32.mxu1 %vm2373_vm2, %v2339_v33 }
 0x249   :  { %10851 = vst [vmem:[#allocation95_spill] sm:$0xff] %v8137_v43  ;;  %v6028_v45 = vpop.f32.mrb[104].mxu1 }
 0x24a   :  { %v2343_v47 = vmul.f32 %v6028_v45, %v7617_v57  ;;  %v1589_v30 = vpop.f32.mrb[105].mxu1 }
 0x24b   :  { %v2341_v31 = vmul.f32 %v1589_v30, %v7622_v59  ;;  %v6029_v58 = vpop.f32.mrb[106].mxu1  ;;  %6350 = vmatmul.mubr.msk.f32.gmra.mrb[200].mxu1 %vm2373_vm2, %v2340_v35 }
 0x24c   :  { %v2344_v49 = vmul.f32 %v6029_v58, %v7629_v61  ;;  %v1592_v44 = vpop.f32.mrb[107].mxu1 }
 0x24d   :  { %v8144_v37 = vpop.f32.mrb[104].mxu0  ;;  %v2342_v62 = vmul.f32 %v1592_v44, %v7634_v63  ;;  %6352 = vmatprep.mubr.msk.f32.mxu1 %vm2373_vm2, %v2341_v31 }
 0x24e   :  { %10852 = vst [vmem:[#allocation96_spill] sm:$0xff] %v8144_v37  ;;  %v8148_v2 = vpop.f32.mrb[105].mxu0 }
 0x24f   :  { %10853 = vst [vmem:[#allocation97_spill] sm:$0xff] %v8148_v2  ;;  %v8150_v33 = vpop.f32.mrb[106].mxu0  ;;  %6353 = vmatmul.mubr.msk.f32.gmra.mrb[202].mxu1 %vm2373_vm2, %v2342_v62 }
 0x250   :  { %10854 = vst [vmem:[#allocation98_spill] sm:$0xff] %v8150_v33  ;;  %v8153_v57 = vpop.f32.mrb[107].mxu0  ;;  %6355 = vmatprep.mubr.msk.f32.mxu1 %vm2373_vm2, %v2343_v47 }
 0x251   :  { %10855 = vst [vmem:[#allocation99_spill] sm:$0xff] %v8153_v57  ;;  %v6032_v59 = vpop.f32.mrb[108].mxu1 }
 0x252   :  { %v2347_v61 = vmul.f32 %v6032_v59, %v7649_v7  ;;  %v1605_v35 = vpop.f32.mrb[109].mxu1 }
 0x253   :  { %v2345_v45 = vmul.f32 %v1605_v35, %v7654_v9  ;;  %v6033_v30 = vpop.f32.mrb[110].mxu1  ;;  %6356 = vmatmul.mubr.msk.f32.gmra.mrb[204].mxu1 %vm2373_vm2, %v2344_v49 }
 0x254   :  { %v2348_v63 = vmul.f32 %v6033_v30, %v7661_v11  ;;  %v1608_v31 = vpop.f32.mrb[111].mxu1 }
 0x255   :  { %v8160_v58 = vpop.f32.mrb[108].mxu0  ;;  %v2346_v44 = vmul.f32 %v1608_v31, %v7666_v23  ;;  %6358 = vmatprep.mubr.msk.f32.mxu1 %vm2373_vm2, %v2345_v45 }
 0x256   :  { %10856 = vst [vmem:[#allocation100_spill] sm:$0xff] %v8160_v58  ;;  %v8164_v62 = vpop.f32.mrb[109].mxu0 }
 0x257   :  { %10857 = vst [vmem:[#allocation101_spill] sm:$0xff] %v8164_v62  ;;  %v8166_v47 = vpop.f32.mrb[110].mxu0  ;;  %6359 = vmatmul.mubr.msk.f32.gmra.mrb[206].mxu1 %vm2373_vm2, %v2346_v44 }
 0x258   :  { %10858 = vst [vmem:[#allocation102_spill] sm:$0xff] %v8166_v47  ;;  %v8169_v7 = vpop.f32.mrb[111].mxu0  ;;  %6361 = vmatprep.mubr.msk.f32.mxu1 %vm2373_vm2, %v2347_v61 }
 0x259   :  { %10859 = vst [vmem:[#allocation103_spill] sm:$0xff] %v8169_v7  ;;  %v6036_v9 = vpop.f32.mrb[112].mxu1 }
 0x25a   :  { %v2351_v11 = vmul.f32 %v6036_v9, %v7679_v42  ;;  %v1621_v49 = vpop.f32.mrb[113].mxu1 }
 0x25b   :  { %v2349_v59 = vmul.f32 %v1621_v49, %v7684_v52  ;;  %v6037_v35 = vpop.f32.mrb[114].mxu1  ;;  %6362 = vmatmul.mubr.msk.f32.gmra.mrb[208].mxu1 %vm2373_vm2, %v2348_v63 }
 0x25c   :  { %v2352_v23 = vmul.f32 %v6037_v35, %v7691_v13  ;;  %v1624_v45 = vpop.f32.mrb[115].mxu1 }
 0x25d   :  { %v8176_v30 = vpop.f32.mrb[112].mxu0  ;;  %v2350_v31 = vmul.f32 %v1624_v45, %v7696_v14  ;;  %6364 = vmatprep.mubr.msk.f32.mxu1 %vm2373_vm2, %v2349_v59 }
 0x25e   :  { %10860 = vst [vmem:[#allocation104_spill] sm:$0xff] %v8176_v30  ;;  %v8180_v44 = vpop.f32.mrb[113].mxu0 }
 0x25f   :  { %10861 = vst [vmem:[#allocation105_spill] sm:$0xff] %v8180_v44  ;;  %v8182_v61 = vpop.f32.mrb[114].mxu0  ;;  %6365 = vmatmul.mubr.msk.f32.gmra.mrb[210].mxu1 %vm2373_vm2, %v2350_v31 }
 0x260   :  { %10862 = vst [vmem:[#allocation106_spill] sm:$0xff] %v8182_v61  ;;  %v8185_v42 = vpop.f32.mrb[115].mxu0  ;;  %6367 = vmatprep.mubr.msk.f32.mxu1 %vm2373_vm2, %v2351_v11 }
 0x261   :  { %10863 = vst [vmem:[#allocation107_spill] sm:$0xff] %v8185_v42  ;;  %v6040_v52 = vpop.f32.mrb[116].mxu1  ;;  %v5558_v42 = vld.sshfl [vmem:[#allocation2] sm:$0x33 pattern:$0x75316420] }
 0x262   :  { %v2355_v13 = vmul.f32 %v6040_v52, %v7705_v28  ;;  %v1637_v63 = vpop.f32.mrb[117].mxu1  ;;  %v3472_v44 = vcombine.high %v5558_v42, %v5558_v42 }
 0x263   :  { %v2353_v9 = vmul.f32 %v1637_v63, %v7710_v56  ;;  %v6041_v49 = vpop.f32.mrb[118].mxu1  ;;  %6368 = vmatmul.mubr.msk.f32.gmra.mrb[212].mxu1 %vm2373_vm2, %v2352_v23 }
 0x264   :  { %v2356_v14 = vmul.f32 %v6041_v49, %v7715_v51  ;;  %v1640_v59 = vpop.f32.mrb[119].mxu1 }
 0x265   :  { %v8192_v35 = vpop.f32.mrb[116].mxu0  ;;  %v2354_v45 = vmul.f32 %v1640_v59, %v7720_v1  ;;  %6370 = vmatprep.mubr.msk.f32.mxu1 %vm2373_vm2, %v2353_v9 }
 0x266   :  { %10864 = vst [vmem:[#allocation108_spill] sm:$0xff] %v8192_v35  ;;  %v8196_v31 = vpop.f32.mrb[117].mxu0 }
 0x267   :  { %10865 = vst [vmem:[#allocation109_spill] sm:$0xff] %v8196_v31  ;;  %v8198_v11 = vpop.f32.mrb[118].mxu0  ;;  %6371 = vmatmul.mubr.msk.f32.gmra.mrb[214].mxu1 %vm2373_vm2, %v2354_v45 }
 0x268   :  { %10866 = vst [vmem:[#allocation110_spill] sm:$0xff] %v8198_v11  ;;  %v8201_v28 = vpop.f32.mrb[119].mxu0  ;;  %6373 = vmatprep.mubr.msk.f32.mxu1 %vm2373_vm2, %v2355_v13 }
 0x269   :  { %10867 = vst [vmem:[#allocation111_spill] sm:$0xff] %v8201_v28  ;;  %v6044_v56 = vpop.f32.mrb[120].mxu1 }
 0x26a   :  { %v2359_v51 = vmul.f32 %v6044_v56, %v7729_v40  ;;  %v1653_v23 = vpop.f32.mrb[121].mxu1 }
 0x26b   :  { %v2357_v52 = vmul.f32 %v1653_v23, %v7734_v15  ;;  %v6045_v63 = vpop.f32.mrb[122].mxu1  ;;  %6374 = vmatmul.mubr.msk.f32.gmra.mrb[216].mxu1 %vm2373_vm2, %v2356_v14 }
 0x26c   :  { %v2360_v1 = vmul.f32 %v6045_v63, %v7739_v16  ;;  %v1656_v9 = vpop.f32.mrb[123].mxu1 }
 0x26d   :  { %v8208_v49 = vpop.f32.mrb[120].mxu0  ;;  %v2358_v59 = vmul.f32 %v1656_v9, %v7744_v12  ;;  %6376 = vmatprep.mubr.msk.f32.mxu1 %vm2373_vm2, %v2357_v52 }
 0x26e   :  { %10868 = vst [vmem:[#allocation112_spill] sm:$0xff] %v8208_v49  ;;  %v8212_v45 = vpop.f32.mrb[121].mxu0  ;;  %v3476_v49 = vlaneseq }
 0x26f   :  { %10869 = vst [vmem:[#allocation113_spill] sm:$0xff] %v8212_v45  ;;  %v8214_v13 = vpop.f32.mrb[122].mxu0  ;;  %6377 = vmatmul.mubr.msk.f32.gmra.mrb[218].mxu1 %vm2373_vm2, %v2358_v59 }
 0x270   :  { %10870 = vst [vmem:[#allocation114_spill] sm:$0xff] %v8214_v13  ;;  %v8217_v40 = vpop.f32.mrb[123].mxu0  ;;  %6379 = vmatprep.mubr.msk.f32.mxu1 %vm2373_vm2, %v2359_v51  ;;  %v3474_v13 = vunpack.c.l.s4 %v7120_v3  ;;  %v3477_v31 = vshrl.u32 %v3476_v49, 7 }
 0x271   :  { %10871 = vst [vmem:[#allocation115_spill] sm:$0xff] %v8217_v40  ;;  %v6048_v15 = vpop.f32.mrb[124].mxu1 }
 0x272   :  { %v2363_v16 = vmul.f32 %v6048_v15, %v7753_v26  ;;  %v1669_v14 = vpop.f32.mrb[125].mxu1  ;;  %v3475_v28 = vunpack.c.0.s8 %v3474_v13  ;;  %v8295_v13 = vsub.s32 0, %v3477_v31 }
 0x273   :  { %v2361_v56 = vmul.f32 %v1669_v14, %v7756_v17  ;;  %v6049_v23 = vpop.f32.mrb[126].mxu1  ;;  %6380 = vmatmul.mubr.msk.f32.gmra.mrb[220].mxu1 %vm2373_vm2, %v2360_v1 }
 0x274   :  { %v2364_v12 = vmul.f32 %v6049_v23, %v7761_v18  ;;  %v1672_v52 = vpop.f32.mrb[127].mxu1  ;;  %v3478_v47 = vsub.s32 %v3475_v28, %v3477_v31 }
 0x275   :  { %v8224_v63 = vpop.f32.mrb[124].mxu0  ;;  %v2362_v9 = vmul.f32 %v1672_v52, %v7764_v24  ;;  %6382 = vmatprep.mubr.msk.f32.mxu1 %vm2373_vm2, %v2361_v56  ;;  %v6551_v52 = vld [vmem:[#allocation13] sm:$0xff]  }
 0x276   :  { %10872 = vst [vmem:[#allocation116_spill] sm:$0xff] %v8224_v63  ;;  %v8228_v59 = vpop.f32.mrb[125].mxu0  ;;  %6388 = vmatprep.subr.bf16.mxu0 %v6551_v52 }
 0x277   :  { %10873 = vst [vmem:[#allocation117_spill] sm:$0xff] %v8228_v59  ;;  %v8230_v51 = vpop.f32.mrb[126].mxu0  ;;  %6383 = vmatmul.mubr.msk.f32.gmra.mrb[222].mxu1 %vm2373_vm2, %v2362_v9  ;;  %6389 = vmatpush3.bf16.msra.mxu0 %v6551_v52 }
 0x278   :  { %10874 = vst [vmem:[#allocation118_spill] sm:$0xff] %v8230_v51  ;;  %v8233_v26 = vpop.f32.mrb[127].mxu0  ;;  %6385 = vmatprep.mubr.msk.f32.mxu1 %vm2373_vm2, %v2363_v16 }
 0x279   :  { %10875 = vst [vmem:[#allocation119_spill] sm:$0xff] %v8233_v26 }
 0x27b   :  { %6386 = vmatmul.mubr.msk.f32.gmra.mrb[224].mxu1 %vm2373_vm2, %v2364_v12 }
 0x27d   :  { %v8237_v17 = vpop.f32.mrb[128].mxu0 }
 0x27e   :  { %10876 = vst [vmem:[#allocation120_spill] sm:$0xff] %v8237_v17  ;;  %v8239_v18 = vpop.f32.mrb[129].mxu0 }
 0x27f   :  { %10877 = vst [vmem:[#allocation121_spill] sm:$0xff] %v8239_v18  ;;  %v8241_v1 = vpop.f32.mrb[130].mxu0 }
 0x280   :  { %10878 = vst [vmem:[#allocation122_spill] sm:$0xff] %v8241_v1  ;;  %v8243_v24 = vpop.f32.mrb[131].mxu0 }
 0x281   :  { %10879 = vst [vmem:[#allocation123_spill] sm:$0xff] %v8243_v24 }
 0x285   :  { %v8245_v15 = vpop.f32.mrb[132].mxu0 }
 0x286   :  { %10880 = vst [vmem:[#allocation124_spill] sm:$0xff] %v8245_v15  ;;  %v8247_v14 = vpop.f32.mrb[133].mxu0 }
 0x287   :  { %10881 = vst [vmem:[#allocation125_spill] sm:$0xff] %v8247_v14  ;;  %v8249_v56 = vpop.f32.mrb[134].mxu0 }
 0x288   :  { %10882 = vst [vmem:[#allocation126_spill] sm:$0xff] %v8249_v56  ;;  %v8251_v23 = vpop.f32.mrb[135].mxu0 }
 0x289   :  { %10883 = vst [vmem:[#allocation127_spill] sm:$0xff] %v8251_v23 }
 0x28d   :  { %v8253_v16 = vpop.f32.mrb[128].mxu1  ;;  %v8255_v12 = vpop.f32.mrb[136].mxu0 }
 0x28e   :  { %10884 = vst [vmem:[#allocation128_spill] sm:$0xff] %v8255_v12  ;;  %v8257_v9 = vpop.f32.mrb[129].mxu1  ;;  %v8259_v51 = vpop.f32.mrb[137].mxu0 }
 0x28f   :  { %10885 = vst [vmem:[#allocation129_spill] sm:$0xff] %v8259_v51  ;;  %v8261_v63 = vpop.f32.mrb[138].mxu0 }
 0x290   :  { %10886 = vst [vmem:[#allocation130_spill] sm:$0xff] %v8261_v63  ;;  %v8263_v26 = vpop.f32.mrb[139].mxu0 }
 0x291   :  { %10887 = vst [vmem:[#allocation131_spill] sm:$0xff] %v8263_v26 }
 0x292   :  { %v8265_v59 = vpop.f32.mrb[130].mxu1 }
 0x293   :  { %v8267_v40 = vpop.f32.mrb[131].mxu1 }
 0x295   :  { %v8269_v52 = vpop.f32.mrb[140].mxu0 }
 0x296   :  { %10888 = vst [vmem:[#allocation132_spill] sm:$0xff] %v8269_v52  ;;  %v8271_v45 = vpop.f32.mrb[141].mxu0  ;;  %v8273_v11 = vpop.f32.mrb[132].mxu1 }
 0x297   :  { %10889 = vst [vmem:[#allocation133_spill] sm:$0xff] %v8271_v45  ;;  %v8275_v35 = vpop.f32.mrb[142].mxu0  ;;  %v8277_v61 = vpop.f32.mrb[133].mxu1  ;;  %v8287_v45 = vrot.slane %v3472_v44, %v3478_v47 }
 0x298   :  { %10890 = vst [vmem:[#allocation134_spill] sm:$0xff] %v8275_v35  ;;  %v8279_v30 = vpop.f32.mrb[143].mxu0 }
 0x299   :  { %10891 = vst [vmem:[#allocation135_spill] sm:$0xff] %v8279_v30  ;;  %v8303_v28 = vrot.slane %v8287_v45, %v8295_v13 }
 0x29a   :  { %v8281_v3 = vpop.f32.mrb[134].mxu1 }
 0x29b   :  { %v8283_v58 = vpop.f32.mrb[135].mxu1 }
 0x29c   :  { %v8441_v60 = vadd.f32 %v8303_v28, %v8283_v58 }
 0x29d   :  { %v8285_v52 = vpop.f32.mrb[144].mxu0 }
 0x29e   :  { %10892 = vst [vmem:[#allocation136_spill] sm:$0xff] %v8285_v52  ;;  %v8289_v7 = vpop.f32.mrb[145].mxu0  ;;  %v8291_v35 = vpop.f32.mrb[136].mxu1  ;;  %10931 = vst [vmem:[#allocation175_spill] sm:$0xff] %v8441_v60 }
 0x29f   :  { %10893 = vst [vmem:[#allocation137_spill] sm:$0xff] %v8289_v7  ;;  %v8293_v49 = vpop.f32.mrb[146].mxu0  ;;  %v8297_v30 = vpop.f32.mrb[137].mxu1  ;;  %v8481_v34 = vadd.f32 %v8291_v35, %v8303_v28 }
 0x2a0   :  { %10894 = vst [vmem:[#allocation138_spill] sm:$0xff] %v8293_v49  ;;  %v8299_v62 = vpop.f32.mrb[147].mxu0 }
 0x2a1   :  { %10895 = vst [vmem:[#allocation139_spill] sm:$0xff] %v8299_v62  ;;  %10936 = vst [vmem:[#allocation180_spill] sm:$0xff] %v8481_v34  ;;  %v8513_v54 = vsel %vm2373_vm2, %v8481_v34, -inf }
 0x2a2   :  { %v6258_v53 = vpop.f32.mrb[138].mxu1 }
 0x2a3   :  { %v8306_v44 = vadd.f32 %v6258_v53, %v8303_v28  ;;  %v3024_v52 = vpop.f32.mrb[139].mxu1 }
 0x2a4   :  { %v8309_v7 = vadd.f32 %v8303_v28, %v3024_v52 }
 0x2a5   :  { %10896 = vst [vmem:[#allocation140_spill] sm:$0xff] %v8306_v44  ;;  %v8311_v63 = vpop.f32.mrb[148].mxu0 }
 0x2a6   :  { %10897 = vst [vmem:[#allocation141_spill] sm:$0xff] %v8309_v7  ;;  %10898 = vst [vmem:[#allocation142_spill] sm:$0xff] %v8311_v63  ;;  %v8313_v31 = vpop.f32.mrb[149].mxu0  ;;  %v6261_v49 = vpop.f32.mrb[140].mxu1 }
 0x2a7   :  { %10899 = vst [vmem:[#allocation143_spill] sm:$0xff] %v8313_v31  ;;  %v8315_v12 = vpop.f32.mrb[150].mxu0  ;;  %v8318_v62 = vadd.f32 %v6261_v49, %v8303_v28  ;;  %v3034_v33 = vpop.f32.mrb[141].mxu1 }
 0x2a8   :  { %10900 = vst [vmem:[#allocation144_spill] sm:$0xff] %v8315_v12  ;;  %v8320_v37 = vpop.f32.mrb[151].mxu0  ;;  %v8323_v53 = vadd.f32 %v8303_v28, %v3034_v33 }
 0x2a9   :  { %10901 = vst [vmem:[#allocation145_spill] sm:$0xff] %v8318_v62  ;;  %10902 = vst [vmem:[#allocation146_spill] sm:$0xff] %v8320_v37 }
 0x2aa   :  { %10903 = vst [vmem:[#allocation147_spill] sm:$0xff] %v8323_v53  ;;  %v6264_v20 = vpop.f32.mrb[142].mxu1 }
 0x2ab   :  { %v8326_v52 = vadd.f32 %v6264_v20, %v8303_v28  ;;  %v3044_v36 = vpop.f32.mrb[143].mxu1 }
 0x2ac   :  { %v8329_v63 = vadd.f32 %v8303_v28, %v3044_v36 }
 0x2ad   :  { %10904 = vst [vmem:[#allocation148_spill] sm:$0xff] %v8326_v52  ;;  %v8331_v31 = vpop.f32.mrb[152].mxu0 }
 0x2ae   :  { %10905 = vst [vmem:[#allocation149_spill] sm:$0xff] %v8329_v63  ;;  %10906 = vst [vmem:[#allocation150_spill] sm:$0xff] %v8331_v31  ;;  %v8333_v12 = vpop.f32.mrb[153].mxu0  ;;  %v6267_v49 = vpop.f32.mrb[144].mxu1  ;;  %v6552_v31 = vld [vmem:[#allocation13 + $0x8] sm:$0xff]  }
 0x2af   :  { %10907 = vst [vmem:[#allocation151_spill] sm:$0xff] %v8333_v12  ;;  %v8335_v26 = vpop.f32.mrb[154].mxu0  ;;  %v8338_v37 = vadd.f32 %v6267_v49, %v8303_v28  ;;  %v3054_v33 = vpop.f32.mrb[145].mxu1  ;;  %6390 = vmatprep.subr.bf16.mxu0 %v6552_v31 }
 0x2b0   :  { %10908 = vst [vmem:[#allocation152_spill] sm:$0xff] %v8335_v26  ;;  %v8340_v51 = vpop.f32.mrb[155].mxu0  ;;  %v8343_v20 = vadd.f32 %v8303_v28, %v3054_v33  ;;  %6391 = vmatpush3.bf16.msra.mxu0 %v6552_v31  ;;  %v8357_v33 = vrot.slane %v5558_v42, %v3478_v47  ;;  %v8377_v47 = vadd.f32 %v8303_v28, %v8267_v40 }
 0x2b1   :  { %10909 = vst [vmem:[#allocation153_spill] sm:$0xff] %v8338_v37  ;;  %10910 = vst [vmem:[#allocation154_spill] sm:$0xff] %v8340_v51 }
 0x2b2   :  { %10911 = vst [vmem:[#allocation155_spill] sm:$0xff] %v8343_v20  ;;  %v6270_v57 = vpop.f32.mrb[146].mxu1  ;;  %10920 = vst [vmem:[#allocation164_spill] sm:$0xff] %v8377_v47 }
 0x2b3   :  { %v8346_v36 = vadd.f32 %v6270_v57, %v8303_v28  ;;  %v3064_v2 = vpop.f32.mrb[147].mxu1 }
 0x2b4   :  { %v8349_v12 = vadd.f32 %v8303_v28, %v3064_v2 }
 0x2b5   :  { %10912 = vst [vmem:[#allocation156_spill] sm:$0xff] %v8346_v36  ;;  %v8351_v21 = vpop.f32.mrb[156].mxu0 }
 0x2b6   :  { %10913 = vst [vmem:[#allocation157_spill] sm:$0xff] %v8349_v12  ;;  %10914 = vst [vmem:[#allocation158_spill] sm:$0xff] %v8351_v21  ;;  %v8353_v26 = vpop.f32.mrb[157].mxu0  ;;  %v6273_v49 = vpop.f32.mrb[148].mxu1  ;;  %v8369_v21 = vadd.f32 %v8265_v59, %v8303_v28 }
 0x2b7   :  { %10915 = vst [vmem:[#allocation159_spill] sm:$0xff] %v8353_v26  ;;  %v8355_v4 = vpop.f32.mrb[158].mxu0  ;;  %v8360_v51 = vadd.f32 %v6273_v49, %v8303_v28  ;;  %v3074_v57 = vpop.f32.mrb[149].mxu1 }
 0x2b8   :  { %10916 = vst [vmem:[#allocation160_spill] sm:$0xff] %v8355_v4  ;;  %v8362_v41 = vpop.f32.mrb[159].mxu0  ;;  %v8365_v2 = vadd.f32 %v8303_v28, %v3074_v57  ;;  %v8373_v4 = vrot.slane %v8357_v33, %v8295_v13  ;;  %v8390_v39 = vsel %vm2373_vm2, %v8369_v21, -inf }
 0x2b9   :  { %10917 = vst [vmem:[#allocation161_spill] sm:$0xff] %v8360_v51  ;;  %10918 = vst [vmem:[#allocation162_spill] sm:$0xff] %v8362_v41 }
 0x2ba   :  { %10919 = vst [vmem:[#allocation163_spill] sm:$0xff] %v8365_v2  ;;  %v6276_v26 = vpop.f32.mrb[150].mxu1  ;;  %v8539_v19 = vadd.f32 %v8253_v16, %v8373_v4  ;;  %v8548_v48 = vadd.f32 %v8373_v4, %v8257_v9 }
 0x2bb   :  { %v8380_v42 = vadd.f32 %v6276_v26, %v8303_v28  ;;  %v3084_v31 = vpop.f32.mrb[151].mxu1  ;;  %v8397_v26 = vsel %vm2373_vm2, %v8377_v47, -inf }
 0x2bc   :  { %v8383_v49 = vadd.f32 %v8303_v28, %v3084_v31  ;;  %v8401_v31 = vadd.f32 %v8273_v11, %v8303_v28  ;;  %10944 = vst [vmem:[#allocation188_spill] sm:$0xff] %v8539_v19  ;;  %10946 = vst [vmem:[#allocation190_spill] sm:$0xff] %v8548_v48 }
 0x2bd   :  { %10921 = vst [vmem:[#allocation165_spill] sm:$0xff] %v8380_v42  ;;  %v6198_v57 = vpop.f32.mrb[160].mxu0 }
 0x2be   :  { %10922 = vst [vmem:[#allocation166_spill] sm:$0xff] %v8383_v49  ;;  %v8386_v59 = vadd.f32 %v6198_v57, %v8373_v4  ;;  %v2824_v41 = vpop.f32.mrb[161].mxu0  ;;  %v6279_v40 = vpop.f32.mrb[152].mxu1  ;;  %10924 = vst [vmem:[#allocation168_spill] sm:$0xff] %v8401_v31 }
 0x2bf   :  { %v8393_v56 = vadd.f32 %v8373_v4, %v2824_v41  ;;  %v8408_v15 = vadd.f32 %v6279_v40, %v8303_v28  ;;  %v3094_v38 = vpop.f32.mrb[153].mxu1  ;;  %v8412_v41 = vadd.f32 %v8303_v28, %v8277_v61  ;;  %v8430_v61 = vadd.f32 %v8281_v3, %v8303_v28 }
 0x2c0   :  { %v8405_v57 = vsel %vm2373_vm2, %v8386_v59, -inf  ;;  %v8421_v11 = vadd.f32 %v8303_v28, %v3094_v38  ;;  %v8437_v38 = vsel %vm2373_vm2, %v8401_v31, -inf }
 0x2c1   :  { %10923 = vst [vmem:[#allocation167_spill] sm:$0xff] %v8393_v56  ;;  %10925 = vst [vmem:[#allocation169_spill] sm:$0xff] %v8408_v15  ;;  %v8418_v0 = vsel %vm2373_vm2, %v8393_v56, -inf  ;;  %v6201_v50 = vpop.f32.mrb[162].mxu0  ;;  %v8470_v18 = vsel %vm2373_vm2, %v8430_v61, -inf }
 0x2c2   :  { %10926 = vst [vmem:[#allocation170_spill] sm:$0xff] %v8412_v41  ;;  %10927 = vst [vmem:[#allocation171_spill] sm:$0xff] %v8421_v11  ;;  %v8426_v23 = vadd.f32 %v6201_v50, %v8373_v4  ;;  %v2834_v14 = vpop.f32.mrb[163].mxu0  ;;  %v6282_v43 = vpop.f32.mrb[154].mxu1 }
 0x2c3   :  { %10929 = vst [vmem:[#allocation173_spill] sm:$0xff] %v8430_v61  ;;  %v8433_v5 = vadd.f32 %v8373_v4, %v2834_v14  ;;  %v8448_v40 = vadd.f32 %v6282_v43, %v8303_v28  ;;  %v3104_v3 = vpop.f32.mrb[155].mxu1  ;;  %v8452_v14 = vsel %vm2373_vm2, %v8412_v41, -inf }
 0x2c4   :  { %10928 = vst [vmem:[#allocation172_spill] sm:$0xff] %v8426_v23  ;;  %v8445_v50 = vsel %vm2373_vm2, %v8426_v23, -inf  ;;  %v8461_v58 = vadd.f32 %v8303_v28, %v3104_v3  ;;  %v8477_v3 = vsel %vm2373_vm2, %v8441_v60, -inf }
 0x2c5   :  { %10930 = vst [vmem:[#allocation174_spill] sm:$0xff] %v8433_v5  ;;  %10932 = vst [vmem:[#allocation176_spill] sm:$0xff] %v8448_v40  ;;  %v8458_v46 = vsel %vm2373_vm2, %v8433_v5, -inf  ;;  %v6204_v27 = vpop.f32.mrb[164].mxu0  ;;  %v10955_v5 = vmax.f32 %v8405_v57, %v8390_v39  ;;  %v10961_v57 = vmax.f32 %v8445_v50, %v8437_v38 }
 0x2c6   :  { %10933 = vst [vmem:[#allocation177_spill] sm:$0xff] %v8461_v58  ;;  %v8466_v25 = vadd.f32 %v6204_v27, %v8373_v4  ;;  %v2844_v24 = vpop.f32.mrb[165].mxu0  ;;  %v6285_v29 = vpop.f32.mrb[156].mxu1 }
 0x2c7   :  { %v8473_v10 = vadd.f32 %v8373_v4, %v2844_v24  ;;  %v8488_v43 = vadd.f32 %v6285_v29, %v8303_v28  ;;  %v3114_v8 = vpop.f32.mrb[157].mxu1  ;;  %v8492_v24 = vadd.f32 %v8303_v28, %v8297_v30 }
 0x2c8   :  { %10934 = vst [vmem:[#allocation178_spill] sm:$0xff] %v8466_v25  ;;  %v8485_v27 = vsel %vm2373_vm2, %v8466_v25, -inf  ;;  %v8501_v35 = vadd.f32 %v8303_v28, %v3114_v8  ;;  %v8582_v25 = vsel %vm2373_vm2, %v8539_v19, -inf }
 0x2c9   :  { %10935 = vst [vmem:[#allocation179_spill] sm:$0xff] %v8473_v10  ;;  %10937 = vst [vmem:[#allocation181_spill] sm:$0xff] %v8488_v43  ;;  %v8498_v17 = vsel %vm2373_vm2, %v8473_v10, -inf  ;;  %v6207_v32 = vpop.f32.mrb[166].mxu0  ;;  %v8555_v10 = vsel %vm2373_vm2, %v8306_v44, -inf }
 0x2ca   :  { %10938 = vst [vmem:[#allocation182_spill] sm:$0xff] %v8492_v24  ;;  %10939 = vst [vmem:[#allocation183_spill] sm:$0xff] %v8501_v35  ;;  %v8506_v22 = vadd.f32 %v6207_v32, %v8373_v4  ;;  %v2854_v6 = vpop.f32.mrb[167].mxu0  ;;  %v6288_v1 = vpop.f32.mrb[158].mxu1  ;;  %v3487_v32 = vcombine.high %v8357_v33, %v8357_v33 }
 0x2cb   :  { %v8509_v30 = vadd.f32 %v8373_v4, %v2854_v6  ;;  %v8520_v55 = vadd.f32 %v6288_v1, %v8303_v28  ;;  %v3124_v29 = vpop.f32.mrb[159].mxu1  ;;  %v8526_v6 = vsel %vm2373_vm2, %v8492_v24, -inf }
 0x2cc   :  { %10940 = vst [vmem:[#allocation184_spill] sm:$0xff] %v8506_v22  ;;  %v8517_v8 = vsel %vm2373_vm2, %v8506_v22, -inf  ;;  %v8535_v22 = vadd.f32 %v8303_v28, %v3124_v29  ;;  %v8565_v61 = vrot.slane %v3487_v32, %v8295_v13 }
 0x2cd   :  { %10941 = vst [vmem:[#allocation185_spill] sm:$0xff] %v8509_v30  ;;  %10942 = vst [vmem:[#allocation186_spill] sm:$0xff] %v8520_v55  ;;  %v8532_v34 = vsel %vm2373_vm2, %v8509_v30, -inf  ;;  %v6210_v1 = vpop.f32.mrb[168].mxu0 }
 0x2ce   :  { %10943 = vst [vmem:[#allocation187_spill] sm:$0xff] %v8535_v22  ;;  %v8544_v24 = vadd.f32 %v6210_v1, %v8373_v4  ;;  %v2864_v60 = vpop.f32.mrb[169].mxu0  ;;  %v6291_v29 = vpop.f32.mrb[160].mxu1 }
 0x2cf   :  { %v8551_v30 = vadd.f32 %v8373_v4, %v2864_v60  ;;  %v8562_v1 = vadd.f32 %v6291_v29, %v8303_v28  ;;  %v3134_v33 = vpop.f32.mrb[161].mxu1  ;;  %v8569_v60 = vsel %vm2373_vm2, %v8309_v7, -inf }
 0x2d0   :  { %10945 = vst [vmem:[#allocation189_spill] sm:$0xff] %v8544_v24  ;;  %v8559_v16 = vsel %vm2373_vm2, %v8544_v24, -inf  ;;  %v8578_v24 = vadd.f32 %v8303_v28, %v3134_v33  ;;  %v8595_v28 = vsel %vm2373_vm2, %v8548_v48, -inf }
 0x2d1   :  { %10947 = vst [vmem:[#allocation191_spill] sm:$0xff] %v8551_v30  ;;  %10948 = vst [vmem:[#allocation192_spill] sm:$0xff] %v8562_v1  ;;  %v8575_v44 = vsel %vm2373_vm2, %v8551_v30, -inf  ;;  %v6213_v29 = vpop.f32.mrb[170].mxu0  ;;  %v8588_v7 = vsel %vm2373_vm2, %v8562_v1, -inf }
 0x2d2   :  { %10949 = vst [vmem:[#allocation193_spill] sm:$0xff] %v8578_v24  ;;  %v8591_v9 = vadd.f32 %v6213_v29, %v8373_v4  ;;  %v2874_v30 = vpop.f32.mrb[171].mxu0  ;;  %v8601_v19 = vsel %vm2373_vm2, %v8578_v24, -inf  ;;  %v6294_v1 = vpop.f32.mrb[162].mxu1  ;;  %v8608_v29 = vsel %vm2373_vm2, %v8318_v62, -inf }
 0x2d3   :  { %v8604_v32 = vadd.f32 %v8373_v4, %v2874_v30  ;;  %v8617_v33 = vadd.f32 %v6294_v1, %v8565_v61  ;;  %v3144_v24 = vpop.f32.mrb[163].mxu1  ;;  %v8621_v30 = vsel %vm2373_vm2, %v8323_v53, -inf  ;;  %v8651_v1 = vsel %vm2373_vm2, %v8326_v52, -inf }
 0x2d4   :  { %10950 = vst [vmem:[#allocation194_spill] sm:$0xff] %v8591_v9  ;;  %v8614_v48 = vsel %vm2373_vm2, %v8591_v9, -inf  ;;  %v8630_v41 = vadd.f32 %v8565_v61, %v3144_v24 }
 0x2d5   :  { %10951 = vst [vmem:[#allocation195_spill] sm:$0xff] %v8604_v32  ;;  %10952 = vst [vmem:[#allocation196_spill] sm:$0xff] %v8617_v33  ;;  %v8627_v62 = vsel %vm2373_vm2, %v8604_v32, -inf  ;;  %v6216_v9 = vpop.f32.mrb[172].mxu0  ;;  %v3647_v31 = vsel %vm2373_vm2, %v8617_v33, -inf }
 0x2d6   :  { %10953 = vst [vmem:[#allocation197_spill] sm:$0xff] %v8630_v41  ;;  %v8637_v53 = vadd.f32 %v6216_v9, %v8373_v4  ;;  %v2884_v23 = vpop.f32.mrb[173].mxu0  ;;  %v8642_v47 = vmax.f32 %v10955_v5, %v3647_v31  ;;  %v3640_v24 = vsel %vm2373_vm2, %v8630_v41, -inf  ;;  %v6297_v56 = vpop.f32.mrb[164].mxu1  ;;  %v10957_v9 = vmax.f32 %v8418_v0, %v8397_v26 }
 0x2d7   :  { %v8647_v32 = vadd.f32 %v8373_v4, %v2884_v23  ;;  %v8663_v5 = vadd.f32 %v6297_v56, %v8565_v61  ;;  %v3154_v31 = vpop.f32.mrb[165].mxu1  ;;  %v8667_v23 = vsel %vm2373_vm2, %v8329_v63, -inf  ;;  %v8697_v56 = vsel %vm2373_vm2, %v8338_v37, -inf }
 0x2d8   :  { %10954 = vst [vmem:[#allocation198_spill] sm:$0xff] %v8637_v53  ;;  %v8656_v33 = vmax.f32 %v10957_v9, %v3640_v24  ;;  %v8660_v39 = vsel %vm2373_vm2, %v8637_v53, -inf  ;;  %v8676_v26 = vadd.f32 %v8565_v61, %v3154_v31 }
 0x2d9   :  { %10956 = vst [vmem:[#allocation199_spill] sm:$0xff] %v8647_v32  ;;  %10958 = vst [vmem:[#allocation200_spill] sm:$0xff] %v8663_v5  ;;  %v8673_v0 = vsel %vm2373_vm2, %v8647_v32, -inf  ;;  %v6219_v24 = vpop.f32.mrb[174].mxu0  ;;  %v3661_v9 = vsel %vm2373_vm2, %v8663_v5, -inf }
 0x2da   :  { %10959 = vst [vmem:[#allocation201_spill] sm:$0xff] %v8676_v26  ;;  %v8683_v63 = vadd.f32 %v6219_v24, %v8373_v4  ;;  %v2894_v52 = vpop.f32.mrb[175].mxu0  ;;  %v8688_v53 = vmax.f32 %v10961_v57, %v3661_v9  ;;  %v3654_v31 = vsel %vm2373_vm2, %v8676_v26, -inf  ;;  %v6300_v41 = vpop.f32.mrb[166].mxu1  ;;  %v10963_v24 = vmax.f32 %v8458_v46, %v8452_v14 }
 0x2db   :  { %v8693_v32 = vadd.f32 %v8373_v4, %v2894_v52  ;;  %v8709_v50 = vadd.f32 %v6300_v41, %v8565_v61  ;;  %v3164_v57 = vpop.f32.mrb[167].mxu1  ;;  %v8713_v52 = vsel %vm2373_vm2, %v8343_v20, -inf  ;;  %v10967_v9 = vmax.f32 %v8485_v27, %v8470_v18 }
 0x2dc   :  { %10960 = vst [vmem:[#allocation202_spill] sm:$0xff] %v8683_v63  ;;  %v8702_v5 = vmax.f32 %v10963_v24, %v3654_v31  ;;  %v8706_v38 = vsel %vm2373_vm2, %v8683_v63, -inf  ;;  %v8722_v14 = vadd.f32 %v8565_v61, %v3164_v57  ;;  %v6553_v63 = vld [vmem:[#allocation13 + $0x10] sm:$0xff]  }
 0x2dd   :  { %10962 = vst [vmem:[#allocation203_spill] sm:$0xff] %v8693_v32  ;;  %10965 = vst [vmem:[#allocation205_spill] sm:$0xff] %v8709_v50  ;;  %v8719_v46 = vsel %vm2373_vm2, %v8693_v32, -inf  ;;  %v6222_v31 = vpop.f32.mrb[176].mxu0  ;;  %v3675_v24 = vsel %vm2373_vm2, %v8709_v50, -inf  ;;  %v8743_v50 = vsel %vm2373_vm2, %v8346_v36, -inf  ;;  %6392 = vmatprep.subr.bf16.mxu0 %v6553_v63 }
 0x2de   :  { %10964 = vst [vmem:[#allocation204_spill] sm:$0xff] %v8702_v5  ;;  %v8729_v20 = vadd.f32 %v6222_v31, %v8373_v4  ;;  %v2904_v37 = vpop.f32.mrb[177].mxu0  ;;  %v8734_v32 = vmax.f32 %v10967_v9, %v3675_v24  ;;  %v3668_v57 = vsel %vm2373_vm2, %v8722_v14, -inf  ;;  %v6303_v41 = vpop.f32.mrb[168].mxu1  ;;  %v10969_v31 = vmax.f32 %v8498_v17, %v8477_v3  ;;  %6393 = vmatpush3.bf16.msra.mxu0 %v6553_v63 }
 0x2df   :  { %v8739_v26 = vadd.f32 %v8373_v4, %v2904_v37  ;;  %v8755_v27 = vadd.f32 %v6303_v41, %v8565_v61  ;;  %v3174_v9 = vpop.f32.mrb[169].mxu1  ;;  %v8759_v37 = vsel %vm2373_vm2, %v8349_v12, -inf  ;;  %v10973_v24 = vmax.f32 %v8517_v8, %v8513_v54 }
 0x2e0   :  { %10966 = vst [vmem:[#allocation206_spill] sm:$0xff] %v8729_v20  ;;  %v8748_v5 = vmax.f32 %v10969_v31, %v3668_v57  ;;  %v8752_v18 = vsel %vm2373_vm2, %v8729_v20, -inf  ;;  %v8768_v3 = vadd.f32 %v8565_v61, %v3174_v9  ;;  %v8789_v41 = vsel %vm2373_vm2, %v8360_v51, -inf }
 0x2e1   :  { %10968 = vst [vmem:[#allocation207_spill] sm:$0xff] %v8739_v26  ;;  %10970 = vst [vmem:[#allocation208_spill] sm:$0xff] %v8755_v27  ;;  %v8765_v17 = vsel %vm2373_vm2, %v8739_v26, -inf  ;;  %v6225_v57 = vpop.f32.mrb[178].mxu0  ;;  %v3689_v31 = vsel %vm2373_vm2, %v8755_v27, -inf }
 0x2e2   :  { %10971 = vst [vmem:[#allocation209_spill] sm:$0xff] %v8768_v3  ;;  %v8775_v12 = vadd.f32 %v6225_v57, %v8373_v4  ;;  %v2914_v36 = vpop.f32.mrb[179].mxu0  ;;  %v8780_v26 = vmax.f32 %v10973_v24, %v3689_v31  ;;  %v3682_v9 = vsel %vm2373_vm2, %v8768_v3, -inf  ;;  %v6306_v20 = vpop.f32.mrb[170].mxu1  ;;  %v10975_v57 = vmax.f32 %v8532_v34, %v8526_v6 }
 0x2e3   :  { %v8785_v63 = vadd.f32 %v8373_v4, %v2914_v36  ;;  %v8801_v8 = vadd.f32 %v6306_v20, %v8565_v61  ;;  %v3184_v24 = vpop.f32.mrb[171].mxu1  ;;  %v8805_v36 = vsel %vm2373_vm2, %v8365_v2, -inf  ;;  %v10979_v31 = vmax.f32 %v8559_v16, %v8555_v10 }
 0x2e4   :  { %10972 = vst [vmem:[#allocation210_spill] sm:$0xff] %v8775_v12  ;;  %v8794_v27 = vmax.f32 %v10975_v57, %v3682_v9  ;;  %v8798_v54 = vsel %vm2373_vm2, %v8775_v12, -inf  ;;  %v8814_v6 = vadd.f32 %v8565_v61, %v3184_v24  ;;  %v8835_v20 = vsel %vm2373_vm2, %v8380_v42, -inf }
 0x2e5   :  { %10974 = vst [vmem:[#allocation211_spill] sm:$0xff] %v8785_v63  ;;  %10976 = vst [vmem:[#allocation212_spill] sm:$0xff] %v8801_v8  ;;  %v8811_v34 = vsel %vm2373_vm2, %v8785_v63, -inf  ;;  %v6228_v9 = vpop.f32.mrb[180].mxu0  ;;  %v3703_v57 = vsel %vm2373_vm2, %v8801_v8, -inf }
 0x2e6   :  { %10977 = vst [vmem:[#allocation213_spill] sm:$0xff] %v8814_v6  ;;  %v8821_v2 = vadd.f32 %v6228_v9, %v8373_v4  ;;  %v2924_v51 = vpop.f32.mrb[181].mxu0  ;;  %v8826_v12 = vmax.f32 %v10979_v31, %v3703_v57  ;;  %v3696_v24 = vsel %vm2373_vm2, %v8814_v6, -inf  ;;  %v6309_v3 = vpop.f32.mrb[172].mxu1  ;;  %v10981_v9 = vmax.f32 %v8575_v44, %v8569_v60 }
 0x2e7   :  { %v8831_v63 = vadd.f32 %v8373_v4, %v2924_v51  ;;  %v8847_v16 = vadd.f32 %v6309_v3, %v8565_v61  ;;  %v3194_v31 = vpop.f32.mrb[173].mxu1  ;;  %v8851_v51 = vsel %vm2373_vm2, %v8383_v49, -inf  ;;  %v10985_v57 = vmax.f32 %v8614_v48, %v8608_v29 }
 0x2e8   :  { %10978 = vst [vmem:[#allocation214_spill] sm:$0xff] %v8821_v2  ;;  %v8840_v8 = vmax.f32 %v10981_v9, %v3696_v24  ;;  %v8844_v10 = vsel %vm2373_vm2, %v8821_v2, -inf  ;;  %v8860_v60 = vadd.f32 %v8565_v61, %v3194_v31  ;;  %v8881_v3 = vsel %vm2373_vm2, %v8408_v15, -inf }
 0x2e9   :  { %10980 = vst [vmem:[#allocation215_spill] sm:$0xff] %v8831_v63  ;;  %10982 = vst [vmem:[#allocation216_spill] sm:$0xff] %v8847_v16  ;;  %v8857_v44 = vsel %vm2373_vm2, %v8831_v63, -inf  ;;  %v6231_v24 = vpop.f32.mrb[182].mxu0  ;;  %v3717_v9 = vsel %vm2373_vm2, %v8847_v16, -inf }
 0x2ea   :  { %10983 = vst [vmem:[#allocation217_spill] sm:$0xff] %v8860_v60  ;;  %v8867_v49 = vadd.f32 %v6231_v24, %v8373_v4  ;;  %v2934_v42 = vpop.f32.mrb[183].mxu0  ;;  %v8872_v2 = vmax.f32 %v10985_v57, %v3717_v9  ;;  %v3710_v31 = vsel %vm2373_vm2, %v8860_v60, -inf  ;;  %v6312_v6 = vpop.f32.mrb[174].mxu1  ;;  %v10987_v24 = vmax.f32 %v8627_v62, %v8621_v30 }
 0x2eb   :  { %v8877_v63 = vadd.f32 %v8373_v4, %v2934_v42  ;;  %v8893_v29 = vadd.f32 %v6312_v6, %v8565_v61  ;;  %v3204_v57 = vpop.f32.mrb[175].mxu1  ;;  %v8897_v42 = vsel %vm2373_vm2, %v8421_v11, -inf  ;;  %v10991_v9 = vmax.f32 %v8660_v39, %v8651_v1 }
 0x2ec   :  { %10984 = vst [vmem:[#allocation218_spill] sm:$0xff] %v8867_v49  ;;  %v8886_v16 = vmax.f32 %v10987_v24, %v3710_v31  ;;  %v8890_v48 = vsel %vm2373_vm2, %v8867_v49, -inf  ;;  %v8906_v30 = vadd.f32 %v8565_v61, %v3204_v57  ;;  %v8927_v6 = vsel %vm2373_vm2, %v8448_v40, -inf }
 0x2ed   :  { %10986 = vst [vmem:[#allocation219_spill] sm:$0xff] %v8877_v63  ;;  %10988 = vst [vmem:[#allocation220_spill] sm:$0xff] %v8893_v29  ;;  %v8903_v62 = vsel %vm2373_vm2, %v8877_v63, -inf  ;;  %v6234_v31 = vpop.f32.mrb[184].mxu0  ;;  %v3731_v24 = vsel %vm2373_vm2, %v8893_v29, -inf }
 0x2ee   :  { %10989 = vst [vmem:[#allocation221_spill] sm:$0xff] %v8906_v30  ;;  %v8913_v11 = vadd.f32 %v6234_v31, %v8373_v4  ;;  %v2944_v15 = vpop.f32.mrb[185].mxu0  ;;  %v8918_v49 = vmax.f32 %v10991_v9, %v3731_v24  ;;  %v3724_v57 = vsel %vm2373_vm2, %v8906_v30, -inf  ;;  %v6315_v60 = vpop.f32.mrb[176].mxu1  ;;  %v10993_v31 = vmax.f32 %v8673_v0, %v8667_v23 }
 0x2ef   :  { %v8923_v63 = vadd.f32 %v8373_v4, %v2944_v15  ;;  %v8939_v39 = vadd.f32 %v6315_v60, %v8565_v61  ;;  %v3214_v9 = vpop.f32.mrb[177].mxu1  ;;  %v8943_v15 = vsel %vm2373_vm2, %v8461_v58, -inf  ;;  %v10996_v24 = vmax.f32 %v8706_v38, %v8697_v56 }
 0x2f0   :  { %10990 = vst [vmem:[#allocation222_spill] sm:$0xff] %v8913_v11  ;;  %v8932_v29 = vmax.f32 %v10993_v31, %v3724_v57  ;;  %v8936_v1 = vsel %vm2373_vm2, %v8913_v11, -inf  ;;  %v8952_v0 = vadd.f32 %v8565_v61, %v3214_v9  ;;  %v8973_v60 = vsel %vm2373_vm2, %v8488_v43, -inf }
 0x2f1   :  { %10992 = vst [vmem:[#allocation223_spill] sm:$0xff] %v8923_v63  ;;  %10994 = vst [vmem:[#allocation224_spill] sm:$0xff] %v8939_v39  ;;  %v8949_v23 = vsel %vm2373_vm2, %v8923_v63, -inf  ;;  %v6237_v57 = vpop.f32.mrb[186].mxu0  ;;  %v3745_v31 = vsel %vm2373_vm2, %v8939_v39, -inf }
 0x2f2   :  { %v8959_v58 = vadd.f32 %v6237_v57, %v8373_v4  ;;  %v2954_v40 = vpop.f32.mrb[187].mxu0  ;;  %v8964_v11 = vmax.f32 %v10996_v24, %v3745_v31  ;;  %v3738_v9 = vsel %vm2373_vm2, %v8952_v0, -inf  ;;  %v6318_v30 = vpop.f32.mrb[178].mxu1  ;;  %v10998_v57 = vmax.f32 %v8719_v46, %v8713_v52 }
 0x2f3   :  { %v8969_v63 = vadd.f32 %v8373_v4, %v2954_v40  ;;  %v8985_v38 = vadd.f32 %v6318_v30, %v8565_v61  ;;  %v3224_v24 = vpop.f32.mrb[179].mxu1  ;;  %v8989_v40 = vsel %vm2373_vm2, %v8501_v35, -inf }
 0x2f4   :  { %10995 = vst [vmem:[#allocation225_spill] sm:$0xff] %v8959_v58  ;;  %v8978_v39 = vmax.f32 %v10998_v57, %v3738_v9  ;;  %v8982_v56 = vsel %vm2373_vm2, %v8959_v58, -inf  ;;  %v8996_v46 = vadd.f32 %v8565_v61, %v3224_v24  ;;  %v11000_v58 = vmax.f32 %v8752_v18, %v8743_v50 }
 0x2f5   :  { %10997 = vst [vmem:[#allocation226_spill] sm:$0xff] %v8969_v63  ;;  %v3828_v31 = vmax.f32 %v8982_v56, %v8973_v60  ;;  %v3819_v52 = vsel %vm2373_vm2, %v8969_v63, -inf  ;;  %v6240_v9 = vpop.f32.mrb[188].mxu0  ;;  %v3759_v30 = vsel %vm2373_vm2, %v8985_v38, -inf }
 0x2f6   :  { %v3821_v57 = vmax.f32 %v3819_v52, %v8989_v40  ;;  %v9002_v43 = vadd.f32 %v6240_v9, %v8373_v4  ;;  %v2964_v35 = vpop.f32.mrb[189].mxu0  ;;  %v9007_v60 = vmax.f32 %v11000_v58, %v3759_v30  ;;  %v3752_v56 = vsel %vm2373_vm2, %v8996_v46, -inf  ;;  %v6321_v63 = vpop.f32.mrb[180].mxu1 }
 0x2f7   :  { %v9012_v24 = vadd.f32 %v8373_v4, %v2964_v35  ;;  %v3841_v40 = vsel %vm2373_vm2, %v8520_v55, -inf  ;;  %v11002_v52 = vmax.f32 %v8765_v17, %v8759_v37  ;;  %v9024_v58 = vadd.f32 %v6321_v63, %v8565_v61  ;;  %v3234_v18 = vpop.f32.mrb[181].mxu1 }
 0x2f8   :  { %10999 = vst [vmem:[#allocation227_spill] sm:$0xff] %v9002_v43  ;;  %v3840_v50 = vsel %vm2373_vm2, %v9002_v43, -inf  ;;  %v3834_v4 = vsel %vm2373_vm2, %v8535_v22, -inf  ;;  %v9031_v55 = vadd.f32 %v8565_v61, %v3234_v18 }
 0x2f9   :  { %11001 = vst [vmem:[#allocation228_spill] sm:$0xff] %v9012_v24  ;;  %v9019_v9 = vmax.f32 %v11002_v52, %v3752_v56  ;;  %v3842_v35 = vmax.f32 %v3840_v50, %v3841_v40  ;;  %v3833_v30 = vsel %vm2373_vm2, %v9012_v24, -inf  ;;  %v3773_v17 = vsel %vm2373_vm2, %v9024_v58, -inf  ;;  %v6554_v24 = vld [vmem:[#allocation13 + $0x18] sm:$0xff]  }
 0x2fa   :  { %v3835_v37 = vmax.f32 %v3833_v30, %v3834_v4  ;;  %v11003_v56 = vmax.f32 %v8798_v54, %v8789_v41  ;;  %v3766_v52 = vsel %vm2373_vm2, %v9031_v55, -inf  ;;  %v6324_v22 = vpop.f32.mrb[182].mxu1  ;;  %v11004_v40 = vmax.f32 %v8811_v34, %v8805_v36  ;;  %6394 = vmatprep.subr.bf16.mxu0 %v6554_v24 }
 0x2fb   :  { %v9048_v18 = vadd.f32 %v6324_v22, %v8565_v61  ;;  %v3244_v4 = vpop.f32.mrb[183].mxu1  ;;  %v11007_v54 = vmax.f32 %v8844_v10, %v8835_v20  ;;  %v11009_v22 = vmax.f32 %v8857_v44, %v8851_v51  ;;  %6395 = vmatpush3.bf16.msra.mxu0 %v6554_v24  ;;  %v11013_v10 = vmax.f32 %v8890_v48, %v8881_v3 }
 0x2fc   :  { %v9038_v63 = vmax.f32 %v11003_v56, %v3773_v17  ;;  %v9045_v50 = vmax.f32 %v11004_v40, %v3766_v52  ;;  %v9051_v30 = vadd.f32 %v8565_v61, %v3244_v4  ;;  %v11019_v48 = vmax.f32 %v8936_v1, %v8927_v6 }
 0x2fd   :  { %11005 = vst [vmem:[#allocation229_spill] sm:$0xff] %v9048_v18  ;;  %v3787_v41 = vsel %vm2373_vm2, %v9048_v18, -inf }
 0x2fe   :  { %11006 = vst [vmem:[#allocation230_spill] sm:$0xff] %v9051_v30  ;;  %v9058_v17 = vmax.f32 %v11007_v54, %v3787_v41  ;;  %v3780_v36 = vsel %vm2373_vm2, %v9051_v30, -inf  ;;  %v6327_v34 = vpop.f32.mrb[184].mxu1  ;;  %v11015_v54 = vmax.f32 %v8903_v62, %v8897_v42 }
 0x2ff   :  { %v9065_v56 = vmax.f32 %v11009_v22, %v3780_v36  ;;  %v9068_v52 = vadd.f32 %v6327_v34, %v8565_v61  ;;  %v3254_v40 = vpop.f32.mrb[185].mxu1 }
 0x300   :  { %11008 = vst [vmem:[#allocation231_spill] sm:$0xff] %v9058_v17  ;;  %v9071_v4 = vadd.f32 %v8565_v61, %v3254_v40 }
 0x301   :  { %11010 = vst [vmem:[#allocation232_spill] sm:$0xff] %v9065_v56  ;;  %11011 = vst [vmem:[#allocation233_spill] sm:$0xff] %v9068_v52  ;;  %v3801_v20 = vsel %vm2373_vm2, %v9068_v52, -inf }
 0x302   :  { %11012 = vst [vmem:[#allocation234_spill] sm:$0xff] %v9071_v4  ;;  %v9078_v41 = vmax.f32 %v11013_v10, %v3801_v20  ;;  %v3794_v51 = vsel %vm2373_vm2, %v9071_v4, -inf  ;;  %v6330_v44 = vpop.f32.mrb[186].mxu1  ;;  %v11021_v20 = vmax.f32 %v8949_v23, %v8943_v15 }
 0x303   :  { %v9085_v36 = vmax.f32 %v11015_v54, %v3794_v51  ;;  %v9088_v24 = vadd.f32 %v6330_v44, %v8565_v61  ;;  %v3264_v34 = vpop.f32.mrb[187].mxu1 }
 0x304   :  { %11014 = vst [vmem:[#allocation235_spill] sm:$0xff] %v9078_v41  ;;  %v9091_v22 = vadd.f32 %v8565_v61, %v3264_v34 }
 0x305   :  { %11016 = vst [vmem:[#allocation236_spill] sm:$0xff] %v9085_v36  ;;  %11017 = vst [vmem:[#allocation237_spill] sm:$0xff] %v9088_v24  ;;  %v3815_v3 = vsel %vm2373_vm2, %v9088_v24, -inf }
 0x306   :  { %11018 = vst [vmem:[#allocation238_spill] sm:$0xff] %v9091_v22  ;;  %v9098_v40 = vmax.f32 %v11019_v48, %v3815_v3  ;;  %v3808_v42 = vsel %vm2373_vm2, %v9091_v22, -inf  ;;  %v6333_v62 = vpop.f32.mrb[188].mxu1 }
 0x307   :  { %v9105_v10 = vmax.f32 %v11021_v20, %v3808_v42  ;;  %v9108_v51 = vadd.f32 %v6333_v62, %v8565_v61  ;;  %v3274_v44 = vpop.f32.mrb[189].mxu1  ;;  %v3488_v42 = vcombine.high %v8287_v45, %v8287_v45 }
 0x308   :  { %11020 = vst [vmem:[#allocation239_spill] sm:$0xff] %v9098_v40  ;;  %v9111_v54 = vadd.f32 %v8565_v61, %v3274_v44 }
 0x309   :  { %11022 = vst [vmem:[#allocation240_spill] sm:$0xff] %v9105_v10  ;;  %11023 = vst [vmem:[#allocation241_spill] sm:$0xff] %v9108_v51  ;;  %v3829_v6 = vsel %vm2373_vm2, %v9108_v51, -inf  ;;  %v9141_v45 = vrot.slane %v3488_v42, %v8295_v13 }
 0x30a   :  { %11024 = vst [vmem:[#allocation242_spill] sm:$0xff] %v9111_v54  ;;  %v9115_v1 = vmax.f32 %v3828_v31, %v3829_v6  ;;  %v3822_v34 = vsel %vm2373_vm2, %v9111_v54, -inf  ;;  %v6336_v3 = vpop.f32.mrb[190].mxu1 }
 0x30b   :  { %v9119_v48 = vmax.f32 %v3821_v57, %v3822_v34  ;;  %v9122_v15 = vadd.f32 %v6336_v3, %v8565_v61  ;;  %v3284_v23 = vpop.f32.mrb[191].mxu1 }
 0x30c   :  { %11025 = vst [vmem:[#allocation243_spill] sm:$0xff] %v9115_v1  ;;  %v9127_v62 = vadd.f32 %v8565_v61, %v3284_v23 }
 0x30d   :  { %11026 = vst [vmem:[#allocation244_spill] sm:$0xff] %v9119_v48  ;;  %11027 = vst [vmem:[#allocation245_spill] sm:$0xff] %v9122_v15  ;;  %v3843_v31 = vsel %vm2373_vm2, %v9122_v15, -inf }
 0x30e   :  { %11028 = vst [vmem:[#allocation246_spill] sm:$0xff] %v9127_v62  ;;  %v9131_v20 = vmax.f32 %v3842_v35, %v3843_v31  ;;  %v3836_v44 = vsel %vm2373_vm2, %v9127_v62, -inf  ;;  %v6339_v57 = vpop.f32.mrb[192].mxu1  ;;  %v11033_v31 = vmax.f32 %v8582_v25, %v8588_v7 }
 0x30f   :  { %v9135_v6 = vmax.f32 %v3835_v37, %v3836_v44  ;;  %v9138_v34 = vadd.f32 %v6339_v57, %v8565_v61  ;;  %v3294_v3 = vpop.f32.mrb[193].mxu1  ;;  %v11035_v57 = vmax.f32 %v8595_v28, %v8601_v19 }
 0x310   :  { %11029 = vst [vmem:[#allocation247_spill] sm:$0xff] %v9131_v20  ;;  %v9144_v23 = vadd.f32 %v8565_v61, %v3294_v3 }
 0x311   :  { %11030 = vst [vmem:[#allocation248_spill] sm:$0xff] %v9135_v6  ;;  %11031 = vst [vmem:[#allocation249_spill] sm:$0xff] %v9138_v34  ;;  %v3857_v35 = vsel %vm2373_vm2, %v9138_v34, -inf  ;;  %v11039_v6 = vld [vmem:[#allocation164_spill] sm:$0xff] }
 0x312   :  { %11032 = vst [vmem:[#allocation250_spill] sm:$0xff] %v9144_v23  ;;  %v9151_v62 = vmax.f32 %v11033_v31, %v3857_v35  ;;  %v3850_v37 = vsel %vm2373_vm2, %v9144_v23, -inf  ;;  %v6342_v44 = vpop.f32.mrb[194].mxu1 }
 0x313   :  { %v9158_v13 = vmax.f32 %v11035_v57, %v3850_v37  ;;  %v3606_v61 = vadd.f32 %v6342_v44, %v9141_v45  ;;  %v3304_v42 = vpop.f32.mrb[195].mxu1  ;;  %v11037_v37 = vld [vmem:[#allocation196_spill] sm:$0xff] }
 0x314   :  { %11034 = vst [vmem:[#allocation251_spill] sm:$0xff] %v9151_v62  ;;  %v3605_v3 = vadd.f32 %v9141_v45, %v3304_v42  ;;  %v11038_v42 = vld [vmem:[#allocation167_spill] sm:$0xff] }
 0x315   :  { %11036 = vst [vmem:[#allocation252_spill] sm:$0xff] %v9158_v13  ;;  %v3649_v34 = vsel %vm2373_vm2, %v3606_v61, -inf }
 0x316   :  { %v3650_v25 = vmax.f32 %v8642_v47, %v3649_v34  ;;  %v3642_v7 = vsel %vm2373_vm2, %v3605_v3, -inf  ;;  %v6345_v35 = vpop.f32.mrb[196].mxu1  ;;  %v11040_v47 = vld [vmem:[#allocation197_spill] sm:$0xff] }
 0x317   :  { %v3643_v31 = vmax.f32 %v8656_v33, %v3642_v7  ;;  %v3608_v23 = vadd.f32 %v6345_v35, %v9141_v45  ;;  %v3314_v62 = vpop.f32.mrb[197].mxu1 }
 0x318   :  { %v3862_v19 = vsub.f32 %v8386_v59, %v3650_v25  ;;  %v3894_v28 = vsub.f32 %v8369_v21, %v3650_v25  ;;  %v3926_v44 = vsub.f32 %v11037_v37, %v3650_v25  ;;  %v3958_v57 = vsub.f32 %v3606_v61, %v3650_v25 }
 0x319   :  { %v3861_v13 = vsub.f32 %v11038_v42, %v3643_v31  ;;  %v3893_v15 = vsub.f32 %v11039_v6, %v3643_v31  ;;  %v3925_v34 = vsub.f32 %v11040_v47, %v3643_v31  ;;  %v3957_v43 = vsub.f32 %v3605_v3, %v3643_v31  ;;  %v11041_v31 = vld [vmem:[#allocation204_spill] sm:$0xff] }
 0x31a   :  { %v3991_v54 = vmul.f32 1.442695, %v3862_v19  ;;  %v4055_v20 = vmul.f32 1.442695, %v3894_v28  ;;  %v4119_v33 = vmul.f32 1.442695, %v3926_v44  ;;  %v3607_v7 = vadd.f32 %v9141_v45, %v3314_v62 }
 0x31b   :  { %v4183_v35 = vmul.f32 1.442695, %v3958_v57  ;;  %v3989_v48 = vmul.f32 1.442695, %v3861_v13  ;;  %v4053_v59 = vmul.f32 1.442695, %v3893_v15 }
 0x31c   :  { %6555 = vpow2.f32 %v3991_v54  ;;  %v4117_v21 = vmul.f32 1.442695, %v3925_v34  ;;  %v3663_v37 = vsel %vm2373_vm2, %v3608_v23, -inf  ;;  %v6348_v61 = vpop.f32.mrb[198].mxu1  ;;  %v4181_v25 = vmul.f32 1.442695, %v3957_v43 }
 0x31d   :  { %6557 = vpow2.f32 %v4055_v20  ;;  %v3664_v6 = vmax.f32 %v8688_v53, %v3663_v37  ;;  %v3656_v42 = vsel %vm2373_vm2, %v3607_v7, -inf  ;;  %v3324_v3 = vpop.f32.mrb[199].mxu1  ;;  %v3610_v62 = vadd.f32 %v6348_v61, %v9141_v45  ;;  %v11042_v15 = vld [vmem:[#allocation172_spill] sm:$0xff]  ;;  %v11045_v34 = vld [vmem:[#allocation174_spill] sm:$0xff] }
 0x31e   :  { %6559 = vpow2.f32 %v4119_v33  ;;  %v3657_v19 = vmax.f32 %v11041_v31, %v3656_v42  ;;  %v9180_v13 = vadd.f32 %v9141_v45, %v3324_v3  ;;  %v6351_v54 = vpop.f32.mrb[200].mxu1  ;;  %v11043_v44 = vld [vmem:[#allocation168_spill] sm:$0xff]  ;;  %v11046_v37 = vld [vmem:[#allocation170_spill] sm:$0xff] }
 0x31f   :  { %6561 = vpow2.f32 %v4183_v35  ;;  %v3864_v28 = vsub.f32 %v11042_v15, %v3664_v6  ;;  %v3896_v20 = vsub.f32 %v11043_v44, %v3664_v6  ;;  %v11044_v43 = vld [vmem:[#allocation200_spill] sm:$0xff]  ;;  %v3334_v53 = vpop.f32.mrb[201].mxu1  ;;  %v3960_v47 = vsub.f32 %v3608_v23, %v3664_v6  ;;  %v11047_v35 = vld [vmem:[#allocation201_spill] sm:$0xff] }
 0x320   :  { %v3928_v57 = vsub.f32 %v11044_v43, %v3664_v6  ;;  %6563 = vpow2.f32 %v3989_v48  ;;  %v3863_v33 = vsub.f32 %v11045_v34, %v3657_v19  ;;  %v3895_v42 = vsub.f32 %v11046_v37, %v3657_v19  ;;  %v11051_v34 = vld [vmem:[#allocation205_spill] sm:$0xff] }
 0x321   :  { %6565 = vpow2.f32 %v4053_v59  ;;  %v3995_v61 = vmul.f32 1.442695, %v3864_v28  ;;  %v4059_v31 = vmul.f32 1.442695, %v3896_v20  ;;  %v4187_v51 = vmul.f32 1.442695, %v3960_v47 }
 0x322   :  { %v4123_v3 = vmul.f32 1.442695, %v3928_v57  ;;  %6567 = vpow2.f32 %v4117_v21  ;;  %v3927_v22 = vsub.f32 %v11047_v35, %v3657_v19  ;;  %v3959_v15 = vsub.f32 %v3607_v7, %v3657_v19  ;;  %v9188_v1 = vpop.f32.mrb[202].mxu1  ;;  %v11049_v20 = vld [vmem:[#allocation178_spill] sm:$0xff]  ;;  %v11050_v47 = vld [vmem:[#allocation173_spill] sm:$0xff] }
 0x323   :  { %6569 = vpow2.f32 %v4181_v25  ;;  %v3993_v44 = vmul.f32 1.442695, %v3863_v33  ;;  %v4057_v43 = vmul.f32 1.442695, %v3895_v42  ;;  %v3677_v48 = vsel %vm2373_vm2, %v3610_v62, -inf  ;;  %v9191_v23 = vpop.f32.mrb[203].mxu1 }
 0x324   :  { %6571 = vpow2.f32 %v3995_v61  ;;  %v4121_v6 = vmul.f32 1.442695, %v3927_v22  ;;  %v4185_v59 = vmul.f32 1.442695, %v3959_v15  ;;  %v3678_v28 = vmax.f32 %v8734_v32, %v3677_v48 }
 0x325   :  { %6573 = vpow2.f32 %v4059_v31  ;;  %v3670_v21 = vsel %vm2373_vm2, %v9180_v13, -inf  ;;  %v9197_v7 = vadd.f32 %v6351_v54, %v9141_v45  ;;  %v9200_v25 = vadd.f32 %v9141_v45, %v3334_v53 }
 0x326   :  { %v9202_v19 = vpop.eup %6555  ;;  %6575 = vpow2.f32 %v4123_v3  ;;  %v3866_v57 = vsub.f32 %v11049_v20, %v3678_v28  ;;  %v3898_v22 = vsub.f32 %v11050_v47, %v3678_v28  ;;  %v3930_v33 = vsub.f32 %v11051_v34, %v3678_v28  ;;  %v9207_v32 = vpop.f32.mrb[204].mxu1  ;;  %v11056_v47 = vld [vmem:[#allocation179_spill] sm:$0xff] }
 0x327   :  { %11048 = vst [vmem:[#allocation196_spill] sm:$0xff] %v9202_v19  ;;  %v9209_v37 = vpop.eup %6557  ;;  %v4252_v54 = vsel %vm2373_vm2, %v9202_v19, 0.0  ;;  %6577 = vpow2.f32 %v4187_v51  ;;  %v3962_v42 = vsub.f32 %v3610_v62, %v3678_v28  ;;  %v9214_v53 = vmax.f32 %v8748_v5, %v3670_v21  ;;  %v9216_v61 = vpop.f32.mrb[205].mxu1 }
 0x328   :  { %11052 = vst [vmem:[#allocation167_spill] sm:$0xff] %v9209_v37  ;;  %v9218_v31 = vpop.eup %6559  ;;  %v4253_v3 = vsel %vm2373_vm2, %v9209_v37, 0.0  ;;  %6579 = vpow2.f32 %v3993_v44  ;;  %v3999_v35 = vmul.f32 1.442695, %v3866_v57  ;;  %v4063_v15 = vmul.f32 1.442695, %v3898_v22 }
 0x329   :  { %11053 = vst [vmem:[#allocation164_spill] sm:$0xff] %v9218_v31  ;;  %v9222_v48 = vpop.eup %6561  ;;  %v4254_v20 = vadd.f32 %v4253_v3, %v4252_v54  ;;  %v4255_v51 = vsel %vm2373_vm2, %v9218_v31, 0.0  ;;  %6581 = vpow2.f32 %v4057_v43  ;;  %v4127_v62 = vmul.f32 1.442695, %v3930_v33  ;;  %v11058_v43 = vld [vmem:[#allocation175_spill] sm:$0xff] }
 0x32a   :  { %11054 = vst [vmem:[#allocation197_spill] sm:$0xff] %v9222_v48  ;;  %v9226_v5 = vpop.eup %6563  ;;  %v4257_v28 = vsel %vm2373_vm2, %v9222_v48, 0.0  ;;  %6583 = vpow2.f32 %v4121_v6  ;;  %v4191_v21 = vmul.f32 1.442695, %v3962_v42  ;;  %v3865_v44 = vsub.f32 %v11056_v47, %v9214_v53  ;;  %v9232_v57 = vpop.f32.mrb[206].mxu1 }
 0x32b   :  { %11055 = vst [vmem:[#allocation204_spill] sm:$0xff] %v9226_v5  ;;  %v9234_v22 = vpop.eup %6565  ;;  %v4256_v34 = vadd.f32 %v4255_v51, %v4254_v20  ;;  %v4245_v54 = vsel %vm2373_vm2, %v9226_v5, 0.0  ;;  %6585 = vpow2.f32 %v4185_v59  ;;  %v3897_v33 = vsub.f32 %v11058_v43, %v9214_v53  ;;  %v9240_v3 = vpop.f32.mrb[207].mxu1  ;;  %v11068_v5 = vld [vmem:[#allocation120_spill] sm:$0xff] }
 0x32c   :  { %11057 = vst [vmem:[#allocation172_spill] sm:$0xff] %v9234_v22  ;;  %v9242_v10 = vpop.eup %6567  ;;  %v4246_v6 = vsel %vm2373_vm2, %v9234_v22, 0.0  ;;  %6587 = vpow2.f32 %v3999_v35  ;;  %v3929_v42 = vsub.f32 %v8722_v14, %v9214_v53  ;;  %v9256_v35 = vmul.f32 1.442695, %v3865_v44 }
 0x32d   :  { %11059 = vst [vmem:[#allocation168_spill] sm:$0xff] %v9242_v10  ;;  %v9250_v51 = vpop.eup %6569  ;;  %v4258_v59 = vadd.f32 %v4257_v28, %v4256_v34  ;;  %v4247_v47 = vadd.f32 %v4246_v6, %v4245_v54  ;;  %v4248_v43 = vsel %vm2373_vm2, %v9242_v10, 0.0  ;;  %6589 = vpow2.f32 %v4063_v15  ;;  %v11061_v34 = vld [vmem:[#allocation45_spill] sm:$0xff] }
 0x32e   :  { %11060 = vst [vmem:[#allocation200_spill] sm:$0xff] %v9250_v51  ;;  %v6572_v24 = vpop.eup %6571  ;;  %v4250_v40 = vsel %vm2373_vm2, %v9250_v51, 0.0  ;;  %6591 = vpow2.f32 %v4127_v62  ;;  %v9258_v4 = vmul.f32 1.442695, %v3897_v33  ;;  %v9260_v14 = vpop.f32.mrb[208].mxu1  ;;  %v11062_v51 = vld [vmem:[#allocation26_spill] sm:$0xff] }
 0x32f   :  { %v6574_v20 = vpop.eup %6573  ;;  %6593 = vrcp.f32 %v4258_v59  ;;  %v4249_v36 = vadd.f32 %v4248_v43, %v4247_v47  ;;  %v4266_v28 = vsel %vm2373_vm2, %v6572_v24, 0.0  ;;  %v4472_v54 = vmul.f32 %v6572_v24, %v11061_v34  ;;  %v9264_v6 = vpop.f32.mrb[209].mxu1  ;;  %v11063_v47 = vld [vmem:[#allocation90_spill] sm:$0xff] }
 0x330   :  { %v6576_v15 = vpop.eup %6575  ;;  %v4267_v48 = vsel %vm2373_vm2, %v6574_v20, 0.0  ;;  %v4504_v62 = vmul.f32 %v6574_v20, %v11062_v51  ;;  %6595 = vpow2.f32 %v4191_v21  ;;  %v9268_v44 = vmul.f32 1.442695, %v3929_v42  ;;  %v11064_v34 = vld [vmem:[#allocation122_spill] sm:$0xff] }
 0x331   :  { %v6578_v33 = vpop.eup %6577  ;;  %v4251_v31 = vadd.f32 %v4250_v40, %v4249_v36  ;;  %v4268_v10 = vadd.f32 %v4267_v48, %v4266_v28  ;;  %v4269_v59 = vsel %vm2373_vm2, %v6576_v15, 0.0  ;;  %v4536_v43 = vmul.f32 %v6576_v15, %v11063_v47 }
 0x332   :  { %v6580_v52 = vpop.eup %6579  ;;  %v4271_v24 = vsel %vm2373_vm2, %v6578_v33, 0.0  ;;  %v4568_v37 = vmul.f32 %v6578_v33, %v11064_v34  ;;  %v4618_v41 = vsel %vm2373_vm2, %v4472_v54, 0.0  ;;  %v4619_v22 = vsel %vm2373_vm2, %v4504_v62, 0.0  ;;  %v9276_v20 = vpop.f32.mrb[210].mxu1  ;;  %v11065_v54 = vld [vmem:[#allocation43_spill] sm:$0xff] }
 0x333   :  { %v6582_v21 = vpop.eup %6581  ;;  %6597 = vrcp.f32 %v4251_v31  ;;  %v4270_v42 = vadd.f32 %v4269_v59, %v4268_v10  ;;  %v4620_v36 = vadd.f32 %v4619_v22, %v4618_v41  ;;  %v4621_v40 = vsel %vm2373_vm2, %v4536_v43, 0.0  ;;  %v9279_v48 = vpop.f32.mrb[211].mxu1  ;;  %v11066_v22 = vld [vmem:[#allocation75_spill] sm:$0xff]  ;;  %v11067_v43 = vld [vmem:[#allocation88_spill] sm:$0xff] }
 0x334   :  { %v6584_v51 = vpop.eup %6583  ;;  %v4623_v28 = vsel %vm2373_vm2, %v4568_v37, 0.0  ;;  %v4259_v15 = vsel %vm2373_vm2, %v6580_v52, 0.0  ;;  %v4260_v33 = vsel %vm2373_vm2, %v6582_v21, 0.0  ;;  %v4471_v47 = vmul.f32 %v6580_v52, %v11065_v54 }
 0x335   :  { %v6586_v62 = vpop.eup %6585  ;;  %v4272_v34 = vadd.f32 %v4271_v24, %v4270_v42  ;;  %v4622_v30 = vadd.f32 %v4621_v40, %v4620_v36  ;;  %v4261_v19 = vadd.f32 %v4260_v33, %v4259_v15  ;;  %v4262_v10 = vsel %vm2373_vm2, %v6584_v51, 0.0 }
 0x336   :  { %v9286_v41 = vpop.eup %6587  ;;  %v4264_v31 = vsel %vm2373_vm2, %v6586_v62, 0.0  ;;  %v4503_v59 = vmul.f32 %v6582_v21, %v11066_v22  ;;  %v4535_v37 = vmul.f32 %v6584_v51, %v11067_v43  ;;  %v4567_v56 = vmul.f32 %v6586_v62, %v11068_v5  ;;  %v9292_v18 = vpop.f32.mrb[212].mxu1 }
 0x337   :  { %v9294_v17 = vpop.eup %6589  ;;  %v9296_v52 = vadd.f32 %v4623_v28, %v4622_v30  ;;  %6599 = vrcp.f32 %v4272_v34  ;;  %v4263_v24 = vadd.f32 %v4262_v10, %v4261_v19  ;;  %v4611_v42 = vsel %vm2373_vm2, %v4471_v47, 0.0  ;;  %v9299_v36 = vpop.f32.mrb[213].mxu1 }
 0x338   :  { %11069 = vst [vmem:[#allocation174_spill] sm:$0xff] %v9294_v17  ;;  %v9301_v40 = vpop.eup %6591  ;;  %v4612_v21 = vsel %vm2373_vm2, %v4503_v59, 0.0  ;;  %v4614_v51 = vsel %vm2373_vm2, %v4535_v37, 0.0  ;;  %v4616_v5 = vsel %vm2373_vm2, %v4567_v56, 0.0  ;;  %v4280_v15 = vsel %vm2373_vm2, %v9286_v41, 0.0 }
 0x339   :  { %11070 = vst [vmem:[#allocation170_spill] sm:$0xff] %v9301_v40  ;;  %v9308_v33 = vpop.eup %6593  ;;  %v4265_v30 = vadd.f32 %v4264_v31, %v4263_v24  ;;  %v4613_v28 = vadd.f32 %v4612_v21, %v4611_v42  ;;  %v4281_v19 = vsel %vm2373_vm2, %v9294_v17, 0.0  ;;  %v4283_v54 = vsel %vm2373_vm2, %v9301_v40, 0.0  ;;  %v11073_v21 = vld [vmem:[#allocation184_spill] sm:$0xff] }
 0x33a   :  { %v9314_v47 = vpop.eup %6595  ;;  %v4282_v62 = vadd.f32 %v4281_v19, %v4280_v15  ;;  %6601 = vpow2.f32 %v9256_v35  ;;  %v11072_v56 = vsub.f32 %v9180_v13, %v9214_v53  ;;  %v3691_v10 = vsel %vm2373_vm2, %v9197_v7, -inf  ;;  %v9322_v31 = vpop.f32.mrb[214].mxu1 }
 0x33b   :  { %11071 = vst [vmem:[#allocation201_spill] sm:$0xff] %v9314_v47  ;;  %v4615_v22 = vadd.f32 %v4614_v51, %v4613_v28  ;;  %6603 = vrcp.f32 %v4265_v30  ;;  %v4285_v59 = vsel %vm2373_vm2, %v9314_v47, 0.0  ;;  %v3692_v43 = vmax.f32 %v8780_v26, %v3691_v10  ;;  %v9327_v37 = vpop.f32.mrb[215].mxu1  ;;  %v11074_v26 = vld [vmem:[#allocation180_spill] sm:$0xff] }
 0x33c   :  { %v4189_v34 = vmul.f32 1.442695, %v11072_v56  ;;  %v4284_v24 = vadd.f32 %v4283_v54, %v4282_v62  ;;  %6605 = vpow2.f32 %v9258_v4  ;;  %v3684_v13 = vsel %vm2373_vm2, %v9200_v25, -inf  ;;  %v11075_v28 = vld [vmem:[#allocation208_spill] sm:$0xff] }
 0x33d   :  { %v3614_v53 = vadd.f32 %v9188_v1, %v9141_v45  ;;  %v9334_v35 = vpop.eup %6597  ;;  %v9336_v42 = vadd.f32 %v4616_v5, %v4615_v22  ;;  %6607 = vpow2.f32 %v9268_v44  ;;  %v3868_v51 = vsub.f32 %v11073_v21, %v3692_v43 }
 0x33e   :  { %v3900_v15 = vsub.f32 %v11074_v26, %v3692_v43  ;;  %v4286_v30 = vadd.f32 %v4285_v59, %v4284_v24  ;;  %6609 = vpow2.f32 %v4189_v34  ;;  %v3932_v4 = vsub.f32 %v11075_v28, %v3692_v43  ;;  %v9343_v54 = vpop.f32.mrb[216].mxu1  ;;  %v11076_v24 = vld [vmem:[#allocation185_spill] sm:$0xff]  ;;  %v11080_v28 = vld [vmem:[#allocation140_spill] sm:$0xff] }
 0x33f   :  { %v3964_v19 = vsub.f32 %v9197_v7, %v3692_v43  ;;  %v4003_v62 = vmul.f32 1.442695, %v3868_v51  ;;  %v3685_v56 = vmax.f32 %v8794_v27, %v3684_v13  ;;  %v3705_v5 = vsel %vm2373_vm2, %v3614_v53, -inf  ;;  %v9347_v10 = vpop.f32.mrb[217].mxu1  ;;  %v11077_v43 = vld [vmem:[#allocation182_spill] sm:$0xff]  ;;  %v11078_v51 = vld [vmem:[#allocation209_spill] sm:$0xff] }
 0x340   :  { %v4067_v1 = vmul.f32 1.442695, %v3900_v15  ;;  %6611 = vrcp.f32 %v4286_v30  ;;  %v4131_v44 = vmul.f32 1.442695, %v3932_v4  ;;  %v3706_v59 = vmax.f32 %v8826_v12, %v3705_v5  ;;  %v11079_v13 = vld [vmem:[#allocation189_spill] sm:$0xff] }
 0x341   :  { %v4195_v22 = vmul.f32 1.442695, %v3964_v19  ;;  %v9350_v34 = vpop.eup %6599  ;;  %6613 = vpow2.f32 %v4003_v62  ;;  %v3867_v7 = vsub.f32 %v11076_v24, %v3685_v56  ;;  %v3899_v21 = vsub.f32 %v11077_v43, %v3685_v56  ;;  %v11081_v43 = vld [vmem:[#allocation212_spill] sm:$0xff] }
 0x342   :  { %v3931_v26 = vsub.f32 %v11078_v51, %v3685_v56  ;;  %6615 = vpow2.f32 %v4067_v1  ;;  %v3963_v27 = vsub.f32 %v9200_v25, %v3685_v56  ;;  %v3870_v15 = vsub.f32 %v11079_v13, %v3706_v59  ;;  %v9358_v4 = vpop.f32.mrb[218].mxu1 }
 0x343   :  { %v3902_v30 = vsub.f32 %v11080_v28, %v3706_v59  ;;  %6617 = vpow2.f32 %v4131_v44  ;;  %v4001_v12 = vmul.f32 1.442695, %v3867_v7  ;;  %v4065_v19 = vmul.f32 1.442695, %v3899_v21  ;;  %v9363_v1 = vpop.f32.mrb[219].mxu1 }
 0x344   :  { %v4129_v5 = vmul.f32 1.442695, %v3931_v26  ;;  %v9360_v62 = vpop.eup %6601  ;;  %6619 = vpow2.f32 %v4195_v22  ;;  %v4193_v24 = vmul.f32 1.442695, %v3963_v27  ;;  %v3934_v47 = vsub.f32 %v11081_v43, %v3706_v59 }
 0x345   :  { %v3966_v51 = vsub.f32 %v3614_v53, %v3706_v59  ;;  %v9365_v25 = vpop.eup %6603  ;;  %v4273_v56 = vsel %vm2373_vm2, %v9360_v62, 0.0  ;;  %6621 = vpow2.f32 %v4001_v12  ;;  %v4007_v13 = vmul.f32 1.442695, %v3870_v15 }
 0x346   :  { %v4071_v44 = vmul.f32 1.442695, %v3902_v30  ;;  %v9369_v7 = vpop.eup %6605  ;;  %6623 = vpow2.f32 %v4065_v19  ;;  %v4135_v21 = vmul.f32 1.442695, %v3934_v47  ;;  %v3613_v22 = vadd.f32 %v9141_v45, %v9191_v23  ;;  %v9373_v27 = vpop.f32.mrb[220].mxu1 }
 0x347   :  { %v4199_v26 = vmul.f32 1.442695, %v3966_v51  ;;  %v9375_v53 = vpop.eup %6607  ;;  %v4274_v59 = vsel %vm2373_vm2, %v9369_v7, 0.0  ;;  %6625 = vpow2.f32 %v4129_v5  ;;  %v9381_v15 = vadd.f32 %v9207_v32, %v9141_v45 }
 0x348   :  { %11082 = vst [vmem:[#allocation178_spill] sm:$0xff] %v9375_v53  ;;  %v9385_v28 = vadd.f32 %v9141_v45, %v9216_v61  ;;  %v9387_v47 = vpop.eup %6609  ;;  %v4275_v30 = vadd.f32 %v4274_v59, %v4273_v56  ;;  %v4276_v23 = vsel %vm2373_vm2, %v9375_v53, 0.0  ;;  %6627 = vpow2.f32 %v4193_v24  ;;  %v11086_v59 = vld [vmem:[#allocation191_spill] sm:$0xff] }
 0x349   :  { %11083 = vst [vmem:[#allocation173_spill] sm:$0xff] %v9387_v47  ;;  %v3698_v12 = vsel %vm2373_vm2, %v3613_v22, -inf  ;;  %v4278_v19 = vsel %vm2373_vm2, %v9387_v47, 0.0  ;;  %6629 = vpow2.f32 %v4007_v13  ;;  %v3719_v5 = vsel %vm2373_vm2, %v9381_v15, -inf  ;;  %v11087_v13 = vld [vmem:[#allocation141_spill] sm:$0xff] }
 0x34a   :  { %v3699_v32 = vmax.f32 %v8840_v8, %v3698_v12  ;;  %v9397_v61 = vpop.eup %6611  ;;  %v4277_v43 = vadd.f32 %v4276_v23, %v4275_v30  ;;  %6631 = vpow2.f32 %v4071_v44  ;;  %v3720_v51 = vmax.f32 %v8872_v2, %v3719_v5  ;;  %v11088_v8 = vld [vmem:[#allocation213_spill] sm:$0xff]  ;;  %v9411_v30 = vpop.f32.mrb[221].mxu1 }
 0x34b   :  { %11084 = vst [vmem:[#allocation205_spill] sm:$0xff] %v9397_v61  ;;  %v3712_v24 = vsel %vm2373_vm2, %v9385_v28, -inf  ;;  %v9402_v56 = vpop.eup %6613  ;;  %6633 = vpow2.f32 %v4135_v21  ;;  %11090 = vst [vmem:[#allocation45_spill] sm:$0xff] %v9411_v30 }
 0x34c   :  { %11085 = vst [vmem:[#allocation179_spill] sm:$0xff] %v9402_v56  ;;  %v3869_v47 = vsub.f32 %v11086_v59, %v3699_v32  ;;  %v3901_v40 = vsub.f32 %v11087_v13, %v3699_v32  ;;  %v3933_v12 = vsub.f32 %v11088_v8, %v3699_v32  ;;  %v9407_v53 = vpop.eup %6615  ;;  %v4279_v17 = vadd.f32 %v4278_v19, %v4277_v43  ;;  %v11092_v13 = vld [vmem:[#allocation194_spill] sm:$0xff] }
 0x34d   :  { %11089 = vst [vmem:[#allocation175_spill] sm:$0xff] %v9407_v53  ;;  %v4294_v44 = vsel %vm2373_vm2, %v9402_v56, 0.0  ;;  %6635 = vpow2.f32 %v4199_v26  ;;  %v3965_v2 = vsub.f32 %v3613_v22, %v3699_v32  ;;  %v9413_v23 = vpop.eup %6617  ;;  %v4295_v21 = vsel %vm2373_vm2, %v9407_v53, 0.0  ;;  %v11094_v53 = vld [vmem:[#allocation145_spill] sm:$0xff] }
 0x34e   :  { %11091 = vst [vmem:[#allocation26_spill] sm:$0xff] %v9413_v23  ;;  %v4005_v5 = vmul.f32 1.442695, %v3869_v47  ;;  %v4069_v59 = vmul.f32 1.442695, %v3901_v40  ;;  %v3872_v61 = vsub.f32 %v11092_v13, %v3720_v51  ;;  %v9418_v8 = vpop.eup %6619  ;;  %6637 = vrcp.f32 %v4279_v17 }
 0x34f   :  { %11093 = vst [vmem:[#allocation90_spill] sm:$0xff] %v9418_v8  ;;  %v4296_v19 = vadd.f32 %v4295_v21, %v4294_v44  ;;  %v4297_v43 = vsel %vm2373_vm2, %v9413_v23, 0.0  ;;  %v4133_v26 = vmul.f32 1.442695, %v3933_v12  ;;  %v9422_v22 = vpop.eup %6621  ;;  %v4299_v32 = vsel %vm2373_vm2, %v9418_v8, 0.0  ;;  %v11096_v44 = vld [vmem:[#allocation216_spill] sm:$0xff] }
 0x350   :  { %6639 = vpow2.f32 %v4005_v5  ;;  %v4197_v56 = vmul.f32 1.442695, %v3965_v2  ;;  %v3904_v47 = vsub.f32 %v11094_v53, %v3720_v51  ;;  %v9427_v40 = vpop.eup %6623  ;;  %v4287_v17 = vsel %vm2373_vm2, %v9422_v22, 0.0 }
 0x351   :  { %11095 = vst [vmem:[#allocation122_spill] sm:$0xff] %v9427_v40  ;;  %v4298_v13 = vadd.f32 %v4297_v43, %v4296_v19  ;;  %6641 = vpow2.f32 %v4069_v59  ;;  %v3936_v21 = vsub.f32 %v11096_v44, %v3720_v51  ;;  %v9432_v23 = vpop.eup %6625  ;;  %v4288_v12 = vsel %vm2373_vm2, %v9427_v40, 0.0 }
 0x352   :  { %6643 = vpow2.f32 %v4133_v26  ;;  %v3968_v5 = vsub.f32 %v9381_v15, %v3720_v51  ;;  %v4011_v2 = vmul.f32 1.442695, %v3872_v61  ;;  %v9437_v8 = vpop.eup %6627  ;;  %v4289_v30 = vadd.f32 %v4288_v12, %v4287_v17 }
 0x353   :  { %v4300_v53 = vadd.f32 %v4299_v32, %v4298_v13  ;;  %v4290_v19 = vsel %vm2373_vm2, %v9432_v23, 0.0  ;;  %6645 = vpow2.f32 %v4197_v56  ;;  %v9441_v59 = vpop.eup %6629  ;;  %v4292_v43 = vsel %vm2373_vm2, %v9437_v8, 0.0 }
 0x354   :  { %11097 = vst [vmem:[#allocation43_spill] sm:$0xff] %v9441_v59  ;;  %6647 = vpow2.f32 %v4011_v2  ;;  %v4075_v44 = vmul.f32 1.442695, %v3904_v47  ;;  %v4139_v40 = vmul.f32 1.442695, %v3936_v21  ;;  %v9445_v26 = vpop.eup %6631  ;;  %v4291_v15 = vadd.f32 %v4290_v19, %v4289_v30  ;;  %v11101_v2 = vld [vmem:[#allocation195_spill] sm:$0xff] }
 0x355   :  { %11098 = vst [vmem:[#allocation75_spill] sm:$0xff] %v9445_v26  ;;  %6649 = vrcp.f32 %v4300_v53  ;;  %v4308_v61 = vsel %vm2373_vm2, %v9441_v59, 0.0  ;;  %v4203_v51 = vmul.f32 1.442695, %v3968_v5  ;;  %v9449_v32 = vpop.eup %6633  ;;  %v4309_v56 = vsel %vm2373_vm2, %v9445_v26, 0.0  ;;  %v11102_v19 = vld [vmem:[#allocation147_spill] sm:$0xff] }
 0x356   :  { %11099 = vst [vmem:[#allocation88_spill] sm:$0xff] %v9449_v32  ;;  %6651 = vpow2.f32 %v4075_v44  ;;  %v3713_v13 = vmax.f32 %v8886_v16, %v3712_v24  ;;  %v3618_v47 = vadd.f32 %v9232_v57, %v9141_v45  ;;  %v4293_v21 = vadd.f32 %v4292_v43, %v4291_v15  ;;  %v9464_v16 = vpop.f32.mrb[222].mxu1  ;;  %v11103_v43 = vld [vmem:[#allocation217_spill] sm:$0xff] }
 0x357   :  { %v9456_v17 = vpop.eup %6635  ;;  %v4310_v12 = vadd.f32 %v4309_v56, %v4308_v61  ;;  %v4311_v30 = vsel %vm2373_vm2, %v9449_v32, 0.0  ;;  %6653 = vpow2.f32 %v4139_v40 }
 0x358   :  { %11100 = vst [vmem:[#allocation120_spill] sm:$0xff] %v9456_v17  ;;  %v4313_v5 = vsel %vm2373_vm2, %v9456_v17, 0.0  ;;  %6655 = vpow2.f32 %v4203_v51  ;;  %v3871_v53 = vsub.f32 %v11101_v2, %v3713_v13  ;;  %v3903_v44 = vsub.f32 %v11102_v19, %v3713_v13  ;;  %v9466_v24 = vpop.eup %6637 }
 0x359   :  { %6657 = vrcp.f32 %v4293_v21  ;;  %v4312_v57 = vadd.f32 %v4311_v30, %v4310_v12  ;;  %v3935_v15 = vsub.f32 %v11103_v43, %v3713_v13  ;;  %v3967_v61 = vsub.f32 %v9385_v28, %v3713_v13 }
 0x35a   :  { %v9470_v56 = vpop.eup %6639  ;;  %v4009_v40 = vmul.f32 1.442695, %v3871_v53  ;;  %v4073_v32 = vmul.f32 1.442695, %v3903_v44  ;;  %v3733_v51 = vsel %vm2373_vm2, %v3618_v47, -inf  ;;  %v3617_v2 = vadd.f32 %v9141_v45, %v9240_v3 }
 0x35b   :  { %11104 = vst [vmem:[#allocation184_spill] sm:$0xff] %v9470_v56  ;;  %v9475_v19 = vpop.eup %6641  ;;  %v4314_v17 = vadd.f32 %v4313_v5, %v4312_v57  ;;  %v4301_v21 = vsel %vm2373_vm2, %v9470_v56, 0.0  ;;  %v4137_v12 = vmul.f32 1.442695, %v3935_v15  ;;  %v4201_v30 = vmul.f32 1.442695, %v3967_v61 }
 0x35c   :  { %11105 = vst [vmem:[#allocation180_spill] sm:$0xff] %v9475_v19  ;;  %v9479_v43 = vpop.eup %6643  ;;  %v4302_v28 = vsel %vm2373_vm2, %v9475_v19, 0.0  ;;  %6659 = vpow2.f32 %v4009_v40  ;;  %v3734_v13 = vmax.f32 %v8918_v49, %v3733_v51  ;;  %v3726_v53 = vsel %vm2373_vm2, %v3617_v2, -inf  ;;  %v11109_v40 = vld [vmem:[#allocation198_spill] sm:$0xff]  ;;  %v11110_v49 = vld [vmem:[#allocation148_spill] sm:$0xff]  ;;  %v9508_v56 = vpop.f32.mrb[223].mxu1 }
 0x35d   :  { %11106 = vst [vmem:[#allocation208_spill] sm:$0xff] %v9479_v43  ;;  %v9485_v44 = vpop.eup %6645  ;;  %6661 = vrcp.f32 %v4314_v17  ;;  %v4303_v3 = vadd.f32 %v4302_v28, %v4301_v21  ;;  %v4304_v5 = vsel %vm2373_vm2, %v9479_v43, 0.0  ;;  %v3727_v57 = vmax.f32 %v8932_v29, %v3726_v53  ;;  %v11112_v21 = vld [vmem:[#allocation220_spill] sm:$0xff] }
 0x35e   :  { %11107 = vst [vmem:[#allocation185_spill] sm:$0xff] %v9485_v44  ;;  %v9490_v15 = vpop.eup %6647  ;;  %v4306_v61 = vsel %vm2373_vm2, %v9485_v44, 0.0  ;;  %6663 = vpow2.f32 %v4073_v32  ;;  %v3874_v26 = vsub.f32 %v11109_v40, %v3734_v13  ;;  %v3906_v51 = vsub.f32 %v11110_v49, %v3734_v13 }
 0x35f   :  { %11108 = vst [vmem:[#allocation182_spill] sm:$0xff] %v9490_v15  ;;  %v9496_v19 = vpop.eup %6649  ;;  %v4305_v59 = vadd.f32 %v4304_v5, %v4303_v3  ;;  %v4322_v17 = vsel %vm2373_vm2, %v9490_v15, 0.0  ;;  %6665 = vpow2.f32 %v4137_v12  ;;  %v3938_v28 = vsub.f32 %v11112_v21, %v3734_v13  ;;  %v11115_v3 = vld [vmem:[#allocation199_spill] sm:$0xff] }
 0x360   :  { %11111 = vst [vmem:[#allocation209_spill] sm:$0xff] %v9496_v19  ;;  %v9501_v29 = vpop.eup %6651  ;;  %6667 = vpow2.f32 %v4201_v30  ;;  %v3970_v53 = vsub.f32 %v3618_v47, %v3734_v13  ;;  %v4015_v43 = vmul.f32 1.442695, %v3874_v26  ;;  %v4079_v44 = vmul.f32 1.442695, %v3906_v51  ;;  %v11117_v13 = vld [vmem:[#allocation149_spill] sm:$0xff] }
 0x361   :  { %11113 = vst [vmem:[#allocation189_spill] sm:$0xff] %v9501_v29  ;;  %v9503_v32 = vpop.eup %6653  ;;  %v4307_v40 = vadd.f32 %v4306_v61, %v4305_v59  ;;  %v4323_v49 = vsel %vm2373_vm2, %v9501_v29, 0.0  ;;  %v4143_v19 = vmul.f32 1.442695, %v3938_v28  ;;  %v3873_v5 = vsub.f32 %v11115_v3, %v3727_v57  ;;  %v11118_v51 = vld [vmem:[#allocation221_spill] sm:$0xff] }
 0x362   :  { %11114 = vst [vmem:[#allocation140_spill] sm:$0xff] %v9503_v32  ;;  %v9510_v12 = vpop.eup %6655  ;;  %v4324_v21 = vadd.f32 %v4323_v49, %v4322_v17  ;;  %v4325_v30 = vsel %vm2373_vm2, %v9503_v32, 0.0  ;;  %6669 = vpow2.f32 %v4015_v43  ;;  %v4207_v26 = vmul.f32 1.442695, %v3970_v53 }
 0x363   :  { %11116 = vst [vmem:[#allocation212_spill] sm:$0xff] %v9510_v12  ;;  %v9514_v47 = vpop.eup %6657  ;;  %6671 = vrcp.f32 %v4307_v40  ;;  %v4327_v59 = vsel %vm2373_vm2, %v9510_v12, 0.0  ;;  %v3905_v61 = vsub.f32 %v11117_v13, %v3727_v57  ;;  %v3937_v28 = vsub.f32 %v11118_v51, %v3727_v57 }
 0x364   :  { %v4326_v3 = vadd.f32 %v4325_v30, %v4324_v21  ;;  %6673 = vpow2.f32 %v4079_v44  ;;  %v3969_v29 = vsub.f32 %v3617_v2, %v3727_v57  ;;  %v4013_v15 = vmul.f32 1.442695, %v3873_v5 }
 0x365   :  { %6675 = vpow2.f32 %v4143_v19  ;;  %v4077_v17 = vmul.f32 1.442695, %v3905_v61  ;;  %v4141_v49 = vmul.f32 1.442695, %v3937_v28  ;;  %v3620_v43 = vadd.f32 %v9260_v14, %v9141_v45  ;;  %v9555_v61 = vpop.f32.mrb[224].mxu1  ;;  %v11125_v28 = vld [vmem:[#allocation153_spill] sm:$0xff] }
 0x366   :  { %v9522_v53 = vpop.eup %6659  ;;  %v4328_v40 = vadd.f32 %v4327_v59, %v4326_v3  ;;  %6677 = vpow2.f32 %v4207_v26  ;;  %v4205_v32 = vmul.f32 1.442695, %v3969_v29  ;;  %v3619_v13 = vadd.f32 %v9141_v45, %v9264_v6  ;;  %v11126_v3 = vld [vmem:[#allocation224_spill] sm:$0xff] }
 0x367   :  { %11119 = vst [vmem:[#allocation191_spill] sm:$0xff] %v9522_v53  ;;  %v9526_v12 = vpop.eup %6661  ;;  %v4315_v2 = vsel %vm2373_vm2, %v9522_v53, 0.0  ;;  %6679 = vpow2.f32 %v4013_v15  ;;  %v3747_v19 = vsel %vm2373_vm2, %v3620_v43, -inf  ;;  %v9533_v44 = vadd.f32 %v9276_v20, %v9141_v45 }
 0x368   :  { %11120 = vst [vmem:[#allocation141_spill] sm:$0xff] %v9526_v12  ;;  %v9535_v14 = vpop.eup %6663  ;;  %6681 = vrcp.f32 %v4328_v40  ;;  %v3748_v57 = vmax.f32 %v8964_v11, %v3747_v19  ;;  %v3740_v29 = vsel %vm2373_vm2, %v3619_v13, -inf  ;;  %v9541_v6 = vadd.f32 %v9141_v45, %v9279_v48  ;;  %v11124_v48 = vld [vmem:[#allocation202_spill] sm:$0xff] }
 0x369   :  { %11121 = vst [vmem:[#allocation213_spill] sm:$0xff] %v9535_v14  ;;  %v9543_v5 = vpop.eup %6665  ;;  %v4316_v15 = vsel %vm2373_vm2, %v9535_v14, 0.0  ;;  %6683 = vpow2.f32 %v4077_v17  ;;  %v3741_v20 = vmax.f32 %v8978_v39, %v3740_v29  ;;  %v3761_v21 = vsel %vm2373_vm2, %v9533_v44, -inf }
 0x36a   :  { %11122 = vst [vmem:[#allocation194_spill] sm:$0xff] %v9543_v5  ;;  %v9550_v30 = vpop.eup %6667  ;;  %v4317_v11 = vadd.f32 %v4316_v15, %v4315_v2  ;;  %v4318_v26 = vsel %vm2373_vm2, %v9543_v5, 0.0  ;;  %6685 = vpow2.f32 %v4141_v49  ;;  %v3876_v59 = vsub.f32 %v11124_v48, %v3748_v57  ;;  %v11127_v15 = vld [vmem:[#allocation203_spill] sm:$0xff] }
 0x36b   :  { %11123 = vst [vmem:[#allocation145_spill] sm:$0xff] %v9550_v30  ;;  %v4320_v51 = vsel %vm2373_vm2, %v9550_v30, 0.0  ;;  %6687 = vpow2.f32 %v4205_v32  ;;  %v3908_v39 = vsub.f32 %v11125_v28, %v3748_v57  ;;  %v3940_v17 = vsub.f32 %v11126_v3, %v3748_v57  ;;  %v11128_v30 = vld [vmem:[#allocation155_spill] sm:$0xff] }
 0x36c   :  { %v9561_v40 = vpop.eup %6669  ;;  %v4319_v19 = vadd.f32 %v4318_v26, %v4317_v11  ;;  %v3972_v2 = vsub.f32 %v3620_v43, %v3748_v57  ;;  %v4019_v29 = vmul.f32 1.442695, %v3876_v59  ;;  %v3875_v12 = vsub.f32 %v11127_v15, %v3741_v20 }
 0x36d   :  { %v9564_v49 = vpop.eup %6671  ;;  %v4336_v48 = vsel %vm2373_vm2, %v9561_v40, 0.0  ;;  %v4083_v5 = vmul.f32 1.442695, %v3908_v39  ;;  %v4147_v14 = vmul.f32 1.442695, %v3940_v17  ;;  %v3907_v32 = vsub.f32 %v11128_v30, %v3741_v20 }
 0x36e   :  { %v9569_v53 = vpop.eup %6673  ;;  %v4321_v28 = vadd.f32 %v4320_v51, %v4319_v19  ;;  %6689 = vpow2.f32 %v4019_v29  ;;  %v4211_v3 = vmul.f32 1.442695, %v3972_v2  ;;  %v3939_v11 = vsub.f32 %v8952_v0, %v3741_v20 }
 0x36f   :  { %v9572_v43 = vpop.eup %6675  ;;  %v4337_v57 = vsel %vm2373_vm2, %v9569_v53, 0.0  ;;  %6691 = vpow2.f32 %v4083_v5  ;;  %v3971_v26 = vsub.f32 %v3619_v13, %v3741_v20  ;;  %v4017_v59 = vmul.f32 1.442695, %v3875_v12 }
 0x370   :  { %v9576_v15 = vpop.eup %6677  ;;  %6693 = vrcp.f32 %v4321_v28  ;;  %v4338_v39 = vadd.f32 %v4337_v57, %v4336_v48  ;;  %v4339_v30 = vsel %vm2373_vm2, %v9572_v43, 0.0  ;;  %v4081_v51 = vmul.f32 1.442695, %v3907_v32  ;;  %v9606_v57 = vpop.f32.mrb[225].mxu1 }
 0x371   :  { %11129 = vst [vmem:[#allocation216_spill] sm:$0xff] %v9576_v15  ;;  %v9580_v17 = vpop.eup %6679  ;;  %v4341_v0 = vsel %vm2373_vm2, %v9576_v15, 0.0  ;;  %6695 = vpow2.f32 %v4147_v14  ;;  %v4145_v19 = vmul.f32 1.442695, %v3939_v11  ;;  %v4209_v2 = vmul.f32 1.442695, %v3971_v26 }
 0x372   :  { %v9584_v29 = vpop.eup %6681  ;;  %v4340_v13 = vadd.f32 %v4339_v30, %v4338_v39  ;;  %v4329_v12 = vsel %vm2373_vm2, %v9580_v17, 0.0  ;;  %6697 = vpow2.f32 %v4211_v3  ;;  %v3762_v5 = vmax.f32 %v9007_v60, %v3761_v21  ;;  %v11131_v21 = vld [vmem:[#allocation206_spill] sm:$0xff] }
 0x373   :  { %11130 = vst [vmem:[#allocation195_spill] sm:$0xff] %v9584_v29  ;;  %v9589_v20 = vpop.eup %6683  ;;  %6699 = vpow2.f32 %v4017_v59  ;;  %v3754_v48 = vsel %vm2373_vm2, %v9541_v6, -inf  ;;  %v9595_v14 = vadd.f32 %v9292_v18, %v9141_v45  ;;  %v9599_v32 = vadd.f32 %v9141_v45, %v9299_v36  ;;  %v11133_v36 = vld [vmem:[#allocation156_spill] sm:$0xff] }
 0x374   :  { %v9601_v28 = vpop.eup %6685  ;;  %v4342_v11 = vadd.f32 %v4341_v0, %v4340_v13  ;;  %v4330_v60 = vsel %vm2373_vm2, %v9589_v20, 0.0  ;;  %6701 = vpow2.f32 %v4081_v51  ;;  %v3878_v3 = vsub.f32 %v11131_v21, %v3762_v5 }
 0x375   :  { %v9608_v26 = vpop.eup %6687  ;;  %v4331_v59 = vadd.f32 %v4330_v60, %v4329_v12  ;;  %v4332_v18 = vsel %vm2373_vm2, %v9601_v28, 0.0  ;;  %6703 = vpow2.f32 %v4145_v19  ;;  %v3910_v39 = vsub.f32 %v11133_v36, %v3762_v5 }
 0x376   :  { %11132 = vst [vmem:[#allocation147_spill] sm:$0xff] %v9608_v26  ;;  %6705 = vrcp.f32 %v4342_v11  ;;  %v4334_v30 = vsel %vm2373_vm2, %v9608_v26, 0.0  ;;  %v3942_v0 = vsub.f32 %v8985_v38, %v3762_v5  ;;  %v3974_v51 = vsub.f32 %v9533_v44, %v3762_v5 }
 0x377   :  { %v4333_v13 = vadd.f32 %v4332_v18, %v4331_v59  ;;  %6707 = vpow2.f32 %v4209_v2  ;;  %v4023_v21 = vmul.f32 1.442695, %v3878_v3  ;;  %v4087_v29 = vmul.f32 1.442695, %v3910_v39  ;;  %v11134_v3 = vld [vmem:[#allocation207_spill] sm:$0xff] }
 0x378   :  { %v9617_v15 = vpop.eup %6689  ;;  %v4151_v12 = vmul.f32 1.442695, %v3942_v0  ;;  %v4215_v60 = vmul.f32 1.442695, %v3974_v51  ;;  %v3755_v19 = vmax.f32 %v9019_v9, %v3754_v48  ;;  %v3775_v11 = vsel %vm2373_vm2, %v9595_v14, -inf  ;;  %v11135_v48 = vld [vmem:[#allocation157_spill] sm:$0xff] }
 0x379   :  { %v9622_v36 = vpop.eup %6691  ;;  %v4335_v26 = vadd.f32 %v4334_v30, %v4333_v13  ;;  %v4350_v38 = vsel %vm2373_vm2, %v9617_v15, 0.0  ;;  %6709 = vpow2.f32 %v4023_v21  ;;  %v3776_v44 = vmax.f32 %v9038_v63, %v3775_v11 }
 0x37a   :  { %v9627_v2 = vpop.eup %6693  ;;  %v4351_v5 = vsel %vm2373_vm2, %v9622_v36, 0.0  ;;  %6711 = vpow2.f32 %v4087_v29  ;;  %v3877_v9 = vsub.f32 %v11134_v3, %v3755_v19  ;;  %v3909_v59 = vsub.f32 %v11135_v48, %v3755_v19 }
 0x37b   :  { %v9633_v18 = vpop.eup %6695  ;;  %6713 = vrcp.f32 %v4335_v26  ;;  %v4352_v39 = vadd.f32 %v4351_v5, %v4350_v38  ;;  %v3941_v30 = vsub.f32 %v8996_v46, %v3755_v19  ;;  %v3973_v0 = vsub.f32 %v9541_v6, %v3755_v19  ;;  %v11137_v19 = vld [vmem:[#allocation210_spill] sm:$0xff] }
 0x37c   :  { %v9637_v51 = vpop.eup %6697  ;;  %v4353_v63 = vsel %vm2373_vm2, %v9633_v18, 0.0  ;;  %6715 = vpow2.f32 %v4151_v12  ;;  %v4021_v13 = vmul.f32 1.442695, %v3877_v9  ;;  %v4085_v29 = vmul.f32 1.442695, %v3909_v59  ;;  %v11138_v59 = vld [vmem:[#allocation161_spill] sm:$0xff] }
 0x37d   :  { %11136 = vst [vmem:[#allocation217_spill] sm:$0xff] %v9637_v51  ;;  %v9641_v21 = vpop.eup %6699  ;;  %v4354_v11 = vadd.f32 %v4353_v63, %v4352_v39  ;;  %v4355_v3 = vsel %vm2373_vm2, %v9637_v51, 0.0  ;;  %6717 = vpow2.f32 %v4215_v60  ;;  %v4149_v26 = vmul.f32 1.442695, %v3941_v30 }
 0x37e   :  { %v9645_v38 = vpop.eup %6701  ;;  %v4343_v46 = vsel %vm2373_vm2, %v9641_v21, 0.0  ;;  %6719 = vpow2.f32 %v4021_v13  ;;  %v4213_v6 = vmul.f32 1.442695, %v3973_v0  ;;  %v3880_v5 = vsub.f32 %v11137_v19, %v3776_v44 }
 0x37f   :  { %v9650_v12 = vpop.eup %6703  ;;  %v4356_v9 = vadd.f32 %v4355_v3, %v4354_v11  ;;  %v4344_v48 = vsel %vm2373_vm2, %v9645_v38, 0.0  ;;  %6721 = vpow2.f32 %v4085_v29  ;;  %v3912_v39 = vsub.f32 %v11138_v59, %v3776_v44 }
 0x380   :  { %v9655_v60 = vpop.eup %6705  ;;  %v4345_v30 = vadd.f32 %v4344_v48, %v4343_v46  ;;  %v4346_v63 = vsel %vm2373_vm2, %v9650_v12, 0.0  ;;  %6723 = vpow2.f32 %v4149_v26  ;;  %v3944_v0 = vsub.f32 %v9024_v58, %v3776_v44 }
 0x381   :  { %11139 = vst [vmem:[#allocation198_spill] sm:$0xff] %v9655_v60  ;;  %v9660_v13 = vpop.eup %6707  ;;  %6725 = vrcp.f32 %v4356_v9  ;;  %v3976_v11 = vsub.f32 %v9595_v14, %v3776_v44  ;;  %v4027_v3 = vmul.f32 1.442695, %v3880_v5  ;;  %v4091_v19 = vmul.f32 1.442695, %v3912_v39 }
 0x382   :  { %11140 = vst [vmem:[#allocation148_spill] sm:$0xff] %v9660_v13  ;;  %v4347_v51 = vadd.f32 %v4346_v63, %v4345_v30  ;;  %v4348_v29 = vsel %vm2373_vm2, %v9660_v13, 0.0  ;;  %6727 = vpow2.f32 %v4213_v6  ;;  %v4155_v59 = vmul.f32 1.442695, %v3944_v0  ;;  %v11145_v0 = vld [vmem:[#allocation211_spill] sm:$0xff] }
 0x383   :  { %v9665_v46 = vpop.eup %6709  ;;  %6729 = vpow2.f32 %v4027_v3  ;;  %v4219_v48 = vmul.f32 1.442695, %v3976_v11  ;;  %v3768_v58 = vsel %vm2373_vm2, %v9599_v32, -inf  ;;  %v3626_v26 = vadd.f32 %v9322_v31, %v9141_v45  ;;  %v11146_v3 = vld [vmem:[#allocation163_spill] sm:$0xff] }
 0x384   :  { %11141 = vst [vmem:[#allocation220_spill] sm:$0xff] %v9665_v46  ;;  %v9671_v9 = vpop.eup %6711  ;;  %v4349_v14 = vadd.f32 %v4348_v29, %v4347_v51  ;;  %v4364_v44 = vsel %vm2373_vm2, %v9665_v46, 0.0  ;;  %6731 = vpow2.f32 %v4091_v19  ;;  %v3769_v6 = vmax.f32 %v9045_v50, %v3768_v58 }
 0x385   :  { %11142 = vst [vmem:[#allocation199_spill] sm:$0xff] %v9671_v9  ;;  %v9676_v5 = vpop.eup %6713  ;;  %v4365_v39 = vsel %vm2373_vm2, %v9671_v9, 0.0  ;;  %6733 = vpow2.f32 %v4155_v59  ;;  %v3789_v30 = vsel %vm2373_vm2, %v3626_v26, -inf  ;;  %v9683_v31 = vadd.f32 %v9141_v45, %v9327_v37 }
 0x386   :  { %11143 = vst [vmem:[#allocation149_spill] sm:$0xff] %v9676_v5  ;;  %v9685_v63 = vpop.eup %6715  ;;  %6735 = vrcp.f32 %v4349_v14  ;;  %v4366_v51 = vadd.f32 %v4365_v39, %v4364_v44  ;;  %v3879_v11 = vsub.f32 %v11145_v0, %v3769_v6  ;;  %v3911_v50 = vsub.f32 %v11146_v3, %v3769_v6  ;;  %v11178_v5 = vld [vmem:[#allocation218_spill] sm:$0xff] }
 0x387   :  { %11144 = vst [vmem:[#allocation221_spill] sm:$0xff] %v9685_v63  ;;  %v9689_v19 = vpop.eup %6717  ;;  %v4367_v29 = vsel %vm2373_vm2, %v9685_v63, 0.0  ;;  %6737 = vpow2.f32 %v4219_v48  ;;  %v3943_v59 = vsub.f32 %v9031_v55, %v3769_v6  ;;  %v3975_v58 = vsub.f32 %v9599_v32, %v3769_v6  ;;  %v11150_v48 = vld [vmem:[#allocation231_spill] sm:$0xff] }
 0x388   :  { %11147 = vst [vmem:[#allocation202_spill] sm:$0xff] %v9689_v19  ;;  %v9695_v37 = vpop.eup %6719  ;;  %v4368_v9 = vadd.f32 %v4367_v29, %v4366_v51  ;;  %v4369_v14 = vsel %vm2373_vm2, %v9689_v19, 0.0  ;;  %v4025_v44 = vmul.f32 1.442695, %v3879_v11  ;;  %v4089_v39 = vmul.f32 1.442695, %v3911_v50 }
 0x389   :  { %11148 = vst [vmem:[#allocation153_spill] sm:$0xff] %v9695_v37  ;;  %v9699_v0 = vpop.eup %6721  ;;  %v4357_v3 = vsel %vm2373_vm2, %v9695_v37, 0.0  ;;  %v4153_v46 = vmul.f32 1.442695, %v3943_v59  ;;  %v4217_v63 = vmul.f32 1.442695, %v3975_v58  ;;  %v3790_v60 = vmax.f32 %v11150_v48, %v3789_v30 }
 0x38a   :  { %11149 = vst [vmem:[#allocation224_spill] sm:$0xff] %v9699_v0  ;;  %v9704_v55 = vpop.eup %6723  ;;  %v4370_v32 = vadd.f32 %v4369_v14, %v4368_v9  ;;  %v4358_v6 = vsel %vm2373_vm2, %v9699_v0, 0.0  ;;  %6739 = vpow2.f32 %v4025_v44  ;;  %v3782_v51 = vsel %vm2373_vm2, %v9683_v31, -inf  ;;  %v11153_v59 = vld [vmem:[#allocation214_spill] sm:$0xff]  ;;  %v11155_v9 = vld [vmem:[#allocation165_spill] sm:$0xff] }
 0x38b   :  { %11151 = vst [vmem:[#allocation203_spill] sm:$0xff] %v9704_v55  ;;  %v9710_v11 = vpop.eup %6725  ;;  %v4359_v50 = vadd.f32 %v4358_v6, %v4357_v3  ;;  %v4360_v29 = vsel %vm2373_vm2, %v9704_v55, 0.0  ;;  %6741 = vpow2.f32 %v4089_v39  ;;  %v3882_v58 = vsub.f32 %v11153_v59, %v3790_v60  ;;  %v11156_v48 = vld [vmem:[#allocation229_spill] sm:$0xff] }
 0x38c   :  { %11152 = vst [vmem:[#allocation155_spill] sm:$0xff] %v9710_v11  ;;  %v9715_v30 = vpop.eup %6727  ;;  %6743 = vrcp.f32 %v4370_v32  ;;  %v3914_v14 = vsub.f32 %v11155_v9, %v3790_v60  ;;  %v3946_v19 = vsub.f32 %v11156_v48, %v3790_v60  ;;  %v3978_v44 = vsub.f32 %v3626_v26, %v3790_v60 }
 0x38d   :  { %11154 = vst [vmem:[#allocation206_spill] sm:$0xff] %v9715_v30  ;;  %v9719_v0 = vpop.eup %6729  ;;  %v4361_v37 = vadd.f32 %v4360_v29, %v4359_v50  ;;  %v4362_v3 = vsel %vm2373_vm2, %v9715_v30, 0.0  ;;  %6745 = vpow2.f32 %v4153_v46  ;;  %v4031_v6 = vmul.f32 1.442695, %v3882_v58  ;;  %v11161_v58 = vld [vmem:[#allocation232_spill] sm:$0xff] }
 0x38e   :  { %11157 = vst [vmem:[#allocation156_spill] sm:$0xff] %v9719_v0  ;;  %v9723_v11 = vpop.eup %6731  ;;  %v4378_v39 = vsel %vm2373_vm2, %v9719_v0, 0.0  ;;  %6747 = vpow2.f32 %v4217_v63  ;;  %v4095_v32 = vmul.f32 1.442695, %v3914_v14  ;;  %v4159_v59 = vmul.f32 1.442695, %v3946_v19 }
 0x38f   :  { %11158 = vst [vmem:[#allocation207_spill] sm:$0xff] %v9723_v11  ;;  %v9727_v9 = vpop.eup %6733  ;;  %v4363_v48 = vadd.f32 %v4362_v3, %v4361_v37  ;;  %v4379_v60 = vsel %vm2373_vm2, %v9723_v11, 0.0  ;;  %6749 = vpow2.f32 %v4031_v6  ;;  %v4223_v26 = vmul.f32 1.442695, %v3978_v44  ;;  %v11163_v37 = vld [vmem:[#allocation44_spill] sm:$0xff]  ;;  %v11165_v44 = vld [vmem:[#allocation46_spill] sm:$0xff] }
 0x390   :  { %11159 = vst [vmem:[#allocation157_spill] sm:$0xff] %v9727_v9  ;;  %v9731_v50 = vpop.eup %6735  ;;  %v4380_v46 = vadd.f32 %v4379_v60, %v4378_v39  ;;  %v4381_v29 = vsel %vm2373_vm2, %v9727_v9, 0.0  ;;  %6751 = vpow2.f32 %v4095_v32  ;;  %v3783_v0 = vmax.f32 %v11161_v58, %v3782_v51  ;;  %v11164_v14 = vld [vmem:[#allocation204_spill] sm:$0xff]  ;;  %v11167_v51 = vld [vmem:[#allocation215_spill] sm:$0xff]  ;;  %v11169_v9 = vld [vmem:[#allocation230_spill] sm:$0xff] }
 0x391   :  { %11160 = vst [vmem:[#allocation210_spill] sm:$0xff] %v9731_v50  ;;  %v9736_v63 = vpop.eup %6737  ;;  %6753 = vrcp.f32 %v4363_v48  ;;  %v3628_v19 = vadd.f32 %v9343_v54, %v9141_v45  ;;  %v9742_v3 = vmul.f32 %v11164_v14, %v11163_v37  ;;  %v11166_v6 = vld [vmem:[#allocation196_spill] sm:$0xff]  ;;  %v11168_v48 = vld [vmem:[#allocation166_spill] sm:$0xff] }
 0x392   :  { %11162 = vst [vmem:[#allocation161_spill] sm:$0xff] %v9736_v63  ;;  %v9746_v11 = vmul.f32 %v11166_v6, %v11165_v44  ;;  %v4382_v39 = vadd.f32 %v4381_v29, %v4380_v46  ;;  %v4383_v32 = vsel %vm2373_vm2, %v9736_v63, 0.0  ;;  %6755 = vpow2.f32 %v4159_v59  ;;  %v11171_v46 = vld [vmem:[#allocation24_spill] sm:$0xff] }
 0x393   :  { %v3881_v60 = vsub.f32 %v11167_v51, %v3783_v0  ;;  %6757 = vpow2.f32 %v4223_v26  ;;  %v3913_v58 = vsub.f32 %v11168_v48, %v3783_v0  ;;  %v3945_v54 = vsub.f32 %v11169_v9, %v3783_v0  ;;  %v11172_v29 = vld [vmem:[#allocation172_spill] sm:$0xff]  ;;  %v11173_v48 = vld [vmem:[#allocation235_spill] sm:$0xff] }
 0x394   :  { %v3977_v50 = vsub.f32 %v9683_v31, %v3783_v0  ;;  %v9754_v37 = vpop.eup %6739  ;;  %v4384_v14 = vadd.f32 %v4383_v32, %v4382_v39  ;;  %v3803_v44 = vsel %vm2373_vm2, %v3628_v19, -inf  ;;  %v4501_v6 = vmul.f32 %v11172_v29, %v11171_v46  ;;  %v11175_v39 = vld [vmem:[#allocation76_spill] sm:$0xff]  ;;  %v11176_v32 = vld [vmem:[#allocation167_spill] sm:$0xff] }
 0x395   :  { %11170 = vst [vmem:[#allocation211_spill] sm:$0xff] %v9754_v37  ;;  %v4029_v30 = vmul.f32 1.442695, %v3881_v60  ;;  %v9759_v63 = vpop.eup %6741  ;;  %v4371_v59 = vsel %vm2373_vm2, %v9754_v37, 0.0  ;;  %v4093_v26 = vmul.f32 1.442695, %v3913_v58  ;;  %v3804_v9 = vmax.f32 %v11173_v48, %v3803_v44 }
 0x396   :  { %v4157_v51 = vmul.f32 1.442695, %v3945_v54  ;;  %v9764_v55 = vpop.eup %6743  ;;  %6759 = vrcp.f32 %v4384_v14  ;;  %v4372_v31 = vsel %vm2373_vm2, %v9759_v63, 0.0  ;;  %v4221_v0 = vmul.f32 1.442695, %v3977_v50  ;;  %v11179_v58 = vld [vmem:[#allocation169_spill] sm:$0xff] }
 0x397   :  { %11174 = vst [vmem:[#allocation163_spill] sm:$0xff] %v9764_v55  ;;  %v4502_v60 = vmul.f32 %v11176_v32, %v11175_v39  ;;  %v9770_v46 = vpop.eup %6745  ;;  %v4373_v29 = vadd.f32 %v4372_v31, %v4371_v59  ;;  %6761 = vpow2.f32 %v4029_v30  ;;  %v3884_v37 = vsub.f32 %v11178_v5, %v3804_v9  ;;  %v11181_v44 = vld [vmem:[#allocation233_spill] sm:$0xff] }
 0x398   :  { %11177 = vst [vmem:[#allocation231_spill] sm:$0xff] %v9770_v46  ;;  %v3916_v54 = vsub.f32 %v11179_v58, %v3804_v9  ;;  %v9774_v13 = vpop.eup %6747  ;;  %v4374_v14 = vsel %vm2373_vm2, %v9770_v46, 0.0  ;;  %6763 = vpow2.f32 %v4093_v26  ;;  %v3948_v48 = vsub.f32 %v11181_v44, %v3804_v9  ;;  %v11187_v46 = vld [vmem:[#allocation91_spill] sm:$0xff] }
 0x399   :  { %11180 = vst [vmem:[#allocation214_spill] sm:$0xff] %v9774_v13  ;;  %v3980_v50 = vsub.f32 %v3628_v19, %v3804_v9  ;;  %v9779_v55 = vpop.eup %6749  ;;  %v4375_v39 = vadd.f32 %v4374_v14, %v4373_v29  ;;  %v4376_v59 = vsel %vm2373_vm2, %v9774_v13, 0.0  ;;  %6765 = vpow2.f32 %v4157_v51  ;;  %v11186_v14 = vld [vmem:[#allocation168_spill] sm:$0xff] }
 0x39a   :  { %11182 = vst [vmem:[#allocation165_spill] sm:$0xff] %v9779_v55  ;;  %v4035_v30 = vmul.f32 1.442695, %v3884_v37  ;;  %v9783_v5 = vpop.eup %6751  ;;  %v4392_v31 = vsel %vm2373_vm2, %v9779_v55, 0.0  ;;  %6767 = vpow2.f32 %v4221_v0  ;;  %v4099_v32 = vmul.f32 1.442695, %v3916_v54 }
 0x39b   :  { %11183 = vst [vmem:[#allocation229_spill] sm:$0xff] %v9783_v5  ;;  %v4163_v58 = vmul.f32 1.442695, %v3948_v48  ;;  %v9787_v26 = vpop.eup %6753  ;;  %v4377_v44 = vadd.f32 %v4376_v59, %v4375_v39  ;;  %v4393_v19 = vsel %vm2373_vm2, %v9783_v5, 0.0  ;;  %v4227_v9 = vmul.f32 1.442695, %v3980_v50 }
 0x39c   :  { %11184 = vst [vmem:[#allocation232_spill] sm:$0xff] %v9787_v26  ;;  %6769 = vpow2.f32 %v4035_v30  ;;  %v9791_v29 = vpop.eup %6755  ;;  %v4394_v51 = vadd.f32 %v4393_v19, %v4392_v31  ;;  %v11185_v37 = vld [vmem:[#allocation89_spill] sm:$0xff]  ;;  %v11188_v55 = vld [vmem:[#allocation164_spill] sm:$0xff]  ;;  %v11192_v50 = vld [vmem:[#allocation123_spill] sm:$0xff] }
 0x39d   :  { %6771 = vpow2.f32 %v4099_v32  ;;  %v4533_v13 = vmul.f32 %v11186_v14, %v11185_v37  ;;  %v4534_v0 = vmul.f32 %v11188_v55, %v11187_v46  ;;  %v9797_v54 = vpop.eup %6757  ;;  %v4395_v48 = vsel %vm2373_vm2, %v9791_v29, 0.0  ;;  %v11190_v39 = vld [vmem:[#allocation121_spill] sm:$0xff]  ;;  %v11191_v59 = vld [vmem:[#allocation200_spill] sm:$0xff] }
 0x39e   :  { %11189 = vst [vmem:[#allocation44_spill] sm:$0xff] %v9797_v54  ;;  %6773 = vrcp.f32 %v4377_v44  ;;  %v4565_v30 = vmul.f32 %v11191_v59, %v11190_v39  ;;  %v11193_v5 = vld [vmem:[#allocation197_spill] sm:$0xff]  ;;  %v4396_v31 = vadd.f32 %v4395_v48, %v4394_v51  ;;  %v4397_v32 = vsel %vm2373_vm2, %v9797_v54, 0.0 }
 0x39f   :  { %v4566_v26 = vmul.f32 %v11193_v5, %v11192_v50  ;;  %6775 = vpow2.f32 %v4163_v58  ;;  %v4597_v55 = vsel %vm2373_vm2, %v9742_v3, 0.0  ;;  %v4598_v46 = vsel %vm2373_vm2, %v4501_v6, 0.0 }
 0x3a0   :  { %6777 = vpow2.f32 %v4227_v9  ;;  %v4600_v44 = vsel %vm2373_vm2, %v4533_v13, 0.0  ;;  %v4602_v19 = vsel %vm2373_vm2, %v4565_v30, 0.0  ;;  %v9812_v37 = vpop.eup %6759  ;;  %v4398_v14 = vadd.f32 %v4397_v32, %v4396_v31 }
 0x3a1   :  { %11194 = vst [vmem:[#allocation204_spill] sm:$0xff] %v9812_v37  ;;  %v4599_v39 = vadd.f32 %v4598_v46, %v4597_v55  ;;  %v4604_v5 = vsel %vm2373_vm2, %v9746_v11, 0.0  ;;  %v4605_v51 = vsel %vm2373_vm2, %v4502_v60, 0.0  ;;  %v9817_v58 = vpop.eup %6761  ;;  %v4607_v3 = vsel %vm2373_vm2, %v4534_v0, 0.0 }
 0x3a2   :  { %v4606_v48 = vadd.f32 %v4605_v51, %v4604_v5  ;;  %v4609_v6 = vsel %vm2373_vm2, %v4566_v26, 0.0  ;;  %v3627_v13 = vadd.f32 %v9141_v45, %v9347_v10  ;;  %v9823_v9 = vpop.eup %6763  ;;  %6779 = vrcp.f32 %v4398_v14 }
 0x3a3   :  { %v4385_v59 = vsel %vm2373_vm2, %v9817_v58, 0.0  ;;  %v4601_v30 = vadd.f32 %v4600_v44, %v4599_v39  ;;  %v9829_v11 = vadd.f32 %v9358_v4, %v9141_v45  ;;  %v9831_v60 = vpop.eup %6765  ;;  %v4386_v0 = vsel %vm2373_vm2, %v9823_v9, 0.0  ;;  %v11195_v4 = vld [vmem:[#allocation236_spill] sm:$0xff] }
 0x3a4   :  { %v4608_v26 = vadd.f32 %v4607_v3, %v4606_v48  ;;  %v3796_v50 = vsel %vm2373_vm2, %v3627_v13, -inf  ;;  %v4855_v10 = vmul.f32 %v9365_v25, %v9336_v42  ;;  %v9838_v31 = vpop.eup %6767  ;;  %v4387_v32 = vadd.f32 %v4386_v0, %v4385_v59  ;;  %v11198_v59 = vld [vmem:[#allocation219_spill] sm:$0xff] }
 0x3a5   :  { %v4388_v55 = vsel %vm2373_vm2, %v9831_v60, 0.0  ;;  %v4603_v46 = vadd.f32 %v4602_v19, %v4601_v30  ;;  %v3797_v44 = vmax.f32 %v11195_v4, %v3796_v50  ;;  %v4390_v39 = vsel %vm2373_vm2, %v9838_v31, 0.0  ;;  %v11200_v50 = vld [vmem:[#allocation171_spill] sm:$0xff] }
 0x3a6   :  { %v9843_v14 = vpop.eup %6769  ;;  %v4610_v5 = vadd.f32 %v4609_v6, %v4608_v26  ;;  %v3817_v51 = vsel %vm2373_vm2, %v9829_v11, -inf  ;;  %v4856_v42 = vmul.f32 %v9350_v34, %v9296_v52  ;;  %v4389_v48 = vadd.f32 %v4388_v55, %v4387_v32  ;;  %v11201_v52 = vld [vmem:[#allocation234_spill] sm:$0xff] }
 0x3a7   :  { %11196 = vst [vmem:[#allocation46_spill] sm:$0xff] %v9843_v14  ;;  %v9851_v25 = vpop.eup %6771  ;;  %v4406_v19 = vsel %vm2373_vm2, %v9843_v14, 0.0  ;;  %v4853_v3 = vmul.f32 %v9334_v35, %v4603_v46  ;;  %v3883_v30 = vsub.f32 %v11198_v59, %v3797_v44  ;;  %v3915_v4 = vsub.f32 %v11200_v50, %v3797_v44 }
 0x3a8   :  { %11197 = vst [vmem:[#allocation196_spill] sm:$0xff] %v9851_v25  ;;  %v9857_v0 = vpop.eup %6773  ;;  %v4407_v6 = vsel %vm2373_vm2, %v9851_v25, 0.0  ;;  %v4854_v26 = vmul.f32 %v9308_v33, %v4610_v5  ;;  %v3947_v34 = vsub.f32 %v11201_v52, %v3797_v44  ;;  %v4391_v32 = vadd.f32 %v4390_v39, %v4389_v48  ;;  %v11202_v39 = vld [vmem:[#allocation239_spill] sm:$0xff] }
 0x3a9   :  { %11199 = vst [vmem:[#allocation215_spill] sm:$0xff] %v9857_v0  ;;  %v9864_v37 = vpop.eup %6775  ;;  %v4408_v55 = vadd.f32 %v4407_v6, %v4406_v19  ;;  %v3979_v14 = vsub.f32 %v3627_v13, %v3797_v44  ;;  %v4033_v54 = vmul.f32 1.442695, %v3883_v30  ;;  %v4097_v0 = vmul.f32 1.442695, %v3915_v4  ;;  %v11203_v6 = vld [vmem:[#allocation48_spill] sm:$0xff] }
 0x3aa   :  { %v9866_v35 = vpop.eup %6777  ;;  %v4409_v46 = vsel %vm2373_vm2, %v9864_v37, 0.0  ;;  %v4885_v59 = vpack.c.bf16 %v4854_v26, %v4853_v3  ;;  %v4161_v25 = vmul.f32 1.442695, %v3947_v34  ;;  %6781 = vrcp.f32 %v4391_v32  ;;  %v11207_v32 = vld [vmem:[#allocation240_spill] sm:$0xff] }
 0x3ab   :  { %v4410_v33 = vadd.f32 %v4409_v46, %v4408_v55  ;;  %v4411_v5 = vsel %vm2373_vm2, %v9866_v35, 0.0  ;;  %v4225_v50 = vmul.f32 1.442695, %v3979_v14  ;;  %6783 = vpow2.f32 %v4033_v54  ;;  %v11204_v14 = vld [vmem:[#allocation222_spill] sm:$0xff]  ;;  %v11205_v54 = vld [vmem:[#allocation176_spill] sm:$0xff]  ;;  %v11208_v46 = vld [vmem:[#allocation243_spill] sm:$0xff] }
 0x3ac   :  { %6396 = vmatprep.mubr.msk.bf16.mxu0 %vm2373_vm2, %v4885_v59  ;;  %v3818_v13 = vmax.f32 %v11202_v39, %v3817_v51  ;;  %v4886_v44 = vpack.c.bf16 %v4856_v42, %v4855_v10  ;;  %v3629_v48 = vadd.f32 %v9141_v45, %v9363_v1  ;;  %v9876_v19 = vpop.eup %6779  ;;  %6785 = vpow2.f32 %v4097_v0  ;;  %v11206_v51 = vld [vmem:[#allocation237_spill] sm:$0xff] }
 0x3ad   :  { %v4412_v3 = vadd.f32 %v4411_v5, %v4410_v33  ;;  %v3632_v30 = vadd.f32 %v9373_v27, %v9141_v45  ;;  %v4473_v26 = vmul.f32 %v9360_v62, %v11203_v6  ;;  %6787 = vpow2.f32 %v4161_v25  ;;  %v11209_v33 = vld [vmem:[#allocation50_spill] sm:$0xff]  ;;  %v11210_v39 = vld [vmem:[#allocation25_spill] sm:$0xff] }
 0x3ae   :  { %v3886_v4 = vsub.f32 %v11204_v14, %v3818_v13  ;;  %v3918_v52 = vsub.f32 %v11205_v54, %v3818_v13  ;;  %v3950_v10 = vsub.f32 %v11206_v51, %v3818_v13  ;;  %6397 = vmatmul.mubr.msk.bf16.vlgmr.msra.gmra.mrb[192].mxu0 %vm2373_vm2, %v4886_v44  ;;  %v3982_v1 = vsub.f32 %v9829_v11, %v3818_v13  ;;  %v11211_v13 = vld [vmem:[#allocation30_spill] sm:$0xff]  ;;  %v11213_v6 = vld [vmem:[#allocation93_spill] sm:$0xff] }
 0x3af   :  { %6789 = vrcp.f32 %v4412_v3  ;;  %v3810_v42 = vsel %vm2373_vm2, %v3629_v48, -inf  ;;  %v3831_v0 = vsel %vm2373_vm2, %v3632_v30, -inf  ;;  %v4474_v5 = vmul.f32 %v9286_v41, %v11209_v33  ;;  %v11212_v44 = vld [vmem:[#allocation174_spill] sm:$0xff]  ;;  %v11218_v41 = vld [vmem:[#allocation225_spill] sm:$0xff] }
 0x3b0   :  { %6791 = vpow2.f32 %v4225_v50  ;;  %v4039_v27 = vmul.f32 1.442695, %v3886_v4  ;;  %v4103_v34 = vmul.f32 1.442695, %v3918_v52  ;;  %v4167_v62 = vmul.f32 1.442695, %v3950_v10 }
 0x3b1   :  { %v4231_v25 = vmul.f32 1.442695, %v3982_v1  ;;  %v3811_v55 = vmax.f32 %v11207_v32, %v3810_v42  ;;  %v3832_v59 = vmax.f32 %v11208_v46, %v3831_v0  ;;  %v4505_v11 = vmul.f32 %v9369_v7, %v11210_v39  ;;  %v11214_v50 = vld [vmem:[#allocation178_spill] sm:$0xff]  ;;  %v11215_v4 = vld [vmem:[#allocation223_spill] sm:$0xff]  ;;  %v11216_v52 = vld [vmem:[#allocation177_spill] sm:$0xff] }
 0x3b2   :  { %6793 = vpow2.f32 %v4039_v27  ;;  %v4506_v3 = vmul.f32 %v11212_v44, %v11211_v13  ;;  %v4537_v14 = vmul.f32 %v11214_v50, %v11213_v6  ;;  %v11217_v10 = vld [vmem:[#allocation238_spill] sm:$0xff]  ;;  %v11219_v27 = vld [vmem:[#allocation181_spill] sm:$0xff] }
 0x3b3   :  { %6795 = vpow2.f32 %v4103_v34  ;;  %v3885_v54 = vsub.f32 %v11215_v4, %v3811_v55  ;;  %v3917_v51 = vsub.f32 %v11216_v52, %v3811_v55  ;;  %v3949_v1 = vsub.f32 %v11217_v10, %v3811_v55  ;;  %v11220_v44 = vld [vmem:[#allocation241_spill] sm:$0xff]  ;;  %v11222_v10 = vld [vmem:[#allocation170_spill] sm:$0xff] }
 0x3b4   :  { %6797 = vpow2.f32 %v4167_v62  ;;  %v3981_v42 = vsub.f32 %v3629_v48, %v3811_v55  ;;  %v3888_v0 = vsub.f32 %v11218_v41, %v3832_v59  ;;  %v3920_v32 = vsub.f32 %v11219_v27, %v3832_v59  ;;  %v9904_v7 = vpop.eup %6781  ;;  %v11221_v55 = vld [vmem:[#allocation95_spill] sm:$0xff]  ;;  %v11225_v27 = vld [vmem:[#allocation173_spill] sm:$0xff] }
 0x3b5   :  { %6799 = vpow2.f32 %v4231_v25  ;;  %v4037_v46 = vmul.f32 1.442695, %v3885_v54  ;;  %v4101_v33 = vmul.f32 1.442695, %v3917_v51  ;;  %v4165_v39 = vmul.f32 1.442695, %v3949_v1  ;;  %v9906_v13 = vpop.eup %6783 }
 0x3b6   :  { %v4229_v34 = vmul.f32 1.442695, %v3981_v42  ;;  %v3952_v6 = vsub.f32 %v11220_v44, %v3832_v59  ;;  %v3984_v50 = vsub.f32 %v3632_v30, %v3832_v59  ;;  %v4043_v4 = vmul.f32 1.442695, %v3888_v0  ;;  %v9909_v52 = vpop.eup %6785  ;;  %v11224_v0 = vld [vmem:[#allocation125_spill] sm:$0xff]  ;;  %v11226_v44 = vld [vmem:[#allocation127_spill] sm:$0xff] }
 0x3b7   :  { %v4399_v48 = vsel %vm2373_vm2, %v9906_v13, 0.0  ;;  %6801 = vpow2.f32 %v4037_v46  ;;  %v4107_v62 = vmul.f32 1.442695, %v3920_v32  ;;  %v4538_v25 = vmul.f32 %v11222_v10, %v11221_v55  ;;  %v9915_v54 = vpop.eup %6787  ;;  %v11227_v55 = vld [vmem:[#allocation201_spill] sm:$0xff] }
 0x3b8   :  { %v4400_v51 = vsel %vm2373_vm2, %v9909_v52, 0.0  ;;  %6803 = vpow2.f32 %v4101_v33  ;;  %v4171_v1 = vmul.f32 1.442695, %v3952_v6  ;;  %v4235_v42 = vmul.f32 1.442695, %v3984_v50 }
 0x3b9   :  { %v9919_v30 = vpop.eup %6789  ;;  %v4401_v59 = vadd.f32 %v4400_v51, %v4399_v48  ;;  %v4402_v41 = vsel %vm2373_vm2, %v9915_v54, 0.0  ;;  %6805 = vpow2.f32 %v4165_v39  ;;  %v4569_v32 = vmul.f32 %v11225_v27, %v11224_v0 }
 0x3ba   :  { %11223 = vst [vmem:[#allocation166_spill] sm:$0xff] %v9919_v30  ;;  %v9925_v46 = vpop.eup %6791  ;;  %6807 = vpow2.f32 %v4229_v34  ;;  %v4570_v10 = vmul.f32 %v11227_v55, %v11226_v44  ;;  %v4625_v33 = vsel %vm2373_vm2, %v4473_v26, 0.0  ;;  %v4626_v6 = vsel %vm2373_vm2, %v4505_v11, 0.0 }
 0x3bb   :  { %v4403_v50 = vadd.f32 %v4402_v41, %v4401_v59  ;;  %v4404_v48 = vsel %vm2373_vm2, %v9925_v46, 0.0  ;;  %6809 = vpow2.f32 %v4043_v4  ;;  %v4627_v51 = vadd.f32 %v4626_v6, %v4625_v33 }
 0x3bc   :  { %v9933_v39 = vpop.eup %6793  ;;  %6811 = vpow2.f32 %v4107_v62  ;;  %v4628_v0 = vsel %vm2373_vm2, %v4537_v14, 0.0  ;;  %v4630_v34 = vsel %vm2373_vm2, %v4569_v32, 0.0  ;;  %v4632_v27 = vsel %vm2373_vm2, %v4474_v5, 0.0 }
 0x3bd   :  { %11228 = vst [vmem:[#allocation230_spill] sm:$0xff] %v9933_v39  ;;  %v9938_v44 = vpop.eup %6795  ;;  %v4405_v26 = vadd.f32 %v4404_v48, %v4403_v50  ;;  %v4420_v11 = vsel %vm2373_vm2, %v9933_v39, 0.0  ;;  %6813 = vpow2.f32 %v4171_v1  ;;  %v4629_v59 = vadd.f32 %v4628_v0, %v4627_v51  ;;  %v11232_v48 = vld [vmem:[#allocation45_spill] sm:$0xff] }
 0x3be   :  { %11229 = vst [vmem:[#allocation24_spill] sm:$0xff] %v9938_v44  ;;  %v9942_v41 = vpop.eup %6797  ;;  %v4421_v4 = vsel %vm2373_vm2, %v9938_v44, 0.0  ;;  %6815 = vpow2.f32 %v4235_v42  ;;  %v4633_v14 = vsel %vm2373_vm2, %v4506_v3, 0.0  ;;  %v4635_v62 = vsel %vm2373_vm2, %v4538_v25, 0.0 }
 0x3bf   :  { %11230 = vst [vmem:[#allocation172_spill] sm:$0xff] %v9942_v41  ;;  %v9948_v32 = vpop.eup %6799  ;;  %6817 = vrcp.f32 %v4405_v26  ;;  %v4422_v5 = vadd.f32 %v4421_v4, %v4420_v11  ;;  %v4423_v55 = vsel %vm2373_vm2, %v9942_v41, 0.0  ;;  %v4631_v33 = vadd.f32 %v4630_v34, %v4629_v59  ;;  %v11234_v26 = vld [vmem:[#allocation47_spill] sm:$0xff]  ;;  %v11236_v4 = vld [vmem:[#allocation49_spill] sm:$0xff] }
 0x3c0   :  { %11231 = vst [vmem:[#allocation235_spill] sm:$0xff] %v9948_v32  ;;  %v4425_v1 = vsel %vm2373_vm2, %v9948_v32, 0.0  ;;  %v4634_v6 = vadd.f32 %v4633_v14, %v4632_v27  ;;  %v4637_v50 = vsel %vm2373_vm2, %v4570_v10, 0.0  ;;  %v3631_v42 = vadd.f32 %v9141_v45, %v11232_v48  ;;  %v11237_v14 = vld [vmem:[#allocation179_spill] sm:$0xff] }
 0x3c1   :  { %v9957_v3 = vpop.eup %6801  ;;  %v4424_v25 = vadd.f32 %v4423_v55, %v4422_v5  ;;  %v4857_v51 = vmul.f32 %v9466_v24, %v4631_v33  ;;  %v3634_v0 = vadd.f32 %v9464_v16, %v9141_v45  ;;  %v9964_v34 = vmul.f32 %v9422_v22, %v11234_v26  ;;  %v11239_v22 = vld [vmem:[#allocation244_spill] sm:$0xff]  ;;  %v11241_v32 = vld [vmem:[#allocation247_spill] sm:$0xff] }
 0x3c2   :  { %11233 = vst [vmem:[#allocation76_spill] sm:$0xff] %v9957_v3  ;;  %v9966_v11 = vpop.eup %6803  ;;  %v4413_v10 = vsel %vm2373_vm2, %v9957_v3, 0.0  ;;  %v4636_v27 = vadd.f32 %v4635_v62, %v4634_v6  ;;  %v3824_v59 = vsel %vm2373_vm2, %v3631_v42, -inf  ;;  %v9973_v5 = vmul.f32 %v11237_v14, %v11236_v4 }
 0x3c3   :  { %11235 = vst [vmem:[#allocation167_spill] sm:$0xff] %v9966_v11  ;;  %v9975_v24 = vpop.eup %6805  ;;  %v4426_v55 = vadd.f32 %v4425_v1, %v4424_v25  ;;  %v4414_v16 = vsel %vm2373_vm2, %v9966_v11, 0.0  ;;  %v3825_v33 = vmax.f32 %v11239_v22, %v3824_v59  ;;  %v3845_v48 = vsel %vm2373_vm2, %v3634_v0, -inf  ;;  %v11243_v25 = vld [vmem:[#allocation226_spill] sm:$0xff]  ;;  %v11244_v59 = vld [vmem:[#allocation183_spill] sm:$0xff] }
 0x3c4   :  { %11238 = vst [vmem:[#allocation218_spill] sm:$0xff] %v9975_v24  ;;  %v9981_v26 = vpop.eup %6807  ;;  %v4415_v30 = vadd.f32 %v4414_v16, %v4413_v10  ;;  %v4416_v62 = vsel %vm2373_vm2, %v9975_v24, 0.0  ;;  %v4638_v6 = vadd.f32 %v4637_v50, %v4636_v27  ;;  %v3846_v4 = vmax.f32 %v11241_v32, %v3845_v48  ;;  %v11246_v16 = vld [vmem:[#allocation205_spill] sm:$0xff]  ;;  %v11247_v27 = vld [vmem:[#allocation242_spill] sm:$0xff] }
 0x3c5   :  { %11240 = vst [vmem:[#allocation169_spill] sm:$0xff] %v9981_v26  ;;  %v9986_v14 = vpop.eup %6809  ;;  %6819 = vrcp.f32 %v4426_v55  ;;  %v4418_v1 = vsel %vm2373_vm2, %v9981_v26, 0.0  ;;  %v3887_v41 = vsub.f32 %v11243_v25, %v3825_v33  ;;  %v3919_v22 = vsub.f32 %v11244_v59, %v3825_v33 }
 0x3c6   :  { %11242 = vst [vmem:[#allocation233_spill] sm:$0xff] %v9986_v14  ;;  %v9992_v44 = vpop.eup %6811  ;;  %v4417_v11 = vadd.f32 %v4416_v62, %v4415_v30  ;;  %v4434_v10 = vsel %vm2373_vm2, %v9986_v14, 0.0  ;;  %v4858_v50 = vmul.f32 %v11246_v16, %v4638_v6  ;;  %v3951_v32 = vsub.f32 %v11247_v27, %v3825_v33 }
 0x3c7   :  { %11245 = vst [vmem:[#allocation89_spill] sm:$0xff] %v9992_v44  ;;  %v9998_v48 = vpop.eup %6813  ;;  %v4435_v55 = vsel %vm2373_vm2, %v9992_v44, 0.0  ;;  %v3983_v26 = vsub.f32 %v3631_v42, %v3825_v33  ;;  %v4041_v24 = vmul.f32 1.442695, %v3887_v41  ;;  %v4105_v25 = vmul.f32 1.442695, %v3919_v22 }
 0x3c8   :  { %11248 = vst [vmem:[#allocation168_spill] sm:$0xff] %v9998_v48  ;;  %v10002_v39 = vpop.eup %6815  ;;  %v4419_v59 = vadd.f32 %v4418_v1, %v4417_v11  ;;  %v4436_v3 = vadd.f32 %v4435_v55, %v4434_v10  ;;  %v4437_v30 = vsel %vm2373_vm2, %v9998_v48, 0.0  ;;  %v4887_v62 = vpack.c.bf16 %v4858_v50, %v4857_v51  ;;  %v11250_v41 = vld [vmem:[#allocation227_spill] sm:$0xff]  ;;  %v11251_v11 = vld [vmem:[#allocation186_spill] sm:$0xff]  ;;  %v11252_v22 = vld [vmem:[#allocation245_spill] sm:$0xff] }
 0x3c9   :  { %11249 = vst [vmem:[#allocation91_spill] sm:$0xff] %v10002_v39  ;;  %v10006_v14 = vpop.eup %6817  ;;  %v4439_v6 = vsel %vm2373_vm2, %v10002_v39, 0.0  ;;  %6821 = vpow2.f32 %v4041_v24  ;;  %v4169_v16 = vmul.f32 1.442695, %v3951_v32  ;;  %v4233_v27 = vmul.f32 1.442695, %v3983_v26 }
 0x3ca   :  { %6823 = vrcp.f32 %v4419_v59  ;;  %v4438_v42 = vadd.f32 %v4437_v30, %v4436_v3  ;;  %6400 = vmatprep.mubr.msk.bf16.mxu0 %vm2373_vm2, %v4887_v62  ;;  %v3890_v33 = vsub.f32 %v11250_v41, %v3846_v4  ;;  %v3922_v1 = vsub.f32 %v11251_v11, %v3846_v4  ;;  %v11253_v50 = vld [vmem:[#allocation28_spill] sm:$0xff]  ;;  %v11254_v55 = vld [vmem:[#allocation122_spill] sm:$0xff]  ;;  %v11255_v59 = vld [vmem:[#allocation27_spill] sm:$0xff] }
 0x3cb   :  { %6825 = vpow2.f32 %v4105_v25  ;;  %v3954_v10 = vsub.f32 %v11252_v22, %v3846_v4  ;;  %v3986_v51 = vsub.f32 %v3634_v0, %v3846_v4  ;;  %v4507_v48 = vmul.f32 %v11254_v55, %v11253_v50  ;;  %v11256_v30 = vld [vmem:[#allocation175_spill] sm:$0xff]  ;;  %v11257_v41 = vld [vmem:[#allocation92_spill] sm:$0xff]  ;;  %v11258_v11 = vld [vmem:[#allocation94_spill] sm:$0xff] }
 0x3cc   :  { %v4440_v44 = vadd.f32 %v4439_v6, %v4438_v42  ;;  %6827 = vpow2.f32 %v4169_v16  ;;  %v4047_v24 = vmul.f32 1.442695, %v3890_v33  ;;  %v4111_v32 = vmul.f32 1.442695, %v3922_v1  ;;  %v11259_v22 = vld [vmem:[#allocation26_spill] sm:$0xff]  ;;  %v11260_v4 = vld [vmem:[#allocation124_spill] sm:$0xff] }
 0x3cd   :  { %6829 = vpow2.f32 %v4233_v27  ;;  %v4175_v26 = vmul.f32 1.442695, %v3954_v10  ;;  %v4239_v3 = vmul.f32 1.442695, %v3986_v51  ;;  %v4508_v62 = vmul.f32 %v11256_v30, %v11255_v59  ;;  %v11262_v16 = vld [vmem:[#allocation126_spill] sm:$0xff]  ;;  %v11264_v30 = vld [vmem:[#allocation52_spill] sm:$0xff] }
 0x3ce   :  { %6831 = vrcp.f32 %v4440_v44  ;;  %v4539_v25 = vmul.f32 %v9432_v23, %v11257_v41  ;;  %v4540_v0 = vmul.f32 %v11259_v22, %v11258_v11  ;;  %v4571_v50 = vmul.f32 %v9437_v8, %v11260_v4  ;;  %v11263_v27 = vld [vmem:[#allocation90_spill] sm:$0xff]  ;;  %v11265_v41 = vld [vmem:[#allocation184_spill] sm:$0xff] }
 0x3cf   :  { %v10024_v6 = vpop.eup %6819  ;;  %6833 = vpow2.f32 %v4047_v24  ;;  %v4572_v42 = vmul.f32 %v11263_v27, %v11262_v16  ;;  %v4639_v33 = vsel %vm2373_vm2, %v9964_v34, 0.0  ;;  %v4640_v44 = vsel %vm2373_vm2, %v4507_v48, 0.0  ;;  %v11287_v39 = vld [vmem:[#allocation246_spill] sm:$0xff] }
 0x3d0   :  { %11261 = vst [vmem:[#allocation164_spill] sm:$0xff] %v10024_v6  ;;  %6835 = vpow2.f32 %v4111_v32  ;;  %v4641_v1 = vadd.f32 %v4640_v44, %v4639_v33  ;;  %v4642_v23 = vsel %vm2373_vm2, %v4539_v25, 0.0  ;;  %v4644_v10 = vsel %vm2373_vm2, %v4571_v50, 0.0  ;;  %v11267_v25 = vld [vmem:[#allocation43_spill] sm:$0xff]  ;;  %v11269_v50 = vld [vmem:[#allocation29_spill] sm:$0xff]  ;;  %v11272_v33 = vld [vmem:[#allocation34_spill] sm:$0xff] }
 0x3d1   :  { %6837 = vpow2.f32 %v4175_v26  ;;  %v4646_v8 = vsel %vm2373_vm2, %v9973_v5, 0.0  ;;  %v4647_v51 = vsel %vm2373_vm2, %v4508_v62, 0.0  ;;  %v4649_v55 = vsel %vm2373_vm2, %v4540_v0, 0.0  ;;  %v11266_v62 = vld [vmem:[#allocation54_spill] sm:$0xff]  ;;  %v11273_v44 = vld [vmem:[#allocation75_spill] sm:$0xff] }
 0x3d2   :  { %6839 = vpow2.f32 %v4239_v3  ;;  %v4643_v24 = vadd.f32 %v4642_v23, %v4641_v1  ;;  %v4648_v59 = vadd.f32 %v4647_v51, %v4646_v8  ;;  %v4651_v34 = vsel %vm2373_vm2, %v4572_v42, 0.0  ;;  %v11274_v23 = vld [vmem:[#allocation97_spill] sm:$0xff]  ;;  %v11275_v8 = vld [vmem:[#allocation208_spill] sm:$0xff] }
 0x3d3   :  { %v10038_v48 = vpop.eup %6821  ;;  %v3633_v32 = vadd.f32 %v9141_v45, %v9508_v56  ;;  %v3636_v26 = vadd.f32 %v9555_v61, %v9141_v45  ;;  %v10046_v5 = vmul.f32 %v11265_v41, %v11264_v30  ;;  %v10050_v11 = vmul.f32 %v11267_v25, %v11266_v62  ;;  %v11270_v56 = vld [vmem:[#allocation180_spill] sm:$0xff] }
 0x3d4   :  { %v10052_v3 = vpop.eup %6823  ;;  %v4427_v22 = vsel %vm2373_vm2, %v10038_v48, 0.0  ;;  %v4645_v0 = vadd.f32 %v4644_v10, %v4643_v24  ;;  %v4650_v4 = vadd.f32 %v4649_v55, %v4648_v59  ;;  %v4509_v16 = vmul.f32 %v11270_v56, %v11269_v50  ;;  %v11277_v59 = vld [vmem:[#allocation248_spill] sm:$0xff]  ;;  %v11279_v56 = vld [vmem:[#allocation251_spill] sm:$0xff] }
 0x3d5   :  { %11268 = vst [vmem:[#allocation121_spill] sm:$0xff] %v10052_v3  ;;  %v10058_v27 = vpop.eup %6825  ;;  %v3838_v61 = vsel %vm2373_vm2, %v3633_v32, -inf  ;;  %v3859_v42 = vsel %vm2373_vm2, %v3636_v26, -inf  ;;  %v4510_v1 = vmul.f32 %v11273_v44, %v11272_v33  ;;  %v4541_v51 = vmul.f32 %v11275_v8, %v11274_v23  ;;  %v11280_v44 = vld [vmem:[#allocation99_spill] sm:$0xff]  ;;  %v11281_v23 = vld [vmem:[#allocation88_spill] sm:$0xff] }
 0x3d6   :  { %11271 = vst [vmem:[#allocation200_spill] sm:$0xff] %v10058_v27  ;;  %v10066_v30 = vpop.eup %6827  ;;  %v4428_v10 = vsel %vm2373_vm2, %v10058_v27, 0.0  ;;  %v4652_v55 = vadd.f32 %v4651_v34, %v4650_v4  ;;  %v4859_v24 = vmul.f32 %v9514_v47, %v4645_v0  ;;  %v3839_v41 = vmax.f32 %v11277_v59, %v3838_v61  ;;  %v11283_v4 = vld [vmem:[#allocation209_spill] sm:$0xff]  ;;  %v11284_v0 = vld [vmem:[#allocation228_spill] sm:$0xff]  ;;  %v11285_v59 = vld [vmem:[#allocation187_spill] sm:$0xff] }
 0x3d7   :  { %11276 = vst [vmem:[#allocation123_spill] sm:$0xff] %v10066_v30  ;;  %v10072_v62 = vpop.eup %6829  ;;  %v4429_v25 = vadd.f32 %v4428_v10, %v4427_v22  ;;  %v4430_v50 = vsel %vm2373_vm2, %v10066_v30, 0.0  ;;  %v3860_v33 = vmax.f32 %v11279_v56, %v3859_v42  ;;  %v4542_v8 = vmul.f32 %v11281_v23, %v11280_v44  ;;  %v11288_v56 = vld [vmem:[#allocation188_spill] sm:$0xff] }
 0x3d8   :  { %11278 = vst [vmem:[#allocation197_spill] sm:$0xff] %v10072_v62  ;;  %v10079_v6 = vpop.eup %6831  ;;  %v4432_v34 = vsel %vm2373_vm2, %v10072_v62, 0.0  ;;  %v4860_v47 = vmul.f32 %v11283_v4, %v4652_v55  ;;  %v3889_v61 = vsub.f32 %v11284_v0, %v3839_v41  ;;  %v3921_v3 = vsub.f32 %v11285_v59, %v3839_v41 }
 0x3d9   :  { %11282 = vst [vmem:[#allocation236_spill] sm:$0xff] %v10079_v6  ;;  %v10086_v22 = vpop.eup %6833  ;;  %v4431_v10 = vadd.f32 %v4430_v50, %v4429_v25  ;;  %v3953_v30 = vsub.f32 %v11287_v39, %v3839_v41  ;;  %v3985_v42 = vsub.f32 %v3633_v32, %v3839_v41  ;;  %v3892_v27 = vsub.f32 %v11288_v56, %v3860_v33 }
 0x3da   :  { %11286 = vst [vmem:[#allocation219_spill] sm:$0xff] %v10086_v22  ;;  %v10090_v44 = vpop.eup %6835  ;;  %v4448_v23 = vsel %vm2373_vm2, %v10086_v22, 0.0  ;;  %v4888_v6 = vpack.c.bf16 %v4860_v47, %v4859_v24  ;;  %v4045_v62 = vmul.f32 1.442695, %v3889_v61  ;;  %v4109_v55 = vmul.f32 1.442695, %v3921_v3 }
 0x3db   :  { %11289 = vst [vmem:[#allocation171_spill] sm:$0xff] %v10090_v44  ;;  %v10094_v4 = vpop.eup %6837  ;;  %v4433_v0 = vadd.f32 %v4432_v34, %v4431_v10  ;;  %v4449_v59 = vsel %vm2373_vm2, %v10090_v44, 0.0  ;;  %v4173_v25 = vmul.f32 1.442695, %v3953_v30  ;;  %v4237_v50 = vmul.f32 1.442695, %v3985_v42 }
 0x3dc   :  { %11290 = vst [vmem:[#allocation234_spill] sm:$0xff] %v10094_v4  ;;  %v10098_v39 = vpop.eup %6839  ;;  %v4450_v32 = vadd.f32 %v4449_v59, %v4448_v23  ;;  %v4451_v41 = vsel %vm2373_vm2, %v10094_v4, 0.0  ;;  %6401 = vmatmul.mubr.msk.bf16.gmra.mrb[196].mxu0 %vm2373_vm2, %v4888_v6  ;;  %6841 = vpow2.f32 %v4045_v62  ;;  %v11292_v24 = vld [vmem:[#allocation192_spill] sm:$0xff]  ;;  %v11293_v34 = vld [vmem:[#allocation249_spill] sm:$0xff]  ;;  %v3988_v10 = vsub.f32 %v3636_v26, %v3860_v33 }
 0x3dd   :  { %11291 = vst [vmem:[#allocation239_spill] sm:$0xff] %v10098_v39  ;;  %v3924_v47 = vsub.f32 %v11292_v24, %v3860_v33  ;;  %6843 = vrcp.f32 %v4433_v0  ;;  %v4453_v3 = vsel %vm2373_vm2, %v10098_v39, 0.0  ;;  %v3956_v61 = vsub.f32 %v11293_v34, %v3860_v33  ;;  %v11294_v4 = vld [vmem:[#allocation129_spill] sm:$0xff]  ;;  %v11296_v24 = vld [vmem:[#allocation131_spill] sm:$0xff]  ;;  %v11297_v0 = vld [vmem:[#allocation120_spill] sm:$0xff] }
 0x3de   :  { %v4452_v30 = vadd.f32 %v4451_v41, %v4450_v32  ;;  %6845 = vpow2.f32 %v4109_v55  ;;  %v4051_v42 = vmul.f32 1.442695, %v3892_v27  ;;  %v4243_v59 = vmul.f32 1.442695, %v3988_v10  ;;  %v11295_v44 = vld [vmem:[#allocation185_spill] sm:$0xff]  ;;  %v11299_v41 = vld [vmem:[#allocation191_spill] sm:$0xff] }
 0x3df   :  { %v4115_v56 = vmul.f32 1.442695, %v3924_v47  ;;  %6847 = vpow2.f32 %v4173_v25  ;;  %v4179_v23 = vmul.f32 1.442695, %v3956_v61  ;;  %v4573_v6 = vmul.f32 %v11295_v44, %v11294_v4  ;;  %v11303_v61 = vld [vmem:[#allocation213_spill] sm:$0xff] }
 0x3e0   :  { %v4454_v62 = vadd.f32 %v4453_v3, %v4452_v30  ;;  %6849 = vpow2.f32 %v4237_v50  ;;  %v4574_v22 = vmul.f32 %v11297_v0, %v11296_v24  ;;  %v4653_v39 = vsel %vm2373_vm2, %v10046_v5, 0.0  ;;  %v11300_v3 = vld [vmem:[#allocation53_spill] sm:$0xff]  ;;  %v11308_v0 = vld [vmem:[#allocation252_spill] sm:$0xff] }
 0x3e1   :  { %6851 = vpow2.f32 %v4051_v42  ;;  %v4654_v26 = vsel %vm2373_vm2, %v4509_v16, 0.0  ;;  %v4656_v27 = vsel %vm2373_vm2, %v4541_v51, 0.0  ;;  %v4658_v33 = vsel %vm2373_vm2, %v4573_v6, 0.0  ;;  %v11298_v51 = vld [vmem:[#allocation51_spill] sm:$0xff] }
 0x3e2   :  { %6853 = vrcp.f32 %v4454_v62  ;;  %v4655_v55 = vadd.f32 %v4654_v26, %v4653_v39  ;;  %v4660_v44 = vsel %vm2373_vm2, %v10050_v11, 0.0  ;;  %v4661_v4 = vsel %vm2373_vm2, %v4510_v1, 0.0  ;;  %v11301_v11 = vld [vmem:[#allocation182_spill] sm:$0xff]  ;;  %v11302_v1 = vld [vmem:[#allocation32_spill] sm:$0xff]  ;;  %v11304_v42 = vld [vmem:[#allocation31_spill] sm:$0xff] }
 0x3e3   :  { %6855 = vpow2.f32 %v4115_v56  ;;  %v4662_v25 = vadd.f32 %v4661_v4, %v4660_v44  ;;  %v4663_v50 = vsel %vm2373_vm2, %v4542_v8, 0.0  ;;  %v4665_v5 = vsel %vm2373_vm2, %v4574_v22, 0.0  ;;  %v11305_v56 = vld [vmem:[#allocation189_spill] sm:$0xff] }
 0x3e4   :  { %6857 = vpow2.f32 %v4179_v23  ;;  %v4657_v32 = vadd.f32 %v4656_v27, %v4655_v55  ;;  %v3635_v16 = vadd.f32 %v9141_v45, %v9606_v57  ;;  %v4479_v47 = vmul.f32 %v11299_v41, %v11298_v51  ;;  %v11306_v45 = vld [vmem:[#allocation96_spill] sm:$0xff]  ;;  %v11307_v57 = vld [vmem:[#allocation194_spill] sm:$0xff] }
 0x3e5   :  { %6859 = vpow2.f32 %v4243_v59  ;;  %v4664_v39 = vadd.f32 %v4663_v50, %v4662_v25  ;;  %v4480_v34 = vmul.f32 %v11301_v11, %v11300_v3  ;;  %v4511_v10 = vmul.f32 %v11303_v61, %v11302_v1  ;;  %v11309_v27 = vld [vmem:[#allocation98_spill] sm:$0xff]  ;;  %v11310_v55 = vld [vmem:[#allocation140_spill] sm:$0xff]  ;;  %v11312_v50 = vld [vmem:[#allocation145_spill] sm:$0xff] }
 0x3e6   :  { %v10129_v30 = vpop.eup %6841  ;;  %v4659_v8 = vadd.f32 %v4658_v33, %v4657_v32  ;;  %v3852_v22 = vsel %vm2373_vm2, %v3635_v16, -inf  ;;  %v4512_v23 = vmul.f32 %v11305_v56, %v11304_v42  ;;  %v4543_v6 = vmul.f32 %v11307_v57, %v11306_v45  ;;  %v11311_v25 = vld [vmem:[#allocation128_spill] sm:$0xff]  ;;  %v11313_v51 = vld [vmem:[#allocation130_spill] sm:$0xff]  ;;  %v11317_v56 = vld [vmem:[#allocation193_spill] sm:$0xff] }
 0x3e7   :  { %v10136_v62 = vpop.eup %6843  ;;  %v4441_v59 = vsel %vm2373_vm2, %v10129_v30, 0.0  ;;  %v4666_v24 = vadd.f32 %v4665_v5, %v4664_v39  ;;  %v3853_v26 = vmax.f32 %v11308_v0, %v3852_v22  ;;  %v4544_v44 = vmul.f32 %v11310_v55, %v11309_v27  ;;  %v11314_v41 = vld [vmem:[#allocation212_spill] sm:$0xff]  ;;  %v11315_v39 = vld [vmem:[#allocation141_spill] sm:$0xff]  ;;  %v11316_v22 = vld [vmem:[#allocation190_spill] sm:$0xff] }
 0x3e8   :  { %v10143_v33 = vpop.eup %6845  ;;  %v4861_v4 = vmul.f32 %v9564_v49, %v4659_v8  ;;  %v4575_v32 = vmul.f32 %v11312_v50, %v11311_v25  ;;  %v4576_v3 = vmul.f32 %v11314_v41, %v11313_v51  ;;  %v4667_v11 = vsel %vm2373_vm2, %v4479_v47, 0.0  ;;  %v11318_v0 = vld [vmem:[#allocation250_spill] sm:$0xff] }
 0x3e9   :  { %v10151_v1 = vpop.eup %6847  ;;  %v4442_v5 = vsel %vm2373_vm2, %v10143_v33, 0.0  ;;  %v4862_v61 = vmul.f32 %v11315_v39, %v4666_v24  ;;  %v3891_v42 = vsub.f32 %v11316_v22, %v3853_v26  ;;  %v3923_v45 = vsub.f32 %v11317_v56, %v3853_v26 }
 0x3ea   :  { %v10158_v49 = vpop.eup %6849  ;;  %v4443_v8 = vadd.f32 %v4442_v5, %v4441_v59  ;;  %v4444_v57 = vsel %vm2373_vm2, %v10151_v1, 0.0  ;;  %v3955_v27 = vsub.f32 %v11318_v0, %v3853_v26  ;;  %v3987_v47 = vsub.f32 %v3635_v16, %v3853_v26 }
 0x3eb   :  { %v10163_v55 = vpop.eup %6851  ;;  %v4446_v25 = vsel %vm2373_vm2, %v10158_v49, 0.0  ;;  %v4889_v50 = vpack.c.bf16 %v4862_v61, %v4861_v4  ;;  %v4049_v24 = vmul.f32 1.442695, %v3891_v42  ;;  %v4113_v51 = vmul.f32 1.442695, %v3923_v45 }
 0x3ec   :  { %v10167_v41 = vpop.eup %6853  ;;  %v4445_v39 = vadd.f32 %v4444_v57, %v4443_v8  ;;  %v4462_v59 = vsel %vm2373_vm2, %v10163_v55, 0.0  ;;  %v4177_v5 = vmul.f32 1.442695, %v3955_v27  ;;  %v4241_v22 = vmul.f32 1.442695, %v3987_v47 }
 0x3ed   :  { %v10171_v56 = vpop.eup %6855  ;;  %6404 = vmatprep.mubr.msk.bf16.mxu0 %vm2373_vm2, %v4889_v50  ;;  %6861 = vpow2.f32 %v4049_v24  ;;  %v4668_v16 = vsel %vm2373_vm2, %v4511_v10, 0.0  ;;  %v4670_v26 = vsel %vm2373_vm2, %v4543_v6, 0.0  ;;  %v4672_v4 = vsel %vm2373_vm2, %v4575_v32, 0.0 }
 0x3ee   :  { %v10177_v61 = vpop.eup %6857  ;;  %v4447_v42 = vadd.f32 %v4446_v25, %v4445_v39  ;;  %v4463_v45 = vsel %vm2373_vm2, %v10171_v56, 0.0  ;;  %6863 = vpow2.f32 %v4113_v51  ;;  %v4669_v8 = vadd.f32 %v4668_v16, %v4667_v11  ;;  %v11319_v39 = vld [vmem:[#allocation56_spill] sm:$0xff] }
 0x3ef   :  { %v10181_v57 = vpop.eup %6859  ;;  %v4464_v0 = vadd.f32 %v4463_v45, %v4462_v59  ;;  %v4465_v27 = vsel %vm2373_vm2, %v10177_v61, 0.0  ;;  %6865 = vpow2.f32 %v4177_v5  ;;  %v4674_v10 = vsel %vm2373_vm2, %v4480_v34, 0.0  ;;  %v11320_v5 = vld [vmem:[#allocation58_spill] sm:$0xff]  ;;  %v11321_v45 = vld [vmem:[#allocation33_spill] sm:$0xff] }
 0x3f0   :  { %6867 = vrcp.f32 %v4447_v42  ;;  %v4467_v6 = vsel %vm2373_vm2, %v10181_v57, 0.0  ;;  %v4671_v32 = vadd.f32 %v4670_v26, %v4669_v8  ;;  %v4675_v47 = vsel %vm2373_vm2, %v4512_v23, 0.0  ;;  %v11322_v23 = vld [vmem:[#allocation38_spill] sm:$0xff] }
 0x3f1   :  { %v4466_v25 = vadd.f32 %v4465_v27, %v4464_v0  ;;  %6869 = vpow2.f32 %v4241_v22  ;;  %v4676_v50 = vadd.f32 %v4675_v47, %v4674_v10  ;;  %v4677_v11 = vsel %vm2373_vm2, %v4544_v44, 0.0  ;;  %v11323_v44 = vld [vmem:[#allocation101_spill] sm:$0xff]  ;;  %v11326_v27 = vld [vmem:[#allocation147_spill] sm:$0xff] }
 0x3f2   :  { %v4673_v24 = vadd.f32 %v4672_v4, %v4671_v32  ;;  %v4679_v51 = vsel %vm2373_vm2, %v4576_v3, 0.0  ;;  %v4481_v59 = vmul.f32 %v9580_v17, %v11319_v39  ;;  %v4482_v34 = vmul.f32 %v9561_v40, %v11320_v5  ;;  %v11324_v3 = vld [vmem:[#allocation103_spill] sm:$0xff]  ;;  %v11325_v17 = vld [vmem:[#allocation133_spill] sm:$0xff]  ;;  %v11328_v32 = vld [vmem:[#allocation216_spill] sm:$0xff] }
 0x3f3   :  { %v4468_v16 = vadd.f32 %v4467_v6, %v4466_v25  ;;  %v4678_v42 = vadd.f32 %v4677_v11, %v4676_v50  ;;  %v4513_v26 = vmul.f32 %v9589_v20, %v11321_v45  ;;  %v4514_v22 = vmul.f32 %v9569_v53, %v11322_v23  ;;  %v11327_v6 = vld [vmem:[#allocation135_spill] sm:$0xff] }
 0x3f4   :  { %v4863_v8 = vmul.f32 %v9627_v2, %v4673_v24  ;;  %v4545_v4 = vmul.f32 %v9601_v28, %v11323_v44  ;;  %v4546_v0 = vmul.f32 %v9572_v43, %v11324_v3  ;;  %v4577_v10 = vmul.f32 %v11326_v27, %v11325_v17  ;;  %v11329_v43 = vld [vmem:[#allocation195_spill] sm:$0xff] }
 0x3f5   :  { %6871 = vrcp.f32 %v4468_v16  ;;  %v4680_v40 = vadd.f32 %v4679_v51, %v4678_v42  ;;  %v4578_v47 = vmul.f32 %v11328_v32, %v11327_v6  ;;  %v4681_v20 = vsel %vm2373_vm2, %v4481_v59, 0.0  ;;  %v11330_v45 = vld [vmem:[#allocation55_spill] sm:$0xff] }
 0x3f6   :  { %v4682_v53 = vsel %vm2373_vm2, %v4513_v26, 0.0  ;;  %v4684_v2 = vsel %vm2373_vm2, %v4545_v4, 0.0  ;;  %v4686_v25 = vsel %vm2373_vm2, %v4577_v10, 0.0  ;;  %v4688_v28 = vsel %vm2373_vm2, %v4482_v34, 0.0  ;;  %v11331_v4 = vld [vmem:[#allocation57_spill] sm:$0xff] }
 0x3f7   :  { %v10213_v50 = vpop.eup %6861  ;;  %v4864_v11 = vmul.f32 %v11329_v43, %v4680_v40  ;;  %v4683_v24 = vadd.f32 %v4682_v53, %v4681_v20  ;;  %v4689_v51 = vsel %vm2373_vm2, %v4514_v22, 0.0  ;;  %v4691_v39 = vsel %vm2373_vm2, %v4546_v0, 0.0  ;;  %v11332_v40 = vld [vmem:[#allocation36_spill] sm:$0xff]  ;;  %v11335_v53 = vld [vmem:[#allocation102_spill] sm:$0xff] }
 0x3f8   :  { %v10218_v5 = vpop.eup %6863  ;;  %v4455_v59 = vsel %vm2373_vm2, %v10213_v50, 0.0  ;;  %v4690_v16 = vadd.f32 %v4689_v51, %v4688_v28  ;;  %v4693_v42 = vsel %vm2373_vm2, %v4578_v47, 0.0  ;;  %v4483_v34 = vmul.f32 %v9641_v21, %v11330_v45  ;;  %v11334_v20 = vld [vmem:[#allocation100_spill] sm:$0xff] }
 0x3f9   :  { %v10225_v26 = vpop.eup %6865  ;;  %v4456_v23 = vsel %vm2373_vm2, %v10218_v5, 0.0  ;;  %v4890_v44 = vpack.c.bf16 %v4864_v11, %v4863_v8  ;;  %v4685_v22 = vadd.f32 %v4684_v2, %v4683_v24  ;;  %v4484_v3 = vmul.f32 %v9617_v15, %v11331_v4  ;;  %v11333_v8 = vld [vmem:[#allocation35_spill] sm:$0xff]  ;;  %v11337_v24 = vld [vmem:[#allocation148_spill] sm:$0xff] }
 0x3fa   :  { %v10231_v0 = vpop.eup %6867  ;;  %v4457_v17 = vadd.f32 %v4456_v23, %v4455_v59  ;;  %v4458_v27 = vsel %vm2373_vm2, %v10225_v26, 0.0  ;;  %v4692_v10 = vadd.f32 %v4691_v39, %v4690_v16  ;;  %v4515_v21 = vmul.f32 %v9645_v38, %v11332_v40  ;;  %v11336_v38 = vld [vmem:[#allocation132_spill] sm:$0xff]  ;;  %v11338_v39 = vld [vmem:[#allocation149_spill] sm:$0xff] }
 0x3fb   :  { %v10237_v6 = vpop.eup %6869  ;;  %6405 = vmatmul.mubr.msk.bf16.gmra.mrb[200].mxu0 %vm2373_vm2, %v4890_v44  ;;  %v4687_v32 = vadd.f32 %v4686_v25, %v4685_v22  ;;  %v4516_v47 = vmul.f32 %v9622_v36, %v11333_v8  ;;  %v4547_v15 = vmul.f32 %v9650_v12, %v11334_v20  ;;  %v4548_v2 = vmul.f32 %v9633_v18, %v11335_v53  ;;  %v11339_v25 = vld [vmem:[#allocation134_spill] sm:$0xff]  ;;  %v11340_v16 = vld [vmem:[#allocation217_spill] sm:$0xff]  ;;  %v11342_v20 = vld [vmem:[#allocation60_spill] sm:$0xff] }
 0x3fc   :  { %v4459_v28 = vadd.f32 %v4458_v27, %v4457_v17  ;;  %v4460_v43 = vsel %vm2373_vm2, %v10237_v6, 0.0  ;;  %v4694_v11 = vadd.f32 %v4693_v42, %v4692_v10  ;;  %v4579_v51 = vmul.f32 %v11337_v24, %v11336_v38  ;;  %v11341_v44 = vld [vmem:[#allocation198_spill] sm:$0xff]  ;;  %v11343_v53 = vld [vmem:[#allocation153_spill] sm:$0xff]  ;;  %v11347_v24 = vld [vmem:[#allocation224_spill] sm:$0xff] }
 0x3fd   :  { %v4865_v59 = vmul.f32 %v11338_v39, %v4687_v32  ;;  %v4580_v45 = vmul.f32 %v11340_v16, %v11339_v25  ;;  %v4695_v36 = vsel %vm2373_vm2, %v4483_v34, 0.0  ;;  %v4696_v12 = vsel %vm2373_vm2, %v4515_v21, 0.0  ;;  %v11346_v38 = vld [vmem:[#allocation37_spill] sm:$0xff]  ;;  %v11349_v39 = vld [vmem:[#allocation199_spill] sm:$0xff] }
 0x3fe   :  { %v4461_v23 = vadd.f32 %v4460_v43, %v4459_v28  ;;  %v4866_v18 = vmul.f32 %v11341_v44, %v4694_v11  ;;  %v4697_v22 = vadd.f32 %v4696_v12, %v4695_v36  ;;  %v4698_v4 = vsel %vm2373_vm2, %v4547_v15, 0.0  ;;  %v11344_v15 = vld [vmem:[#allocation62_spill] sm:$0xff]  ;;  %v11345_v43 = vld [vmem:[#allocation220_spill] sm:$0xff]  ;;  %v11350_v25 = vld [vmem:[#allocation105_spill] sm:$0xff] }
 0x3ff   :  { %v10257_v17 = vpop.eup %6871  ;;  %v4700_v42 = vsel %vm2373_vm2, %v4579_v51, 0.0  ;;  %v4702_v27 = vsel %vm2373_vm2, %v4484_v3, 0.0  ;;  %v4703_v10 = vsel %vm2373_vm2, %v4516_v47, 0.0  ;;  %v4705_v40 = vsel %vm2373_vm2, %v4548_v2, 0.0  ;;  %v11348_v2 = vld [vmem:[#allocation41_spill] sm:$0xff]  ;;  %v11351_v16 = vld [vmem:[#allocation203_spill] sm:$0xff] }
 0x400   :  { %6873 = vrcp.f32 %v4461_v23  ;;  %v4891_v34 = vpack.c.bf16 %v4866_v18, %v4865_v59  ;;  %v4699_v32 = vadd.f32 %v4698_v4, %v4697_v22  ;;  %v4704_v21 = vadd.f32 %v4703_v10, %v4702_v27  ;;  %v11353_v12 = vld [vmem:[#allocation221_spill] sm:$0xff]  ;;  %v11355_v18 = vld [vmem:[#allocation206_spill] sm:$0xff]  ;;  %v11356_v4 = vld [vmem:[#allocation139_spill] sm:$0xff] }
 0x401   :  { %v4707_v8 = vsel %vm2373_vm2, %v4580_v45, 0.0  ;;  %v4485_v28 = vmul.f32 %v11343_v53, %v11342_v20  ;;  %v4486_v11 = vmul.f32 %v11345_v43, %v11344_v15  ;;  %v4517_v51 = vmul.f32 %v11347_v24, %v11346_v38  ;;  %v11352_v45 = vld [vmem:[#allocation107_spill] sm:$0xff]  ;;  %v11354_v44 = vld [vmem:[#allocation137_spill] sm:$0xff]  ;;  %v11357_v27 = vld [vmem:[#allocation202_spill] sm:$0xff] }
 0x402   :  { %6408 = vmatprep.mubr.msk.bf16.mxu0 %vm2373_vm2, %v4891_v34  ;;  %v4701_v3 = vadd.f32 %v4700_v42, %v4699_v32  ;;  %v4706_v47 = vadd.f32 %v4705_v40, %v4704_v21  ;;  %v4518_v59 = vmul.f32 %v11349_v39, %v11348_v2  ;;  %v4549_v36 = vmul.f32 %v11351_v16, %v11350_v25  ;;  %v11358_v42 = vld [vmem:[#allocation210_spill] sm:$0xff]  ;;  %v11359_v24 = vld [vmem:[#allocation155_spill] sm:$0xff]  ;;  %v11362_v16 = vld [vmem:[#allocation61_spill] sm:$0xff] }
 0x403   :  { %v4550_v23 = vmul.f32 %v11353_v12, %v11352_v45  ;;  %v4581_v22 = vmul.f32 %v11355_v18, %v11354_v44  ;;  %v4582_v10 = vmul.f32 %v11357_v27, %v11356_v4  ;;  %v4709_v20 = vsel %vm2373_vm2, %v4485_v28, 0.0  ;;  %v11364_v12 = vld [vmem:[#allocation40_spill] sm:$0xff] }
 0x404   :  { %v4708_v34 = vadd.f32 %v4707_v8, %v4706_v47  ;;  %v4867_v40 = vmul.f32 %v11358_v42, %v4701_v3  ;;  %v4710_v32 = vsel %vm2373_vm2, %v4517_v51, 0.0  ;;  %v4712_v21 = vsel %vm2373_vm2, %v4549_v36, 0.0  ;;  %v11360_v3 = vld [vmem:[#allocation59_spill] sm:$0xff]  ;;  %v11363_v36 = vld [vmem:[#allocation156_spill] sm:$0xff]  ;;  %v11370_v42 = vld [vmem:[#allocation157_spill] sm:$0xff] }
 0x405   :  { %v4711_v53 = vadd.f32 %v4710_v32, %v4709_v20  ;;  %v4714_v15 = vsel %vm2373_vm2, %v4581_v22, 0.0  ;;  %v4716_v43 = vsel %vm2373_vm2, %v4486_v11, 0.0  ;;  %v4717_v38 = vsel %vm2373_vm2, %v4518_v59, 0.0  ;;  %v11361_v47 = vld [vmem:[#allocation211_spill] sm:$0xff]  ;;  %v11367_v27 = vld [vmem:[#allocation104_spill] sm:$0xff] }
 0x406   :  { %v4868_v2 = vmul.f32 %v11359_v24, %v4708_v34  ;;  %v4718_v39 = vadd.f32 %v4717_v38, %v4716_v43  ;;  %v4719_v25 = vsel %vm2373_vm2, %v4550_v23, 0.0  ;;  %v4721_v8 = vsel %vm2373_vm2, %v4582_v10, 0.0  ;;  %v11365_v59 = vld [vmem:[#allocation39_spill] sm:$0xff]  ;;  %v11369_v10 = vld [vmem:[#allocation106_spill] sm:$0xff]  ;;  %v11374_v24 = vld [vmem:[#allocation161_spill] sm:$0xff] }
 0x407   :  { %v4713_v28 = vadd.f32 %v4712_v21, %v4711_v53  ;;  %v4487_v51 = vmul.f32 %v11361_v47, %v11360_v3  ;;  %v4488_v45 = vmul.f32 %v11363_v36, %v11362_v16  ;;  %v4519_v44 = vmul.f32 %v9759_v63, %v11364_v12  ;;  %v11366_v22 = vld [vmem:[#allocation207_spill] sm:$0xff]  ;;  %v11371_v21 = vld [vmem:[#allocation136_spill] sm:$0xff]  ;;  %v11372_v53 = vld [vmem:[#allocation214_spill] sm:$0xff] }
 0x408   :  { %v4892_v11 = vpack.c.bf16 %v4868_v2, %v4867_v40  ;;  %v4720_v18 = vadd.f32 %v4719_v25, %v4718_v39  ;;  %v4520_v4 = vmul.f32 %v11366_v22, %v11365_v59  ;;  %v11368_v20 = vld [vmem:[#allocation231_spill] sm:$0xff]  ;;  %v4552_v32 = vmul.f32 %v11370_v42, %v11369_v10  ;;  %v11373_v38 = vld [vmem:[#allocation138_spill] sm:$0xff]  ;;  %v11375_v39 = vld [vmem:[#allocation232_spill] sm:$0xff] }
 0x409   :  { %v4551_v23 = vmul.f32 %v11368_v20, %v11367_v27  ;;  %v4715_v34 = vadd.f32 %v4714_v15, %v4713_v28  ;;  %v4583_v43 = vmul.f32 %v11372_v53, %v11371_v21  ;;  %v4584_v3 = vmul.f32 %v11374_v24, %v11373_v38  ;;  %v11376_v12 = vld [vmem:[#allocation163_spill] sm:$0xff]  ;;  %v11378_v20 = vld [vmem:[#allocation66_spill] sm:$0xff]  ;;  %v11380_v42 = vld [vmem:[#allocation77_spill] sm:$0xff] }
 0x40a   :  { %v10307_v47 = vpop.eup %6873  ;;  %6409 = vmatmul.mubr.msk.bf16.gmra.mrb[204].mxu0 %vm2373_vm2, %v4892_v11  ;;  %v4722_v63 = vadd.f32 %v4721_v8, %v4720_v18  ;;  %v4723_v40 = vsel %vm2373_vm2, %v4487_v51, 0.0  ;;  %v4724_v2 = vsel %vm2373_vm2, %v4519_v44, 0.0  ;;  %v4730_v36 = vsel %vm2373_vm2, %v4488_v45, 0.0  ;;  %v11377_v44 = vld [vmem:[#allocation64_spill] sm:$0xff]  ;;  %v11381_v21 = vld [vmem:[#allocation79_spill] sm:$0xff]  ;;  %v11382_v53 = vld [vmem:[#allocation229_spill] sm:$0xff] }
 0x40b   :  { %v4726_v15 = vsel %vm2373_vm2, %v4551_v23, 0.0  ;;  %v4869_v25 = vmul.f32 %v11375_v39, %v4715_v34  ;;  %v4725_v28 = vadd.f32 %v4724_v2, %v4723_v40  ;;  %v4728_v16 = vsel %vm2373_vm2, %v4583_v43, 0.0  ;;  %v11379_v23 = vld [vmem:[#allocation165_spill] sm:$0xff]  ;;  %v11385_v40 = vld [vmem:[#allocation143_spill] sm:$0xff]  ;;  %v11386_v2 = vld [vmem:[#allocation146_spill] sm:$0xff] }
 0x40c   :  { %v4870_v59 = vmul.f32 %v11376_v12, %v4722_v63  ;;  %v4731_v22 = vsel %vm2373_vm2, %v4520_v4, 0.0  ;;  %v4733_v11 = vsel %vm2373_vm2, %v4552_v32, 0.0  ;;  %v4735_v8 = vsel %vm2373_vm2, %v4584_v3, 0.0  ;;  %v11383_v4 = vld [vmem:[#allocation109_spill] sm:$0xff]  ;;  %v11384_v3 = vld [vmem:[#allocation111_spill] sm:$0xff] }
 0x40d   :  { %v4727_v51 = vadd.f32 %v4726_v15, %v4725_v28  ;;  %v4732_v18 = vadd.f32 %v4731_v22, %v4730_v36  ;;  %v4489_v27 = vmul.f32 %v9817_v58, %v11377_v44  ;;  %v4490_v34 = vmul.f32 %v11379_v23, %v11378_v20  ;;  %v11387_v15 = vld [vmem:[#allocation44_spill] sm:$0xff]  ;;  %v11390_v20 = vld [vmem:[#allocation63_spill] sm:$0xff]  ;;  %v11391_v23 = vld [vmem:[#allocation65_spill] sm:$0xff] }
 0x40e   :  { %v4893_v10 = vpack.c.bf16 %v4870_v59, %v4869_v25  ;;  %v4521_v45 = vmul.f32 %v9823_v9, %v11380_v42  ;;  %v4522_v43 = vmul.f32 %v11382_v53, %v11381_v21  ;;  %v4553_v32 = vmul.f32 %v9831_v60, %v11383_v4  ;;  %v11395_v53 = vld [vmem:[#allocation196_spill] sm:$0xff] }
 0x40f   :  { %v4729_v38 = vadd.f32 %v4728_v16, %v4727_v51  ;;  %v4734_v24 = vadd.f32 %v4733_v11, %v4732_v18  ;;  %v4554_v63 = vmul.f32 %v9791_v29, %v11384_v3  ;;  %v4585_v58 = vmul.f32 %v9838_v31, %v11385_v40  ;;  %v11388_v16 = vld [vmem:[#allocation215_spill] sm:$0xff]  ;;  %v11389_v51 = vld [vmem:[#allocation204_spill] sm:$0xff] }
 0x410   :  { %6412 = vmatprep.mubr.msk.bf16.mxu0 %vm2373_vm2, %v4893_v10  ;;  %v4586_v39 = vmul.f32 %v11387_v15, %v11386_v2  ;;  %v4737_v9 = vsel %vm2373_vm2, %v4489_v27, 0.0  ;;  %v4738_v25 = vsel %vm2373_vm2, %v4521_v45, 0.0  ;;  %v4740_v28 = vsel %vm2373_vm2, %v4553_v32, 0.0  ;;  %v11392_v10 = vld [vmem:[#allocation46_spill] sm:$0xff]  ;;  %v11396_v4 = vld [vmem:[#allocation108_spill] sm:$0xff] }
 0x411   :  { %v4736_v60 = vadd.f32 %v4735_v8, %v4734_v24  ;;  %v4871_v36 = vmul.f32 %v11388_v16, %v4729_v38  ;;  %v4739_v12 = vadd.f32 %v4738_v25, %v4737_v9  ;;  %v4742_v29 = vsel %vm2373_vm2, %v4585_v58, 0.0  ;;  %v11393_v45 = vld [vmem:[#allocation42_spill] sm:$0xff]  ;;  %v11399_v2 = vld [vmem:[#allocation144_spill] sm:$0xff] }
 0x412   :  { %v4744_v59 = vsel %vm2373_vm2, %v4490_v34, 0.0  ;;  %v4745_v31 = vsel %vm2373_vm2, %v4522_v43, 0.0  ;;  %v4747_v22 = vsel %vm2373_vm2, %v4554_v63, 0.0  ;;  %v4749_v11 = vsel %vm2373_vm2, %v4586_v39, 0.0  ;;  %v11394_v34 = vld [vmem:[#allocation78_spill] sm:$0xff] }
 0x413   :  { %v4872_v18 = vmul.f32 %v11389_v51, %v4736_v60  ;;  %v4741_v44 = vadd.f32 %v4740_v28, %v4739_v12  ;;  %v4746_v27 = vadd.f32 %v4745_v31, %v4744_v59  ;;  %v4491_v8 = vmul.f32 %v9906_v13, %v11390_v20  ;;  %v11397_v63 = vld [vmem:[#allocation110_spill] sm:$0xff]  ;;  %v11400_v59 = vld [vmem:[#allocation68_spill] sm:$0xff]  ;;  %v11406_v20 = vld [vmem:[#allocation83_spill] sm:$0xff] }
 0x414   :  { %v4492_v42 = vmul.f32 %v11392_v10, %v11391_v23  ;;  %v4523_v21 = vmul.f32 %v9909_v52, %v11393_v45  ;;  %v4524_v43 = vmul.f32 %v11395_v53, %v11394_v34  ;;  %v4555_v32 = vmul.f32 %v9915_v54, %v11396_v4  ;;  %v11398_v58 = vld [vmem:[#allocation142_spill] sm:$0xff]  ;;  %v11401_v31 = vld [vmem:[#allocation76_spill] sm:$0xff]  ;;  %v11410_v53 = vld [vmem:[#allocation115_spill] sm:$0xff] }
 0x415   :  { %v4894_v38 = vpack.c.bf16 %v4872_v18, %v4871_v36  ;;  %v4743_v24 = vadd.f32 %v4742_v29, %v4741_v44  ;;  %v4748_v3 = vadd.f32 %v4747_v22, %v4746_v27  ;;  %v4556_v40 = vmul.f32 %v9864_v37, %v11397_v63  ;;  %v11402_v22 = vld [vmem:[#allocation70_spill] sm:$0xff]  ;;  %v11404_v18 = vld [vmem:[#allocation81_spill] sm:$0xff]  ;;  %v11405_v44 = vld [vmem:[#allocation167_spill] sm:$0xff] }
 0x416   :  { %v4587_v13 = vmul.f32 %v9925_v46, %v11398_v58  ;;  %v4588_v15 = vmul.f32 %v9866_v35, %v11399_v2  ;;  %v4751_v52 = vsel %vm2373_vm2, %v4491_v8, 0.0  ;;  %v4752_v39 = vsel %vm2373_vm2, %v4523_v21, 0.0  ;;  %v11407_v8 = vld [vmem:[#allocation24_spill] sm:$0xff]  ;;  %v11409_v21 = vld [vmem:[#allocation218_spill] sm:$0xff]  ;;  %v11415_v63 = vld [vmem:[#allocation235_spill] sm:$0xff] }
 0x417   :  { %6413 = vmatmul.mubr.msk.bf16.gmra.mrb[208].mxu0 %vm2373_vm2, %v4894_v38  ;;  %v4750_v9 = vadd.f32 %v4749_v11, %v4748_v3  ;;  %v4873_v54 = vmul.f32 %v9904_v7, %v4743_v24  ;;  %v4753_v25 = vadd.f32 %v4752_v39, %v4751_v52  ;;  %v4754_v28 = vsel %vm2373_vm2, %v4555_v32, 0.0  ;;  %v11403_v11 = vld [vmem:[#allocation230_spill] sm:$0xff]  ;;  %v11412_v32 = vld [vmem:[#allocation151_spill] sm:$0xff]  ;;  %v11413_v38 = vld [vmem:[#allocation169_spill] sm:$0xff] }
 0x418   :  { %v4756_v37 = vsel %vm2373_vm2, %v4587_v13, 0.0  ;;  %v4758_v60 = vsel %vm2373_vm2, %v4492_v42, 0.0  ;;  %v4759_v46 = vsel %vm2373_vm2, %v4524_v43, 0.0  ;;  %v4761_v35 = vsel %vm2373_vm2, %v4556_v40, 0.0  ;;  %v11411_v43 = vld [vmem:[#allocation172_spill] sm:$0xff]  ;;  %v11414_v3 = vld [vmem:[#allocation154_spill] sm:$0xff] }
 0x419   :  { %v4874_v16 = vmul.f32 %v9876_v19, %v4750_v9  ;;  %v4755_v36 = vadd.f32 %v4754_v28, %v4753_v25  ;;  %v4760_v12 = vadd.f32 %v4759_v46, %v4758_v60  ;;  %v4763_v29 = vsel %vm2373_vm2, %v4588_v15, 0.0  ;;  %v11408_v19 = vld [vmem:[#allocation113_spill] sm:$0xff]  ;;  %v11416_v28 = vld [vmem:[#allocation166_spill] sm:$0xff] }
 0x41a   :  { %v4493_v7 = vmul.f32 %v11401_v31, %v11400_v59  ;;  %v4494_v51 = vmul.f32 %v11403_v11, %v11402_v22  ;;  %v4525_v27 = vmul.f32 %v11405_v44, %v11404_v18  ;;  %v4526_v23 = vmul.f32 %v11407_v8, %v11406_v20  ;;  %v11420_v31 = vld [vmem:[#allocation80_spill] sm:$0xff]  ;;  %v11422_v18 = vld [vmem:[#allocation82_spill] sm:$0xff]  ;;  %v11423_v44 = vld [vmem:[#allocation89_spill] sm:$0xff] }
 0x41b   :  { %v4895_v10 = vpack.c.bf16 %v4874_v16, %v4873_v54  ;;  %v4757_v42 = vadd.f32 %v4756_v37, %v4755_v36  ;;  %v4762_v45 = vadd.f32 %v4761_v35, %v4760_v12  ;;  %v4557_v34 = vmul.f32 %v11409_v21, %v11408_v19  ;;  %v11418_v12 = vld [vmem:[#allocation69_spill] sm:$0xff]  ;;  %v11424_v20 = vld [vmem:[#allocation112_spill] sm:$0xff]  ;;  %v11425_v8 = vld [vmem:[#allocation123_spill] sm:$0xff] }
 0x41c   :  { %v4558_v4 = vmul.f32 %v11411_v43, %v11410_v53  ;;  %v4589_v24 = vmul.f32 %v11413_v38, %v11412_v32  ;;  %v4590_v40 = vmul.f32 %v11415_v63, %v11414_v3  ;;  %v4765_v58 = vsel %vm2373_vm2, %v4493_v7, 0.0  ;;  %v11421_v7 = vld [vmem:[#allocation200_spill] sm:$0xff]  ;;  %v11428_v21 = vld [vmem:[#allocation150_spill] sm:$0xff]  ;;  %v11431_v43 = vld [vmem:[#allocation91_spill] sm:$0xff] }
 0x41d   :  { %6416 = vmatprep.mubr.msk.bf16.mxu0 %vm2373_vm2, %v4895_v10  ;;  %v4764_v13 = vadd.f32 %v4763_v29, %v4762_v45  ;;  %v4875_v2 = vmul.f32 %v10006_v14, %v4757_v42  ;;  %v4766_v15 = vsel %vm2373_vm2, %v4525_v27, 0.0  ;;  %v4768_v52 = vsel %vm2373_vm2, %v4557_v34, 0.0  ;;  %v11417_v14 = vld [vmem:[#allocation67_spill] sm:$0xff]  ;;  %v11419_v29 = vld [vmem:[#allocation233_spill] sm:$0xff]  ;;  %v11426_v42 = vld [vmem:[#allocation114_spill] sm:$0xff] }
 0x41e   :  { %v4767_v39 = vadd.f32 %v4766_v15, %v4765_v58  ;;  %v4770_v9 = vsel %vm2373_vm2, %v4589_v24, 0.0  ;;  %v4772_v54 = vsel %vm2373_vm2, %v4494_v51, 0.0  ;;  %v4773_v25 = vsel %vm2373_vm2, %v4526_v23, 0.0  ;;  %v11427_v45 = vld [vmem:[#allocation168_spill] sm:$0xff]  ;;  %v11432_v63 = vld [vmem:[#allocation121_spill] sm:$0xff] }
 0x41f   :  { %v4876_v37 = vmul.f32 %v11416_v28, %v4764_v13  ;;  %v4774_v60 = vadd.f32 %v4773_v25, %v4772_v54  ;;  %v4775_v46 = vsel %vm2373_vm2, %v4558_v4, 0.0  ;;  %v4777_v35 = vsel %vm2373_vm2, %v4590_v40, 0.0  ;;  %v11430_v53 = vld [vmem:[#allocation152_spill] sm:$0xff] }
 0x420   :  { %v4769_v16 = vadd.f32 %v4768_v52, %v4767_v39  ;;  %v4495_v36 = vmul.f32 %v10038_v48, %v11417_v14  ;;  %v4496_v59 = vmul.f32 %v11419_v29, %v11418_v12  ;;  %v4527_v22 = vmul.f32 %v11421_v7, %v11420_v31  ;;  %v11429_v48 = vld [vmem:[#allocation197_spill] sm:$0xff]  ;;  %v11433_v15 = vld [vmem:[#allocation164_spill] sm:$0xff]  ;;  %v11438_v29 = vld [vmem:[#allocation87_spill] sm:$0xff] }
 0x421   :  { %v4896_v11 = vpack.c.bf16 %v4876_v37, %v4875_v2  ;;  %v4776_v51 = vadd.f32 %v4775_v46, %v4774_v60  ;;  %v4528_v27 = vmul.f32 %v11423_v44, %v11422_v18  ;;  %v4559_v23 = vmul.f32 %v11425_v8, %v11424_v20  ;;  %v11434_v37 = vld [vmem:[#allocation72_spill] sm:$0xff]  ;;  %v11435_v46 = vld [vmem:[#allocation74_spill] sm:$0xff]  ;;  %v11440_v7 = vld [vmem:[#allocation117_spill] sm:$0xff] }
 0x422   :  { %v4771_v10 = vadd.f32 %v4770_v9, %v4769_v16  ;;  %v4560_v19 = vmul.f32 %v11427_v45, %v11426_v42  ;;  %v4591_v34 = vmul.f32 %v11429_v48, %v11428_v21  ;;  %v4592_v4 = vmul.f32 %v11431_v43, %v11430_v53  ;;  %v11441_v18 = vld [vmem:[#allocation119_spill] sm:$0xff]  ;;  %v11442_v44 = vld [vmem:[#allocation234_spill] sm:$0xff] }
 0x423   :  { %6417 = vmatmul.mubr.msk.bf16.gmra.mrb[212].mxu0 %vm2373_vm2, %v4896_v11  ;;  %v4778_v32 = vadd.f32 %v4777_v35, %v4776_v51  ;;  %v4779_v38 = vsel %vm2373_vm2, %v4495_v36, 0.0  ;;  %v4780_v24 = vsel %vm2373_vm2, %v4527_v22, 0.0  ;;  %v4782_v3 = vsel %vm2373_vm2, %v4559_v23, 0.0  ;;  %v11436_v35 = vld [vmem:[#allocation219_spill] sm:$0xff]  ;;  %v11437_v36 = vld [vmem:[#allocation85_spill] sm:$0xff]  ;;  %v11444_v8 = vld [vmem:[#allocation162_spill] sm:$0xff] }
 0x424   :  { %v4877_v40 = vmul.f32 %v11432_v63, %v4771_v10  ;;  %v4781_v58 = vadd.f32 %v4780_v24, %v4779_v38  ;;  %v4784_v13 = vsel %vm2373_vm2, %v4591_v34, 0.0  ;;  %v4786_v2 = vsel %vm2373_vm2, %v4496_v59, 0.0  ;;  %v11439_v59 = vld [vmem:[#allocation171_spill] sm:$0xff] }
 0x425   :  { %v4878_v52 = vmul.f32 %v11433_v15, %v4778_v32  ;;  %v4787_v39 = vsel %vm2373_vm2, %v4528_v27, 0.0  ;;  %v4789_v9 = vsel %vm2373_vm2, %v4560_v19, 0.0  ;;  %v4791_v54 = vsel %vm2373_vm2, %v4592_v4, 0.0  ;;  %v11443_v20 = vld [vmem:[#allocation159_spill] sm:$0xff]  ;;  %v11446_v4 = vld [vmem:[#allocation236_spill] sm:$0xff] }
 0x426   :  { %v4783_v25 = vadd.f32 %v4782_v3, %v4781_v58  ;;  %v4788_v28 = vadd.f32 %v4787_v39, %v4786_v2  ;;  %v4497_v60 = vmul.f32 %v10129_v30, %v11434_v37  ;;  %v4498_v16 = vmul.f32 %v11436_v35, %v11435_v46  ;;  %v11445_v23 = vld [vmem:[#allocation239_spill] sm:$0xff]  ;;  %v11449_v58 = vld [vmem:[#allocation84_spill] sm:$0xff]  ;;  %v11450_v2 = vld [vmem:[#allocation86_spill] sm:$0xff] }
 0x427   :  { %v4897_v14 = vpack.c.bf16 %v4878_v52, %v4877_v40  ;;  %v4529_v12 = vmul.f32 %v10143_v33, %v11437_v36  ;;  %v4530_v31 = vmul.f32 %v11439_v59, %v11438_v29  ;;  %v4561_v22 = vmul.f32 %v10151_v1, %v11440_v7  ;;  %v11447_v3 = vld [vmem:[#allocation71_spill] sm:$0xff]  ;;  %v11448_v40 = vld [vmem:[#allocation73_spill] sm:$0xff]  ;;  %v11451_v52 = vld [vmem:[#allocation116_spill] sm:$0xff] }
 0x428   :  { %v4785_v11 = vadd.f32 %v4784_v13, %v4783_v25  ;;  %v4790_v51 = vadd.f32 %v4789_v9, %v4788_v28  ;;  %v4562_v27 = vmul.f32 %v11442_v44, %v11441_v18  ;;  %v4593_v30 = vmul.f32 %v10158_v49, %v11443_v20  ;;  %v11452_v28 = vld [vmem:[#allocation118_spill] sm:$0xff]  ;;  %v11454_v46 = vld [vmem:[#allocation160_spill] sm:$0xff] }
 0x429   :  { %6420 = vmatprep.mubr.msk.bf16.mxu0 %vm2373_vm2, %v4897_v14  ;;  %v4594_v10 = vmul.f32 %v11445_v23, %v11444_v8  ;;  %v4793_v33 = vsel %vm2373_vm2, %v4497_v60, 0.0  ;;  %v4794_v42 = vsel %vm2373_vm2, %v4529_v12, 0.0  ;;  %v4796_v45 = vsel %vm2373_vm2, %v4561_v22, 0.0  ;;  %v11453_v60 = vld [vmem:[#allocation158_spill] sm:$0xff] }
 0x42a   :  { %v4792_v1 = vadd.f32 %v4791_v54, %v4790_v51  ;;  %v4879_v19 = vmul.f32 %v10136_v62, %v4785_v11  ;;  %v4795_v21 = vadd.f32 %v4794_v42, %v4793_v33  ;;  %v4798_v48 = vsel %vm2373_vm2, %v4593_v30, 0.0 }
 0x42b   :  { %v4800_v34 = vsel %vm2373_vm2, %v4498_v16, 0.0  ;;  %v4801_v49 = vsel %vm2373_vm2, %v4530_v31, 0.0  ;;  %v4803_v53 = vsel %vm2373_vm2, %v4562_v27, 0.0  ;;  %v4805_v43 = vsel %vm2373_vm2, %v4594_v10, 0.0 }
 0x42c   :  { %v4880_v32 = vmul.f32 %v11446_v4, %v4792_v1  ;;  %v4797_v38 = vadd.f32 %v4796_v45, %v4795_v21  ;;  %v4802_v24 = vadd.f32 %v4801_v49, %v4800_v34  ;;  %v4499_v63 = vmul.f32 %v10213_v50, %v11447_v3 }
 0x42d   :  { %v4500_v62 = vmul.f32 %v10163_v55, %v11448_v40  ;;  %v4531_v13 = vmul.f32 %v10218_v5, %v11449_v58  ;;  %v4532_v15 = vmul.f32 %v10171_v56, %v11450_v2  ;;  %v4563_v39 = vmul.f32 %v10225_v26, %v11451_v52 }
 0x42e   :  { %v4898_v9 = vpack.c.bf16 %v4880_v32, %v4879_v19  ;;  %v4799_v54 = vadd.f32 %v4798_v48, %v4797_v38  ;;  %v4804_v25 = vadd.f32 %v4803_v53, %v4802_v24  ;;  %v4564_v37 = vmul.f32 %v10177_v61, %v11452_v28 }
 0x42f   :  { %v4595_v50 = vmul.f32 %v10237_v6, %v11453_v60  ;;  %v4596_v55 = vmul.f32 %v10181_v57, %v11454_v46  ;;  %v4807_v5 = vsel %vm2373_vm2, %v4499_v63, 0.0  ;;  %v4808_v35 = vsel %vm2373_vm2, %v4531_v13, 0.0 }
 0x430   :  { %6421 = vmatmul.mubr.msk.bf16.gmra.mrb[216].mxu0 %vm2373_vm2, %v4898_v9  ;;  %v4806_v56 = vadd.f32 %v4805_v43, %v4804_v25  ;;  %v4881_v26 = vmul.f32 %v10231_v0, %v4799_v54  ;;  %v4809_v16 = vadd.f32 %v4808_v35, %v4807_v5  ;;  %v4810_v14 = vsel %vm2373_vm2, %v4563_v39, 0.0 }
 0x431   :  { %v4814_v61 = vsel %vm2373_vm2, %v4500_v62, 0.0  ;;  %v4815_v36 = vsel %vm2373_vm2, %v4532_v15, 0.0  ;;  %v4812_v29 = vsel %vm2373_vm2, %v4595_v50, 0.0  ;;  %v4817_v59 = vsel %vm2373_vm2, %v4564_v37, 0.0 }
 0x432   :  { %v4882_v6 = vmul.f32 %v10167_v41, %v4806_v56  ;;  %v4811_v12 = vadd.f32 %v4810_v14, %v4809_v16  ;;  %v4816_v57 = vadd.f32 %v4815_v36, %v4814_v61  ;;  %v4819_v0 = vsel %vm2373_vm2, %v4596_v55, 0.0  ;;  %v10486_v41 = vld [vmem:[#allocation14] ss:$0 sm:$0xff] }
 0x434   :  { %v4899_v31 = vpack.c.bf16 %v4882_v6, %v4881_v26  ;;  %v4813_v7 = vadd.f32 %v4812_v29, %v4811_v12  ;;  %v4818_v22 = vadd.f32 %v4817_v59, %v4816_v57 }
 0x436   :  { %6424 = vmatprep.mubr.msk.bf16.mxu0 %vm2373_vm2, %v4899_v31  ;;  %v4820_v11 = vadd.f32 %v4819_v0, %v4818_v22  ;;  %v4883_v51 = vmul.f32 %v10307_v47, %v4813_v7 }
 0x438   :  { %v4884_v18 = vmul.f32 %v10257_v17, %v4820_v11 }
 0x43a   :  { %v4900_v44 = vpack.c.bf16 %v4884_v18, %v4883_v51 }
 0x43c   :  { %6425 = vmatmul.mubr.msk.bf16.gmra.mrb[220].mxu0 %vm2373_vm2, %v4900_v44 }
 0x481   :  { %v6398_v27 = vpop.f32.mrb[192].mxu0 }
 0x482   :  { %v5031_v20 = vadd.f32 %v6398_v27, %v10486_v41  ;;  %v5022_v30 = vpop.f32.mrb[193].mxu0 }
 0x483   :  { %v5023_v8 = vadd.f32 %v10486_v41, %v5022_v30  ;;  %v6399_v23 = vpop.f32.mrb[194].mxu0 }
 0x484   :  { %5151 = vst.msk [vmem:[#allocation17 + $0x10] sm:$0xff] %vm280_vm1, %v5031_v20  ;;  %v5034_v10 = vadd.f32 %v6399_v23, %v10486_v41  ;;  %v5025_v33 = vpop.f32.mrb[195].mxu0 }
 0x485   :  { %5149 = vst.msk [vmem:[#allocation17] sm:$0xff] %vm280_vm1, %v5023_v8  ;;  %v5026_v17 = vadd.f32 %v10486_v41, %v5025_v33 }
 0x486   :  { %5152 = vst.msk [vmem:[#allocation17 + $0x18] sm:$0xff] %vm280_vm1, %v5034_v10 }
 0x487   :  { %5150 = vst.msk [vmem:[#allocation17 + $0x8] sm:$0xff] %vm280_vm1, %v5026_v17 }
 0x4af   :  { %v6402_v47 = vpop.f32.mrb[196].mxu0 }
 0x4b0   :  { %v5047_v42 = vadd.f32 %v6402_v47, %v10486_v41  ;;  %v5038_v45 = vpop.f32.mrb[197].mxu0 }
 0x4b1   :  { %v5039_v1 = vadd.f32 %v10486_v41, %v5038_v45  ;;  %v6403_v19 = vpop.f32.mrb[198].mxu0 }
 0x4b2   :  { %5155 = vst.msk [vmem:[#allocation17 + $0x30] sm:$0xff] %vm280_vm1, %v5047_v42  ;;  %v5050_v21 = vadd.f32 %v6403_v19, %v10486_v41  ;;  %v5041_v48 = vpop.f32.mrb[199].mxu0 }
 0x4b3   :  { %5153 = vst.msk [vmem:[#allocation17 + $0x20] sm:$0xff] %vm280_vm1, %v5039_v1  ;;  %v5042_v34 = vadd.f32 %v10486_v41, %v5041_v48 }
 0x4b4   :  { %5156 = vst.msk [vmem:[#allocation17 + $0x38] sm:$0xff] %vm280_vm1, %v5050_v21 }
 0x4b5   :  { %5154 = vst.msk [vmem:[#allocation17 + $0x28] sm:$0xff] %vm280_vm1, %v5042_v34 }
 0x4ce   :  { %v6406_v49 = vpop.f32.mrb[200].mxu0 }
 0x4cf   :  { %v5063_v53 = vadd.f32 %v6406_v49, %v10486_v41  ;;  %v5054_v43 = vpop.f32.mrb[201].mxu0 }
 0x4d0   :  { %v5055_v4 = vadd.f32 %v10486_v41, %v5054_v43  ;;  %v6407_v32 = vpop.f32.mrb[202].mxu0 }
 0x4d1   :  { %5159 = vst.msk [vmem:[#allocation17 + $0x50] sm:$0xff] %vm280_vm1, %v5063_v53  ;;  %v5066_v38 = vadd.f32 %v6407_v32, %v10486_v41  ;;  %v5057_v24 = vpop.f32.mrb[203].mxu0 }
 0x4d2   :  { %5157 = vst.msk [vmem:[#allocation17 + $0x40] sm:$0xff] %vm280_vm1, %v5055_v4  ;;  %v5058_v3 = vadd.f32 %v10486_v41, %v5057_v24 }
 0x4d3   :  { %5160 = vst.msk [vmem:[#allocation17 + $0x58] sm:$0xff] %vm280_vm1, %v5066_v38 }
 0x4d4   :  { %5158 = vst.msk [vmem:[#allocation17 + $0x48] sm:$0xff] %vm280_vm1, %v5058_v3 }
 0x4dd   :  { %v6410_v63 = vpop.f32.mrb[204].mxu0 }
 0x4de   :  { %v5079_v40 = vadd.f32 %v6410_v63, %v10486_v41  ;;  %v5070_v62 = vpop.f32.mrb[205].mxu0 }
 0x4df   :  { %v5071_v58 = vadd.f32 %v10486_v41, %v5070_v62  ;;  %v6411_v13 = vpop.f32.mrb[206].mxu0 }
 0x4e0   :  { %5163 = vst.msk [vmem:[#allocation17 + $0x70] sm:$0xff] %vm280_vm1, %v5079_v40  ;;  %v5082_v2 = vadd.f32 %v6411_v13, %v10486_v41  ;;  %v5073_v15 = vpop.f32.mrb[207].mxu0 }
 0x4e1   :  { %5161 = vst.msk [vmem:[#allocation17 + $0x60] sm:$0xff] %vm280_vm1, %v5071_v58  ;;  %v5074_v52 = vadd.f32 %v10486_v41, %v5073_v15 }
 0x4e2   :  { %5164 = vst.msk [vmem:[#allocation17 + $0x78] sm:$0xff] %vm280_vm1, %v5082_v2 }
 0x4e3   :  { %5162 = vst.msk [vmem:[#allocation17 + $0x68] sm:$0xff] %vm280_vm1, %v5074_v52 }
 0x4ea   :  { %v6414_v39 = vpop.f32.mrb[208].mxu0 }
 0x4eb   :  { %v5095_v9 = vadd.f32 %v6414_v39, %v10486_v41  ;;  %v5086_v54 = vpop.f32.mrb[209].mxu0 }
 0x4ec   :  { %v5087_v25 = vadd.f32 %v10486_v41, %v5086_v54  ;;  %v6415_v28 = vpop.f32.mrb[210].mxu0 }
 0x4ed   :  { %5167 = vst.msk [vmem:[#allocation17 + $0x90] sm:$0xff] %vm280_vm1, %v5095_v9  ;;  %v5098_v37 = vadd.f32 %v6415_v28, %v10486_v41  ;;  %v5089_v60 = vpop.f32.mrb[211].mxu0 }
 0x4ee   :  { %5165 = vst.msk [vmem:[#allocation17 + $0x80] sm:$0xff] %vm280_vm1, %v5087_v25  ;;  %v5090_v50 = vadd.f32 %v10486_v41, %v5089_v60 }
 0x4ef   :  { %5168 = vst.msk [vmem:[#allocation17 + $0x98] sm:$0xff] %vm280_vm1, %v5098_v37 }
 0x4f0   :  { %5166 = vst.msk [vmem:[#allocation17 + $0x88] sm:$0xff] %vm280_vm1, %v5090_v50 }
 0x4f6   :  { %v6418_v46 = vpop.f32.mrb[212].mxu0 }
 0x4f7   :  { %v5111_v55 = vadd.f32 %v6418_v46, %v10486_v41  ;;  %v5102_v5 = vpop.f32.mrb[213].mxu0 }
 0x4f8   :  { %v5103_v35 = vadd.f32 %v10486_v41, %v5102_v5  ;;  %v6419_v56 = vpop.f32.mrb[214].mxu0 }
 0x4f9   :  { %5171 = vst.msk [vmem:[#allocation17 + $0xb0] sm:$0xff] %vm280_vm1, %v5111_v55  ;;  %v5114_v26 = vadd.f32 %v6419_v56, %v10486_v41  ;;  %v5105_v16 = vpop.f32.mrb[215].mxu0 }
 0x4fa   :  { %5169 = vst.msk [vmem:[#allocation17 + $0xa0] sm:$0xff] %vm280_vm1, %v5103_v35  ;;  %v5106_v14 = vadd.f32 %v10486_v41, %v5105_v16 }
 0x4fb   :  { %5172 = vst.msk [vmem:[#allocation17 + $0xb8] sm:$0xff] %vm280_vm1, %v5114_v26 }
 0x4fc   :  { %5170 = vst.msk [vmem:[#allocation17 + $0xa8] sm:$0xff] %vm280_vm1, %v5106_v14 }
 0x503   :  { %v6422_v61 = vpop.f32.mrb[216].mxu0 }
 0x504   :  { %v5127_v36 = vadd.f32 %v6422_v61, %v10486_v41  ;;  %v5118_v6 = vpop.f32.mrb[217].mxu0 }
 0x505   :  { %v5119_v12 = vadd.f32 %v10486_v41, %v5118_v6  ;;  %v6423_v57 = vpop.f32.mrb[218].mxu0 }
 0x506   :  { %5175 = vst.msk [vmem:[#allocation17 + $0xd0] sm:$0xff] %vm280_vm1, %v5127_v36  ;;  %v5130_v29 = vadd.f32 %v6423_v57, %v10486_v41  ;;  %v5121_v59 = vpop.f32.mrb[219].mxu0 }
 0x507   :  { %5173 = vst.msk [vmem:[#allocation17 + $0xc0] sm:$0xff] %vm280_vm1, %v5119_v12  ;;  %v5122_v31 = vadd.f32 %v10486_v41, %v5121_v59 }
 0x508   :  { %5176 = vst.msk [vmem:[#allocation17 + $0xd8] sm:$0xff] %vm280_vm1, %v5130_v29 }
 0x509   :  { %5174 = vst.msk [vmem:[#allocation17 + $0xc8] sm:$0xff] %vm280_vm1, %v5122_v31 }
 0x50f   :  { %v6426_v7 = vpop.f32.mrb[220].mxu0 }
 0x510   :  { %v5143_v22 = vadd.f32 %v6426_v7, %v10486_v41  ;;  %v5134_v0 = vpop.f32.mrb[221].mxu0 }
 0x511   :  { %v5135_v11 = vadd.f32 %v10486_v41, %v5134_v0  ;;  %v6427_v51 = vpop.f32.mrb[222].mxu0 }
 0x512   :  { %5179 = vst.msk [vmem:[#allocation17 + $0xf0] sm:$0xff] %vm280_vm1, %v5143_v22  ;;  %v5146_v18 = vadd.f32 %v6427_v51, %v10486_v41  ;;  %v5137_v44 = vpop.f32.mrb[223].mxu0 }
 0x513   :  { %5177 = vst.msk [vmem:[#allocation17 + $0xe0] sm:$0xff] %vm280_vm1, %v5135_v11  ;;  %v5138_v27 = vadd.f32 %v10486_v41, %v5137_v44 }
 0x514   :  { %5180 = vst.msk [vmem:[#allocation17 + $0xf8] sm:$0xff] %vm280_vm1, %v5146_v18 }
 0x515   :  { %5178 = vst.msk [vmem:[#allocation17 + $0xe8] sm:$0xff] %vm280_vm1, %v5138_v27 }
 0x516   :  { %7084 = shalt.err (!%p7081_p6)
}
 0x517   :  { %s7085_s29 = scalar_lea.hbm %s10576_s9, 4096 }
 0x518   :  { %p7086_p7 = scmp.ne.s32.totalorder %s10576_s9, %s7085_s29  ;;  %p7089_p8 = scmp.lt.u32.totalorder %s7085_s29, %s10576_s9 }
 0x51a   :  { %p7091_p9 = pnand %p7089_p8, %p7086_p7 }
 0x51c   :  { %7094 = shalt.err (!%p7091_p9)
}
 0x51d   :  { %5192 = dma.vmem_to_hbm [thread:$0]  %s5187_s27, 4096, %s10576_s9, [#allocation4], %s7118_s6, %s7118_s6, %s7119_s19  }
 0x51e   :  { %7105 = dma.done.wait [#allocation4], 4096  }
 0x51f   :  { %7106 = vsyncadd [#allocation4], 4294963200 }
 0x520   :  { %5196 = vsyncpa [#allocation3], 1 }
 0x521   :  { %5197 = vsyncpa [#allocation6], 1 }
 0x522   :  { %5198 = vsyncpa [#allocation9], 1 }
 0x523   :  { %5199 = vsyncpa [#allocation12], 1 }
 0x524   :  { %5200 = vsyncpa [#allocation15], 1 }
 0x525   :  { %5201 = vsyncpa [#allocation4], 1 }

</bundles_post_ra>
